<compile_context>
chip_gen: v5e
topology: v5e:2x2
jax: 0.10.0
libtpu: 0.0.40
codegen_flags: <defaults>
</compile_context>

<pallas_src>
import math
import numpy as np

import jax
import jax.numpy as jnp
from jax.experimental import pallas as pl
from jax.experimental.pallas import tpu as pltpu

# ----------------------------- configuration --------------------------------
DIM = 32                      # embedding dim C
NUM_HEADS = 4                 # head_dim = 8
INPUT_RESOLUTION = (4, 6, 8)  # (Pl, Lat, Lon)  -> L = 192
WINDOW_SIZE = (2, 3, 4)       # (win_pl, win_lat, win_lon) -> N = 24 tokens / window
SHIFT_SIZE = (1, 1, 2)        # nonzero -> shifted-window branch (roll=True)
MLP_RATIO = 4.0
BATCH = 2
LN_EPS = 1e-5
DTYPE = jnp.float32
BIAS_DTYPE = jnp.bfloat16     # bias is storage-only bf16; cast to f32 inside the kernel
NEG_INF = -1e9                # cross-window mask value (exp underflows to exactly 0)


# ----------------------------- static helpers (numpy) -----------------------
def get_earth_position_index(window_size):
    win_pl, win_lat, win_lon = window_size
    coords_zi = np.arange(win_pl)
    coords_zj = -np.arange(win_pl) * win_pl
    coords_hi = np.arange(win_lat)
    coords_hj = -np.arange(win_lat) * win_lat
    coords_w = np.arange(win_lon)
    coords_1 = np.stack(np.meshgrid(coords_zi, coords_hi, coords_w, indexing="ij"))
    coords_2 = np.stack(np.meshgrid(coords_zj, coords_hj, coords_w, indexing="ij"))
    cf1 = coords_1.reshape(3, -1)
    cf2 = coords_2.reshape(3, -1)
    coords = cf1[:, :, None] - cf2[:, None, :]
    coords = coords.transpose(1, 2, 0).copy()
    coords[:, :, 2] += win_lon - 1
    coords[:, :, 1] *= 2 * win_lon - 1
    coords[:, :, 0] *= (2 * win_lon - 1) * win_lat * win_lat
    return coords.sum(-1)  # (N, N) int


def get_pad3d(input_resolution, window_size):
    Pl, Lat, Lon = input_resolution
    win_pl, win_lat, win_lon = window_size
    pL = pR = pT = pB = pF = pBk = 0
    if Pl % win_pl:
        pad = win_pl - Pl % win_pl
        pF = pad // 2
        pBk = pad - pF
    if Lat % win_lat:
        pad = win_lat - Lat % win_lat
        pT = pad // 2
        pB = pad - pT
    if Lon % win_lon:
        pad = win_lon - Lon % win_lon
        pL = pad // 2
        pR = pad - pL
    return (pL, pR, pT, pB, pF, pBk)


def window_partition(x, window_size):
    # x: (B, Pl, Lat, Lon, C) -> (B*num_lon, num_pl*num_lat, win_pl, win_lat, win_lon, C)
    B, Pl, Lat, Lon, C = x.shape
    win_pl, win_lat, win_lon = window_size
    x = x.reshape(B, Pl // win_pl, win_pl, Lat // win_lat, win_lat, Lon // win_lon, win_lon, C)
    x = x.transpose(0, 5, 1, 3, 2, 4, 6, 7)
    return x.reshape(-1, (Pl // win_pl) * (Lat // win_lat), win_pl, win_lat, win_lon, C)


def window_reverse(windows, window_size, Pl, Lat, Lon):
    win_pl, win_lat, win_lon = window_size
    B = windows.shape[0] // (Lon // win_lon)
    x = windows.reshape(B, Lon // win_lon, Pl // win_pl, Lat // win_lat, win_pl, win_lat, win_lon, -1)
    x = x.transpose(0, 2, 4, 3, 5, 1, 6, 7)
    return x.reshape(B, Pl, Lat, Lon, -1)


def crop3d_channels_last(x, resolution):
    _, Pl, Lat, Lon, _ = x.shape
    pl_pad = Pl - resolution[0]
    lat_pad = Lat - resolution[1]
    lon_pad = Lon - resolution[2]
    pf = pl_pad // 2
    pb = pl_pad - pf
    pt = lat_pad // 2
    pbm = lat_pad - pt
    pl_ = lon_pad // 2
    pr = lon_pad - pl_
    return x[:, pf:Pl - pb, pt:Lat - pbm, pl_:Lon - pr, :]


def get_shift_window_mask(input_resolution, window_size, shift_size):
    Pl, Lat, Lon = input_resolution
    win_pl, win_lat, win_lon = window_size
    shift_pl, shift_lat, shift_lon = shift_size
    img_mask = np.zeros((1, Pl, Lat, Lon + shift_lon, 1), dtype=np.float64)
    pl_slices = (slice(0, -win_pl), slice(-win_pl, -shift_pl), slice(-shift_pl, None))
    lat_slices = (slice(0, -win_lat), slice(-win_lat, -shift_lat), slice(-shift_lat, None))
    lon_slices = (slice(0, -win_lon), slice(-win_lon, -shift_lon), slice(-shift_lon, None))
    cnt = 0
    for ps in pl_slices:
        for ls in lat_slices:
            for ws in lon_slices:
                img_mask[:, ps, ls, ws, :] = cnt
                cnt += 1
    img_mask = img_mask[:, :, :, :Lon, :]
    mask_windows = window_partition(img_mask, window_size)
    win_total = win_pl * win_lat * win_lon
    mask_windows = mask_windows.reshape(mask_windows.shape[0], mask_windows.shape[1], win_total)
    attn_mask = mask_windows[:, :, None, :] - mask_windows[:, :, :, None]
    attn_mask = np.where(attn_mask != 0, -100.0, 0.0)
    return attn_mask.astype(np.float32)  # (nLon, nW, N, N)


# ----------------------------- block-size helpers ----------------------------
def _attention_grid_steps(B_, nW_, N):
    """One (batch, lon) window-group per grid step (G=4 here, rows=96): halves the masked
    off-diagonal work vs G=2, keeps per-head scores at ~12 vregs, and provides >=2
    pipelined steps per TensorCore on v7x / DMA overlap on single-TC v5e/v6e."""
    if (nW_ * N) % 8 == 0:
        return B_
    if B_ % 2 == 0 and ((B_ // 2) * nW_ * N) % 8 == 0:
        return 2
    return 1


def _split_rows(R, max_block=2048):
    """Row-block picker for the elementwise/MLP kernels: >=2 steps when possible, big
    blocks, second-minor block dim multiple of 8."""
    G = 2 if (R % 2 == 0 and (R // 2) % 8 == 0) else 1
    while R // G > max_block and R % (G * 2) == 0 and (R // (G * 2)) % 8 == 0:
        G *= 2
    return G, R // G


# ----------------------------- Pallas kernels --------------------------------
def _erf_approx(x):
    # Abramowitz-Stegun 7.1.26 (|err| < 1.5e-7): exact-GELU semantics with guaranteed
    # lowerable ops (exp/abs/where) inside the Mosaic kernel.
    a1, a2, a3, a4, a5 = 0.254829592, -0.284496736, 1.421413741, -1.453152027, 1.061405429
    p = 0.3275911
    ax = jnp.abs(x)
    t = 1.0 / (1.0 + p * ax)
    poly = ((((a5 * t + a4) * t + a3) * t + a2) * t + a1) * t
    y = 1.0 - poly * jnp.exp(-ax * ax)
    return jnp.where(x >= 0, y, -y)


def layernorm_pallas(x2d, w, b, eps=LN_EPS):
    """Standalone norm1 (only used when window padding is nonzero, i.e. LN cannot be
    fused into the attention kernel)."""
    R, C = x2d.shape
    G, block_rows = _split_rows(R)

    def kernel(x_ref, w_ref, b_ref, o_ref):
        x = x_ref[...]
        mu = jnp.mean(x, axis=-1, keepdims=True)
        var = jnp.mean((x - mu) ** 2, axis=-1, keepdims=True)
        o_ref[...] = ((x - mu) * jax.lax.rsqrt(var + eps) * w_ref[...] + b_ref[...]).astype(o_ref.dtype)

    return pl.pallas_call(
        kernel,
        out_shape=jax.ShapeDtypeStruct((R, C), x2d.dtype),
        grid_spec=pltpu.PrefetchScalarGridSpec(
            num_scalar_prefetch=0,
            grid=(G,),
            in_specs=[
                pl.BlockSpec((block_rows, C), lambda i: (i, 0)),
                pl.BlockSpec((1, C), lambda i: (0, 0)),
                pl.BlockSpec((1, C), lambda i: (0, 0)),
            ],
            out_specs=pl.BlockSpec((block_rows, C), lambda i: (i, 0)),
        ),
        compiler_params=pltpu.CompilerParams(dimension_semantics=("parallel",)),
    )(x2d, w.reshape(1, C), b.reshape(1, C))


def attention_pallas(x_tokens, bias_dense, ln_w, ln_b, qkv_w, qkv_b, proj_w, proj_b,
                     num_heads, scale, fuse_ln, eps=LN_EPS):
    """Fused (optional norm1) + windowed multi-head attention + output projection.

    x_tokens  : (B_*nW_*N, C)  window tokens in partition order (row = ((b_*nW_+w)*N+n)).
    bias_dense: (G, H, rows, rows) bf16 block-diagonal per-step bias; diagonal (N,N) blocks
                hold shift-mask + earth position bias, off-diagonal entries are -1e9 so the
                single lane-dense (rows, rows) softmax per head reproduces the per-window
                softmax exactly (exp underflows to 0 off-window).
    """
    R, C = x_tokens.shape
    H = num_heads
    HD = C // H
    G = bias_dense.shape[0]
    rows = bias_dense.shape[2]
    assert R == G * rows

    def kernel(x_ref, bias_ref, lnw_ref, lnb_ref, qkvw_ref, qkvb_ref, pw_ref, pb_ref, o_ref):
        x = x_ref[...]                                                      # (rows, C)
        if fuse_ln:                                                         # fused norm1
            mu = jnp.mean(x, axis=-1, keepdims=True)
            var = jnp.mean((x - mu) ** 2, axis=-1, keepdims=True)
            x = (x - mu) * jax.lax.rsqrt(var + eps) * lnw_ref[...] + lnb_ref[...]
        # Batched QKV projection over every window token of this step: (rows, C) @ (C, 3C).
        qkv = jnp.dot(x, qkvw_ref[...], preferred_element_type=jnp.float32) + qkvb_ref[...]
        q = qkv[:, :C] * scale              # softmax scale folded into q ((rows,C) mul only)
        k = qkv[:, C:2 * C]
        v = qkv[:, 2 * C:]
        # Head-column ids (hoisted): masks keep every MXU operand 32-lane aligned (no 8-lane
        # head slices feeding the MXU) and place each head's output in its column block.
        lane = jax.lax.broadcasted_iota(jnp.int32, (rows, C), 1)
        acc = jnp.zeros((rows, C), jnp.float32)
        for h in range(H):                                                  # unrolled, H=4
            hm = jnp.logical_and(lane >= h * HD, lane < (h + 1) * HD)
            kh = jnp.where(hm, k, 0.0)                                      # head-masked K
            vh = jnp.where(hm, v, 0.0)                                      # head-masked V
            # One lane-dense score matrix for all windows of the step; the block-diagonal
            # bias (-1e9 off-window) zeroes cross-window attention after exp().
            s = jax.lax.dot_general(q, kh, (((1,), (1,)), ((), ())),
                                    preferred_element_type=jnp.float32)
            s = s + bias_ref[0, h].astype(jnp.float32)                      # bf16 -> f32 at the add
            s = s - jnp.max(s, axis=-1, keepdims=True)
            p = jnp.exp(s)
            inv_l = pl.reciprocal(jnp.sum(p, axis=-1, keepdims=True), approx=True)
            # 1/l folded into the (rows, C) per-head output (not the (rows, rows) probs);
            # head-h output occupies only head-h columns, so the sum over h is the concat.
            acc = acc + jnp.dot(p, vh, preferred_element_type=jnp.float32) * inv_l
        # Single lane-dense output projection (rows,32)@(32,32) instead of 4x (rows,8)@(8,32).
        out = jnp.dot(acc, pw_ref[...], preferred_element_type=jnp.float32) + pb_ref[...]
        o_ref[...] = out.astype(o_ref.dtype)

    const2 = lambda g: (0, 0)
    return pl.pallas_call(
        kernel,
        out_shape=jax.ShapeDtypeStruct((R, C), x_tokens.dtype),
        grid_spec=pltpu.PrefetchScalarGridSpec(
            num_scalar_prefetch=0,
            grid=(G,),
            in_specs=[
                pl.BlockSpec((rows, C), lambda g: (g, 0)),
                pl.BlockSpec((1, H, rows, rows), lambda g: (g, 0, 0, 0)),   # bf16, 74 KB/step
                pl.BlockSpec((1, C), const2),
                pl.BlockSpec((1, C), const2),
                pl.BlockSpec((C, 3 * C), const2),                           # VMEM-resident weights
                pl.BlockSpec((1, 3 * C), const2),
                pl.BlockSpec((C, C), const2),
                pl.BlockSpec((1, C), const2),
            ],
            out_specs=pl.BlockSpec((rows, C), lambda g: (g, 0)),
        ),
        # per-step working set < 0.5 MB -> far below every generation's VMEM (incl. v7x 64 MiB)
        compiler_params=pltpu.CompilerParams(dimension_semantics=("parallel",)),
    )(x_tokens, bias_dense, ln_w.reshape(1, C), ln_b.reshape(1, C),
      qkv_w, qkv_b.reshape(1, -1), proj_w, proj_b.reshape(1, C))


def mlp_block_pallas(shortcut2d, attn2d, ln_w, ln_b, w1, b1, w2, b2, eps=LN_EPS):
    """y = (s + a) + fc2(GELU(fc1(LayerNorm(s + a))))  — fused, 2 large row blocks."""
    R, C = shortcut2d.shape
    Hd = w1.shape[1]
    G, block_rows = _split_rows(R)
    inv_sqrt2 = 1.0 / math.sqrt(2.0)

    def kernel(s_ref, a_ref, lw_ref, lb_ref, w1_ref, b1_ref, w2_ref, b2_ref, o_ref):
        x = s_ref[...] + a_ref[...]                      # fused attention residual
        mu = jnp.mean(x, axis=-1, keepdims=True)
        var = jnp.mean((x - mu) ** 2, axis=-1, keepdims=True)
        xn = (x - mu) * jax.lax.rsqrt(var + eps) * lw_ref[...] + lb_ref[...]
        h = jnp.dot(xn, w1_ref[...], preferred_element_type=jnp.float32) + b1_ref[...]
        h = 0.5 * h * (1.0 + _erf_approx(h * inv_sqrt2))                   # exact (erf) GELU
        h = jnp.dot(h, w2_ref[...], preferred_element_type=jnp.float32) + b2_ref[...]
        o_ref[...] = (x + h).astype(o_ref.dtype)

    const2 = lambda i: (0, 0)
    return pl.pallas_call(
        kernel,
        out_shape=jax.ShapeDtypeStruct((R, C), shortcut2d.dtype),
        grid_spec=pltpu.PrefetchScalarGridSpec(
            num_scalar_prefetch=0,
            grid=(G,),
            in_specs=[
                pl.BlockSpec((block_rows, C), lambda i: (i, 0)),
                pl.BlockSpec((block_rows, C), lambda i: (i, 0)),
                pl.BlockSpec((1, C), const2),
                pl.BlockSpec((1, C), const2),
                pl.BlockSpec((C, Hd), const2),
                pl.BlockSpec((1, Hd), const2),
                pl.BlockSpec((Hd, C), const2),
                pl.BlockSpec((1, C), const2),
            ],
            out_specs=pl.BlockSpec((block_rows, C), lambda i: (i, 0)),
        ),
        compiler_params=pltpu.CompilerParams(dimension_semantics=("parallel",)),
    )(shortcut2d, attn2d, ln_w.reshape(1, C), ln_b.reshape(1, C),
      w1, b1.reshape(1, Hd), w2, b2.reshape(1, C))


# ----------------------------- pure-JAX references (for self-check) ---------
def layernorm_ref(x2d, w, b, eps=LN_EPS):
    mu = jnp.mean(x2d, -1, keepdims=True)
    var = jnp.mean((x2d - mu) ** 2, -1, keepdims=True)
    return (x2d - mu) * jax.lax.rsqrt(var + eps) * w + b


def attention_ref(xw, bias_full, qkv_w, qkv_b, proj_w, proj_b, num_heads, scale):
    B_, nW_, N, C = xw.shape
    H = num_heads
    HD = C // H
    qkv = xw @ qkv_w + qkv_b
    qkv = qkv.reshape(B_, nW_, N, 3, H, HD).transpose(3, 0, 4, 1, 2, 5)    # (3, B_, H, nW_, N, HD)
    q, k, v = qkv[0], qkv[1], qkv[2]
    bias = jnp.transpose(bias_full, (0, 2, 1, 3, 4))                       # (B_, H, nW_, N, N)
    attn = jnp.einsum("bhwnd,bhwmd->bhwnm", q, k) * scale + bias
    attn = jax.nn.softmax(attn, axis=-1)
    o = jnp.einsum("bhwnm,bhwmd->bhwnd", attn, v)
    o = jnp.transpose(o, (0, 2, 3, 1, 4)).reshape(B_, nW_, N, C)
    return o @ proj_w + proj_b


def mlp_block_ref(s2d, a2d, ln_w, ln_b, w1, b1, w2, b2, eps=LN_EPS):
    x = s2d + a2d
    xn = layernorm_ref(x, ln_w, ln_b, eps)
    h = xn @ w1 + b1
    h = 0.5 * h * (1.0 + jax.lax.erf(h * (1.0 / math.sqrt(2.0))))
    h = h @ w2 + b2
    return x + h


# ----------------------------- hoisted bias construction ---------------------
def build_attention_bias(params, attn_mask, B):
    """Combined (shift-window mask + earth position bias).  Hoisted out of the per-step
    forward (fixed function of the parameters + static indices).  Returns:
       bias_full : (B_, nW_, H, N, N) f32   -- used by the pure-JAX reference
       bias_dense: (G,  H, rows, rows) bf16 -- block-diagonal per-grid-step bias for the
                                               fused Pallas attention kernel (-1e9 off-window)
    """
    win_pl, win_lat, win_lon = WINDOW_SIZE
    N = win_pl * win_lat * win_lon
    pads = get_pad3d(INPUT_RESOLUTION, WINDOW_SIZE)
    Lon_pad = INPUT_RESOLUTION[2] + pads[0] + pads[1]
    nLon = Lon_pad // win_lon

    epi = get_earth_position_index(WINDOW_SIZE)                            # (N, N) static
    epb = params["epb_table"][jnp.asarray(epi.reshape(-1))]                # (N*N, nW_, H)
    nW_ = epb.shape[1]
    epb = epb.reshape(N, N, nW_, NUM_HEADS)
    epb_whnn = jnp.transpose(epb, (2, 3, 0, 1))                            # (nW_, H, N, N)
    if attn_mask is not None:
        bias_all = attn_mask[:, :, None, :, :] + epb_whnn[None]            # (nLon, nW_, H, N, N)
    else:
        bias_all = jnp.broadcast_to(epb_whnn[None], (nLon, nW_, NUM_HEADS, N, N))
    # window_partition orders the batch-window axis as b*nLon + lon -> bias[b_] = bias_all[b_ % nLon]
    bias_full = jnp.tile(bias_all, (B, 1, 1, 1, 1)).astype(DTYPE)          # (B_, nW_, H, N, N)

    B_ = bias_full.shape[0]
    G = _attention_grid_steps(B_, nW_, N)
    Bb = B_ // G
    W = Bb * nW_
    rows = W * N
    bf = bias_full.reshape(G, W, NUM_HEADS, N, N)                          # step-local window order
    dense = jnp.full((G, NUM_HEADS, rows, rows), NEG_INF, jnp.float32)
    for j in range(W):
        dense = dense.at[:, :, j * N:(j + 1) * N, j * N:(j + 1) * N].set(bf[:, j])
    return bias_full, dense.astype(BIAS_DTYPE)                             # bf16 storage: ~295 KB


# ----------------------------- full forward ----------------------------------
def transformer3d_block(x, params, bias_full, bias_dense, use_pallas=True):
    B, L, C = x.shape
    Pl, Lat, Lon = INPUT_RESOLUTION
    win_pl, win_lat, win_lon = WINDOW_SIZE
    shift_pl, shift_lat, shift_lon = SHIFT_SIZE
    roll = bool(shift_pl and shift_lat and shift_lon)
    N = win_pl * win_lat * win_lon
    pads = get_pad3d(INPUT_RESOLUTION, WINDOW_SIZE)   # (l, r, t, b, front, back)
    pad_is_zero = not any(pads)
    # LayerNorm is per-token, so it commutes with roll / window partition; when there is no
    # window padding we fuse norm1 directly into the attention kernel (one fewer HBM pass).
    fuse_ln = use_pallas and pad_is_zero

    shortcut2d = x.reshape(B * L, C)

    # --- norm1 ---
    if fuse_ln:
        xsp = x.reshape(B, Pl, Lat, Lon, C)           # normalized inside the attention kernel
    else:
        xn = layernorm_pallas(shortcut2d, params["norm1_w"], params["norm1_b"]) if use_pallas \
            else layernorm_ref(shortcut2d, params["norm1_w"], params["norm1_b"])
        xsp = xn.reshape(B, Pl, Lat, Lon, C)

    # --- pad to multiples of the window size (no-op for this configuration) ---
    if not pad_is_zero:
        xsp = jnp.pad(xsp, ((0, 0), (pads[4], pads[5]), (pads[2], pads[3]), (pads[0], pads[1]), (0, 0)))
    _, Pl_pad, Lat_pad, Lon_pad, _ = xsp.shape

    # --- (shifted) window partition ---
    if roll:
        # NOTE: reproduces the PyTorch reference verbatim: the forward roll uses
        # shifts=(-shift_pl, -shift_lat, -shift_lat) (shift_lat on the lon axis) while the
        # reverse roll uses (+shift_pl, +shift_lat, +shift_lon) — exactly as in
        # Transformer3DBlock.forward.
        shifted = jnp.roll(xsp, (-shift_pl, -shift_lat, -shift_lat), axis=(1, 2, 3))
    else:
        shifted = xsp
    xw = window_partition(shifted, WINDOW_SIZE)
    B_, nW_ = xw.shape[0], xw.shape[1]
    x_tokens = xw.reshape(B_ * nW_ * N, C)

    # --- attention ---
    scale = (C // NUM_HEADS) ** (-0.5)
    if use_pallas:
        a_tokens = attention_pallas(x_tokens, bias_dense,
                                    params["norm1_w"], params["norm1_b"],
                                    params["qkv_w"], params["qkv_b"],
                                    params["proj_w"], params["proj_b"],
                                    NUM_HEADS, scale, fuse_ln)
    else:
        a_tokens = attention_ref(x_tokens.reshape(B_, nW_, N, C), bias_full,
                                 params["qkv_w"], params["qkv_b"],
                                 params["proj_w"], params["proj_b"],
                                 NUM_HEADS, scale).reshape(B_ * nW_ * N, C)
    aw = a_tokens.reshape(B_, nW_, win_pl, win_lat, win_lon, C)

    # --- reverse windows, roll back, crop ---
    shifted = window_reverse(aw, WINDOW_SIZE, Pl_pad, Lat_pad, Lon_pad)
    xb = jnp.roll(shifted, (shift_pl, shift_lat, shift_lon), axis=(1, 2, 3)) if roll else shifted
    attn2d = crop3d_channels_last(xb, INPUT_RESOLUTION).reshape(B * L, C)

    # --- fused: residual + norm2 + MLP + residual (dropout / drop_path are identity, p=0) ---
    if use_pallas:
        y = mlp_block_pallas(shortcut2d, attn2d, params["norm2_w"], params["norm2_b"],
                             params["fc1_w"], params["fc1_b"], params["fc2_w"], params["fc2_b"])
    else:
        y = mlp_block_ref(shortcut2d, attn2d, params["norm2_w"], params["norm2_b"],
                          params["fc1_w"], params["fc1_b"], params["fc2_w"], params["fc2_b"])
    return y.reshape(B, L, C)


# ----------------------------- parameter init --------------------------------
def init_params(key):
    C = DIM
    hidden = int(C * MLP_RATIO)
    win_pl, win_lat, win_lon = WINDOW_SIZE
    pads = get_pad3d(INPUT_RESOLUTION, WINDOW_SIZE)
    pad_res = (INPUT_RESOLUTION[0] + pads[4] + pads[5],
               INPUT_RESOLUTION[1] + pads[2] + pads[3],
               INPUT_RESOLUTION[2] + pads[0] + pads[1])
    type_of_windows = (pad_res[0] // win_pl) * (pad_res[1] // win_lat)
    n_bias = win_pl ** 2 * win_lat ** 2 * (2 * win_lon - 1)
    ks = jax.random.split(key, 8)
    # Linear weights stored as (in, out) = transposed torch layout (out = x @ W + b).
    params = dict(
        norm1_w=jnp.ones((C,), DTYPE),
        norm1_b=jnp.zeros((C,), DTYPE),
        norm2_w=jnp.ones((C,), DTYPE),
        norm2_b=jnp.zeros((C,), DTYPE),
        epb_table=0.02 * jax.random.normal(ks[0], (n_bias, type_of_windows, NUM_HEADS), DTYPE),
        qkv_w=0.05 * jax.random.normal(ks[1], (C, 3 * C), DTYPE),
        qkv_b=0.05 * jax.random.normal(ks[2], (3 * C,), DTYPE),
        proj_w=0.05 * jax.random.normal(ks[3], (C, C), DTYPE),
        proj_b=0.05 * jax.random.normal(ks[4], (C,), DTYPE),
        fc1_w=0.05 * jax.random.normal(ks[5], (C, hidden), DTYPE),
        fc1_b=0.05 * jax.random.normal(ks[6], (hidden,), DTYPE),
        fc2_w=0.05 * jax.random.normal(ks[7], (hidden, C), DTYPE),
        fc2_b=jnp.zeros((C,), DTYPE),
    )
    return params, pad_res


# ----------------------------- main ------------------------------------------
if __name__ == "__main__":
    key = jax.random.PRNGKey(0)
    pkey, xkey = jax.random.split(key)
    params, pad_res = init_params(pkey)

    Pl, Lat, Lon = INPUT_RESOLUTION
    L = Pl * Lat * Lon
    x = jax.random.normal(xkey, (BATCH, L, DIM), DTYPE)

    shift_pl, shift_lat, shift_lon = SHIFT_SIZE
    roll = bool(shift_pl and shift_lat and shift_lon)
    attn_mask = jnp.asarray(get_shift_window_mask(pad_res, WINDOW_SIZE, SHIFT_SIZE)) if roll else None

    # Hoisted out of the forward: fixed function of the parameters + static mask.
    bias_full, bias_dense = build_attention_bias(params, attn_mask, BATCH)

    fwd = jax.jit(transformer3d_block, static_argnames=("use_pallas",))

    out = jax.block_until_ready(fwd(x, params, bias_full, bias_dense, use_pallas=True))

    # pure-JAX reference self-check (same glue, exact softmax/erf, standard LN-then-partition)
    ref = jax.block_until_ready(fwd(x, params, bias_full, bias_dense, use_pallas=False))

    assert out.shape == (BATCH, L, DIM)
    max_err = float(jnp.max(jnp.abs(out - ref)))
    # 5e-3 budget covers the approx-reciprocal softmax, bf16 bias storage and the erf
    # polynomial; all matmuls / elementwise math stay f32.
    assert max_err < 5e-3, f"kernel/reference mismatch: {max_err}"
    print("KERNEL_OK")
</pallas_src>

<mosaic_0001>
module attributes {stable_mosaic.version = 11 : i64} {
  func.func @kernel(%arg0: i32, %arg1: memref<96x32xf32, #tpu.memory_space<vmem>>, %arg2: memref<1x4x96x96xbf16, #tpu.memory_space<vmem>>, %arg3: memref<1x32xf32, #tpu.memory_space<vmem>>, %arg4: memref<1x32xf32, #tpu.memory_space<vmem>>, %arg5: memref<32x96xf32, #tpu.memory_space<vmem>>, %arg6: memref<1x96xf32, #tpu.memory_space<vmem>>, %arg7: memref<32x32xf32, #tpu.memory_space<vmem>>, %arg8: memref<1x32xf32, #tpu.memory_space<vmem>>, %arg9: memref<96x32xf32, #tpu.memory_space<vmem>>) attributes {dimension_semantics = [#tpu.dimension_semantics<parallel>], iteration_bounds = array<i64: 4>, scalar_prefetch = 0 : i64, scratch_operands = 0 : i64, tpu.core_type = #tpu.core_type<tc>, window_params = [{transform_indices = @transform_0, window_bounds = array<i64: 96, 32>}, {transform_indices = @transform_1, window_bounds = array<i64: 1, 4, 96, 96>}, {pipeline_mode = #tpu.pipeline_mode<synchronous>, transform_indices = @transform_2, window_bounds = array<i64: 1, 32>}, {pipeline_mode = #tpu.pipeline_mode<synchronous>, transform_indices = @transform_3, window_bounds = array<i64: 1, 32>}, {pipeline_mode = #tpu.pipeline_mode<synchronous>, transform_indices = @transform_4, window_bounds = array<i64: 32, 96>}, {pipeline_mode = #tpu.pipeline_mode<synchronous>, transform_indices = @transform_5, window_bounds = array<i64: 1, 96>}, {pipeline_mode = #tpu.pipeline_mode<synchronous>, transform_indices = @transform_6, window_bounds = array<i64: 32, 32>}, {pipeline_mode = #tpu.pipeline_mode<synchronous>, transform_indices = @transform_7, window_bounds = array<i64: 1, 32>}, {transform_indices = @transform_8, window_bounds = array<i64: 96, 32>}]} {
    %c0 = arith.constant 0 : index
    %c0_0 = arith.constant 0 : index
    %0 = vector.load %arg1[%c0, %c0_0] : memref<96x32xf32, #tpu.memory_space<vmem>>, vector<96x32xf32>
    %cst = arith.constant dense<0.000000e+00> : vector<96xf32>
    %1 = vector.multi_reduction <add>, %0, %cst [1] : vector<96x32xf32> to vector<96xf32>
    %2 = vector.shape_cast %1 : vector<96xf32> to vector<96x1xf32>
    %cst_1 = arith.constant 3.200000e+01 : f32
    %3 = vector.broadcast %cst_1 : f32 to vector<96x1xf32>
    %4 = arith.divf %2, %3 : vector<96x1xf32>
    %5 = vector.broadcast %4 : vector<96x1xf32> to vector<96x32xf32>
    %6 = arith.subf %0, %5 : vector<96x32xf32>
    %7 = arith.mulf %6, %6 : vector<96x32xf32>
    %cst_2 = arith.constant dense<0.000000e+00> : vector<96xf32>
    %8 = vector.multi_reduction <add>, %7, %cst_2 [1] : vector<96x32xf32> to vector<96xf32>
    %9 = vector.shape_cast %8 : vector<96xf32> to vector<96x1xf32>
    %cst_3 = arith.constant 3.200000e+01 : f32
    %10 = vector.broadcast %cst_3 : f32 to vector<96x1xf32>
    %11 = arith.divf %9, %10 : vector<96x1xf32>
    %12 = vector.broadcast %4 : vector<96x1xf32> to vector<96x32xf32>
    %13 = arith.subf %0, %12 : vector<96x32xf32>
    %cst_4 = arith.constant 9.99999974E-6 : f32
    %14 = vector.broadcast %cst_4 : f32 to vector<96x1xf32>
    %15 = arith.addf %11, %14 : vector<96x1xf32>
    %16 = math.rsqrt %15 : vector<96x1xf32>
    %17 = vector.broadcast %16 : vector<96x1xf32> to vector<96x32xf32>
    %18 = arith.mulf %13, %17 : vector<96x32xf32>
    %c0_5 = arith.constant 0 : index
    %c0_6 = arith.constant 0 : index
    %19 = vector.load %arg3[%c0_5, %c0_6] : memref<1x32xf32, #tpu.memory_space<vmem>>, vector<1x32xf32>
    %20 = vector.broadcast %19 : vector<1x32xf32> to vector<96x32xf32>
    %21 = arith.mulf %18, %20 : vector<96x32xf32>
    %c0_7 = arith.constant 0 : index
    %c0_8 = arith.constant 0 : index
    %22 = vector.load %arg4[%c0_7, %c0_8] : memref<1x32xf32, #tpu.memory_space<vmem>>, vector<1x32xf32>
    %23 = vector.broadcast %22 : vector<1x32xf32> to vector<96x32xf32>
    %24 = arith.addf %21, %23 : vector<96x32xf32>
    %c0_9 = arith.constant 0 : index
    %c0_10 = arith.constant 0 : index
    %25 = vector.load %arg5[%c0_9, %c0_10] : memref<32x96xf32, #tpu.memory_space<vmem>>, vector<32x96xf32>
    %cst_11 = arith.constant dense<0.000000e+00> : vector<96x96xf32>
    %26 = tpu.matmul %24, %25, %cst_11 {dimension_numbers = #tpu.dot_dimension_numbers<[1], [0], [0], [1], [0, 0, 1, 1], [], []>} : vector<96x32xf32>, vector<32x96xf32>, vector<96x96xf32> -> vector<96x96xf32>
    %c0_12 = arith.constant 0 : index
    %c0_13 = arith.constant 0 : index
    %27 = vector.load %arg6[%c0_12, %c0_13] : memref<1x96xf32, #tpu.memory_space<vmem>>, vector<1x96xf32>
    %28 = vector.broadcast %27 : vector<1x96xf32> to vector<96x96xf32>
    %29 = arith.addf %26, %28 : vector<96x96xf32>
    %30 = vector.extract_strided_slice %29 {offsets = [0, 0], sizes = [96, 32], strides = [1, 1]} : vector<96x96xf32> to vector<96x32xf32>
    %cst_14 = arith.constant 0.353553385 : f32
    %31 = vector.broadcast %cst_14 : f32 to vector<96x32xf32>
    %32 = arith.mulf %30, %31 : vector<96x32xf32>
    %33 = vector.extract_strided_slice %29 {offsets = [0, 32], sizes = [96, 32], strides = [1, 1]} : vector<96x96xf32> to vector<96x32xf32>
    %34 = vector.extract_strided_slice %29 {offsets = [0, 64], sizes = [96, 32], strides = [1, 1]} : vector<96x96xf32> to vector<96x32xf32>
    %35 = tpu.iota {dimensions = array<i32: 1>} : vector<96x32xi32>
    %cst_15 = arith.constant 0.000000e+00 : f32
    %36 = vector.broadcast %cst_15 : f32 to vector<96x32xf32>
    %c0_i32 = arith.constant 0 : i32
    %37 = vector.broadcast %c0_i32 : i32 to vector<96x32xi32>
    %38 = arith.cmpi sge, %35, %37 : vector<96x32xi32>
    %c8_i32 = arith.constant 8 : i32
    %39 = vector.broadcast %c8_i32 : i32 to vector<96x32xi32>
    %40 = arith.cmpi slt, %35, %39 : vector<96x32xi32>
    %41 = arith.andi %38, %40 : vector<96x32xi1>
    %cst_16 = arith.constant 0.000000e+00 : f32
    %42 = vector.broadcast %cst_16 : f32 to vector<96x32xf32>
    %43 = arith.select %41, %33, %42 : vector<96x32xi1>, vector<96x32xf32>
    %cst_17 = arith.constant 0.000000e+00 : f32
    %44 = vector.broadcast %cst_17 : f32 to vector<96x32xf32>
    %45 = arith.select %41, %34, %44 : vector<96x32xi1>, vector<96x32xf32>
    %cst_18 = arith.constant dense<0.000000e+00> : vector<96x96xf32>
    %46 = tpu.matmul %32, %43, %cst_18 {dimension_numbers = #tpu.dot_dimension_numbers<[1], [1], [0], [0], [0, 0, 1, 0], [], []>} : vector<96x32xf32>, vector<96x32xf32>, vector<96x96xf32> -> vector<96x96xf32>
    %c0_19 = arith.constant 0 : index
    %c0_20 = arith.constant 0 : index
    %c0_21 = arith.constant 0 : index
    %c0_22 = arith.constant 0 : index
    %47 = vector.load %arg2[%c0_19, %c0_20, %c0_21, %c0_22] : memref<1x4x96x96xbf16, #tpu.memory_space<vmem>>, vector<1x1x96x96xbf16>
    %48 = vector.shape_cast %47 : vector<1x1x96x96xbf16> to vector<96x96xbf16>
    %49 = arith.extf %48 : vector<96x96xbf16> to vector<96x96xf32>
    %50 = arith.addf %46, %49 : vector<96x96xf32>
    %cst_23 = arith.constant dense<0xFF800000> : vector<96xf32>
    %51 = vector.multi_reduction <maximumf>, %50, %cst_23 [1] : vector<96x96xf32> to vector<96xf32>
    %52 = vector.shape_cast %51 : vector<96xf32> to vector<96x1xf32>
    %53 = vector.broadcast %52 : vector<96x1xf32> to vector<96x96xf32>
    %54 = arith.subf %50, %53 : vector<96x96xf32>
    %55 = math.exp %54 : vector<96x96xf32>
    %cst_24 = arith.constant dense<0.000000e+00> : vector<96xf32>
    %56 = vector.multi_reduction <add>, %55, %cst_24 [1] : vector<96x96xf32> to vector<96xf32>
    %57 = vector.shape_cast %56 : vector<96xf32> to vector<96x1xf32>
    %58 = tpu.reciprocal %57 {approx = true} : vector<96x1xf32> -> vector<96x1xf32>
    %cst_25 = arith.constant dense<0.000000e+00> : vector<96x32xf32>
    %59 = tpu.matmul %55, %45, %cst_25 {dimension_numbers = #tpu.dot_dimension_numbers<[1], [0], [0], [1], [0, 0, 1, 1], [], []>} : vector<96x96xf32>, vector<96x32xf32>, vector<96x32xf32> -> vector<96x32xf32>
    %60 = vector.broadcast %58 : vector<96x1xf32> to vector<96x32xf32>
    %61 = arith.mulf %59, %60 : vector<96x32xf32>
    %62 = arith.addf %36, %61 : vector<96x32xf32>
    %c8_i32_26 = arith.constant 8 : i32
    %63 = vector.broadcast %c8_i32_26 : i32 to vector<96x32xi32>
    %64 = arith.cmpi sge, %35, %63 : vector<96x32xi32>
    %c16_i32 = arith.constant 16 : i32
    %65 = vector.broadcast %c16_i32 : i32 to vector<96x32xi32>
    %66 = arith.cmpi slt, %35, %65 : vector<96x32xi32>
    %67 = arith.andi %64, %66 : vector<96x32xi1>
    %cst_27 = arith.constant 0.000000e+00 : f32
    %68 = vector.broadcast %cst_27 : f32 to vector<96x32xf32>
    %69 = arith.select %67, %33, %68 : vector<96x32xi1>, vector<96x32xf32>
    %cst_28 = arith.constant 0.000000e+00 : f32
    %70 = vector.broadcast %cst_28 : f32 to vector<96x32xf32>
    %71 = arith.select %67, %34, %70 : vector<96x32xi1>, vector<96x32xf32>
    %cst_29 = arith.constant dense<0.000000e+00> : vector<96x96xf32>
    %72 = tpu.matmul %32, %69, %cst_29 {dimension_numbers = #tpu.dot_dimension_numbers<[1], [1], [0], [0], [0, 0, 1, 0], [], []>} : vector<96x32xf32>, vector<96x32xf32>, vector<96x96xf32> -> vector<96x96xf32>
    %c0_30 = arith.constant 0 : index
    %c1 = arith.constant 1 : index
    %c0_31 = arith.constant 0 : index
    %c0_32 = arith.constant 0 : index
    %73 = vector.load %arg2[%c0_30, %c1, %c0_31, %c0_32] : memref<1x4x96x96xbf16, #tpu.memory_space<vmem>>, vector<1x1x96x96xbf16>
    %74 = vector.shape_cast %73 : vector<1x1x96x96xbf16> to vector<96x96xbf16>
    %75 = arith.extf %74 : vector<96x96xbf16> to vector<96x96xf32>
    %76 = arith.addf %72, %75 : vector<96x96xf32>
    %cst_33 = arith.constant dense<0xFF800000> : vector<96xf32>
    %77 = vector.multi_reduction <maximumf>, %76, %cst_33 [1] : vector<96x96xf32> to vector<96xf32>
    %78 = vector.shape_cast %77 : vector<96xf32> to vector<96x1xf32>
    %79 = vector.broadcast %78 : vector<96x1xf32> to vector<96x96xf32>
    %80 = arith.subf %76, %79 : vector<96x96xf32>
    %81 = math.exp %80 : vector<96x96xf32>
    %cst_34 = arith.constant dense<0.000000e+00> : vector<96xf32>
    %82 = vector.multi_reduction <add>, %81, %cst_34 [1] : vector<96x96xf32> to vector<96xf32>
    %83 = vector.shape_cast %82 : vector<96xf32> to vector<96x1xf32>
    %84 = tpu.reciprocal %83 {approx = true} : vector<96x1xf32> -> vector<96x1xf32>
    %cst_35 = arith.constant dense<0.000000e+00> : vector<96x32xf32>
    %85 = tpu.matmul %81, %71, %cst_35 {dimension_numbers = #tpu.dot_dimension_numbers<[1], [0], [0], [1], [0, 0, 1, 1], [], []>} : vector<96x96xf32>, vector<96x32xf32>, vector<96x32xf32> -> vector<96x32xf32>
    %86 = vector.broadcast %84 : vector<96x1xf32> to vector<96x32xf32>
    %87 = arith.mulf %85, %86 : vector<96x32xf32>
    %88 = arith.addf %62, %87 : vector<96x32xf32>
    %c16_i32_36 = arith.constant 16 : i32
    %89 = vector.broadcast %c16_i32_36 : i32 to vector<96x32xi32>
    %90 = arith.cmpi sge, %35, %89 : vector<96x32xi32>
    %c24_i32 = arith.constant 24 : i32
    %91 = vector.broadcast %c24_i32 : i32 to vector<96x32xi32>
    %92 = arith.cmpi slt, %35, %91 : vector<96x32xi32>
    %93 = arith.andi %90, %92 : vector<96x32xi1>
    %cst_37 = arith.constant 0.000000e+00 : f32
    %94 = vector.broadcast %cst_37 : f32 to vector<96x32xf32>
    %95 = arith.select %93, %33, %94 : vector<96x32xi1>, vector<96x32xf32>
    %cst_38 = arith.constant 0.000000e+00 : f32
    %96 = vector.broadcast %cst_38 : f32 to vector<96x32xf32>
    %97 = arith.select %93, %34, %96 : vector<96x32xi1>, vector<96x32xf32>
    %cst_39 = arith.constant dense<0.000000e+00> : vector<96x96xf32>
    %98 = tpu.matmul %32, %95, %cst_39 {dimension_numbers = #tpu.dot_dimension_numbers<[1], [1], [0], [0], [0, 0, 1, 0], [], []>} : vector<96x32xf32>, vector<96x32xf32>, vector<96x96xf32> -> vector<96x96xf32>
    %c0_40 = arith.constant 0 : index
    %c2 = arith.constant 2 : index
    %c0_41 = arith.constant 0 : index
    %c0_42 = arith.constant 0 : index
    %99 = vector.load %arg2[%c0_40, %c2, %c0_41, %c0_42] : memref<1x4x96x96xbf16, #tpu.memory_space<vmem>>, vector<1x1x96x96xbf16>
    %100 = vector.shape_cast %99 : vector<1x1x96x96xbf16> to vector<96x96xbf16>
    %101 = arith.extf %100 : vector<96x96xbf16> to vector<96x96xf32>
    %102 = arith.addf %98, %101 : vector<96x96xf32>
    %cst_43 = arith.constant dense<0xFF800000> : vector<96xf32>
    %103 = vector.multi_reduction <maximumf>, %102, %cst_43 [1] : vector<96x96xf32> to vector<96xf32>
    %104 = vector.shape_cast %103 : vector<96xf32> to vector<96x1xf32>
    %105 = vector.broadcast %104 : vector<96x1xf32> to vector<96x96xf32>
    %106 = arith.subf %102, %105 : vector<96x96xf32>
    %107 = math.exp %106 : vector<96x96xf32>
    %cst_44 = arith.constant dense<0.000000e+00> : vector<96xf32>
    %108 = vector.multi_reduction <add>, %107, %cst_44 [1] : vector<96x96xf32> to vector<96xf32>
    %109 = vector.shape_cast %108 : vector<96xf32> to vector<96x1xf32>
    %110 = tpu.reciprocal %109 {approx = true} : vector<96x1xf32> -> vector<96x1xf32>
    %cst_45 = arith.constant dense<0.000000e+00> : vector<96x32xf32>
    %111 = tpu.matmul %107, %97, %cst_45 {dimension_numbers = #tpu.dot_dimension_numbers<[1], [0], [0], [1], [0, 0, 1, 1], [], []>} : vector<96x96xf32>, vector<96x32xf32>, vector<96x32xf32> -> vector<96x32xf32>
    %112 = vector.broadcast %110 : vector<96x1xf32> to vector<96x32xf32>
    %113 = arith.mulf %111, %112 : vector<96x32xf32>
    %114 = arith.addf %88, %113 : vector<96x32xf32>
    %c24_i32_46 = arith.constant 24 : i32
    %115 = vector.broadcast %c24_i32_46 : i32 to vector<96x32xi32>
    %116 = arith.cmpi sge, %35, %115 : vector<96x32xi32>
    %c32_i32 = arith.constant 32 : i32
    %117 = vector.broadcast %c32_i32 : i32 to vector<96x32xi32>
    %118 = arith.cmpi slt, %35, %117 : vector<96x32xi32>
    %119 = arith.andi %116, %118 : vector<96x32xi1>
    %cst_47 = arith.constant 0.000000e+00 : f32
    %120 = vector.broadcast %cst_47 : f32 to vector<96x32xf32>
    %121 = arith.select %119, %33, %120 : vector<96x32xi1>, vector<96x32xf32>
    %cst_48 = arith.constant 0.000000e+00 : f32
    %122 = vector.broadcast %cst_48 : f32 to vector<96x32xf32>
    %123 = arith.select %119, %34, %122 : vector<96x32xi1>, vector<96x32xf32>
    %cst_49 = arith.constant dense<0.000000e+00> : vector<96x96xf32>
    %124 = tpu.matmul %32, %121, %cst_49 {dimension_numbers = #tpu.dot_dimension_numbers<[1], [1], [0], [0], [0, 0, 1, 0], [], []>} : vector<96x32xf32>, vector<96x32xf32>, vector<96x96xf32> -> vector<96x96xf32>
    %c0_50 = arith.constant 0 : index
    %c3 = arith.constant 3 : index
    %c0_51 = arith.constant 0 : index
    %c0_52 = arith.constant 0 : index
    %125 = vector.load %arg2[%c0_50, %c3, %c0_51, %c0_52] : memref<1x4x96x96xbf16, #tpu.memory_space<vmem>>, vector<1x1x96x96xbf16>
    %126 = vector.shape_cast %125 : vector<1x1x96x96xbf16> to vector<96x96xbf16>
    %127 = arith.extf %126 : vector<96x96xbf16> to vector<96x96xf32>
    %128 = arith.addf %124, %127 : vector<96x96xf32>
    %cst_53 = arith.constant dense<0xFF800000> : vector<96xf32>
    %129 = vector.multi_reduction <maximumf>, %128, %cst_53 [1] : vector<96x96xf32> to vector<96xf32>
    %130 = vector.shape_cast %129 : vector<96xf32> to vector<96x1xf32>
    %131 = vector.broadcast %130 : vector<96x1xf32> to vector<96x96xf32>
    %132 = arith.subf %128, %131 : vector<96x96xf32>
    %133 = math.exp %132 : vector<96x96xf32>
    %cst_54 = arith.constant dense<0.000000e+00> : vector<96xf32>
    %134 = vector.multi_reduction <add>, %133, %cst_54 [1] : vector<96x96xf32> to vector<96xf32>
    %135 = vector.shape_cast %134 : vector<96xf32> to vector<96x1xf32>
    %136 = tpu.reciprocal %135 {approx = true} : vector<96x1xf32> -> vector<96x1xf32>
    %cst_55 = arith.constant dense<0.000000e+00> : vector<96x32xf32>
    %137 = tpu.matmul %133, %123, %cst_55 {dimension_numbers = #tpu.dot_dimension_numbers<[1], [0], [0], [1], [0, 0, 1, 1], [], []>} : vector<96x96xf32>, vector<96x32xf32>, vector<96x32xf32> -> vector<96x32xf32>
    %138 = vector.broadcast %136 : vector<96x1xf32> to vector<96x32xf32>
    %139 = arith.mulf %137, %138 : vector<96x32xf32>
    %140 = arith.addf %114, %139 : vector<96x32xf32>
    %c0_56 = arith.constant 0 : index
    %c0_57 = arith.constant 0 : index
    %141 = vector.load %arg7[%c0_56, %c0_57] : memref<32x32xf32, #tpu.memory_space<vmem>>, vector<32x32xf32>
    %cst_58 = arith.constant dense<0.000000e+00> : vector<96x32xf32>
    %142 = tpu.matmul %140, %141, %cst_58 {dimension_numbers = #tpu.dot_dimension_numbers<[1], [0], [0], [1], [0, 0, 1, 1], [], []>} : vector<96x32xf32>, vector<32x32xf32>, vector<96x32xf32> -> vector<96x32xf32>
    %c0_59 = arith.constant 0 : index
    %c0_60 = arith.constant 0 : index
    %143 = vector.load %arg8[%c0_59, %c0_60] : memref<1x32xf32, #tpu.memory_space<vmem>>, vector<1x32xf32>
    %144 = vector.broadcast %143 : vector<1x32xf32> to vector<96x32xf32>
    %145 = arith.addf %142, %144 : vector<96x32xf32>
    %c0_61 = arith.constant 0 : index
    %c0_62 = arith.constant 0 : index
    %146 = vector.load %arg9[%c0_61, %c0_62] : memref<96x32xf32, #tpu.memory_space<vmem>>, vector<96x32xf32>
    tpu.vector_store %arg9[%c0_61, %c0_62], %145 {strides = array<i32>} : memref<96x32xf32, #tpu.memory_space<vmem>>, vector<96x32xf32>,
    return
  }
  func.func @transform_0(%arg0: i32) -> (i32, i32) {
    %c0_i32 = arith.constant 0 : i32
    %c0_i32_0 = arith.constant 0 : i32
    return %arg0, %c0_i32 : i32, i32
  }
  func.func @transform_1(%arg0: i32) -> (i32, i32, i32, i32) {
    %c0_i32 = arith.constant 0 : i32
    %c0_i32_0 = arith.constant 0 : i32
    %c0_i32_1 = arith.constant 0 : i32
    %c0_i32_2 = arith.constant 0 : i32
    return %arg0, %c0_i32, %c0_i32_0, %c0_i32_1 : i32, i32, i32, i32
  }
  func.func @transform_2(%arg0: i32) -> (i32, i32) {
    %c0_i32 = arith.constant 0 : i32
    %c0_i32_0 = arith.constant 0 : i32
    %c0_i32_1 = arith.constant 0 : i32
    return %c0_i32, %c0_i32_0 : i32, i32
  }
  func.func @transform_3(%arg0: i32) -> (i32, i32) {
    %c0_i32 = arith.constant 0 : i32
    %c0_i32_0 = arith.constant 0 : i32
    %c0_i32_1 = arith.constant 0 : i32
    return %c0_i32, %c0_i32_0 : i32, i32
  }
  func.func @transform_4(%arg0: i32) -> (i32, i32) {
    %c0_i32 = arith.constant 0 : i32
    %c0_i32_0 = arith.constant 0 : i32
    %c0_i32_1 = arith.constant 0 : i32
    return %c0_i32, %c0_i32_0 : i32, i32
  }
  func.func @transform_5(%arg0: i32) -> (i32, i32) {
    %c0_i32 = arith.constant 0 : i32
    %c0_i32_0 = arith.constant 0 : i32
    %c0_i32_1 = arith.constant 0 : i32
    return %c0_i32, %c0_i32_0 : i32, i32
  }
  func.func @transform_6(%arg0: i32) -> (i32, i32) {
    %c0_i32 = arith.constant 0 : i32
    %c0_i32_0 = arith.constant 0 : i32
    %c0_i32_1 = arith.constant 0 : i32
    return %c0_i32, %c0_i32_0 : i32, i32
  }
  func.func @transform_7(%arg0: i32) -> (i32, i32) {
    %c0_i32 = arith.constant 0 : i32
    %c0_i32_0 = arith.constant 0 : i32
    %c0_i32_1 = arith.constant 0 : i32
    return %c0_i32, %c0_i32_0 : i32, i32
  }
  func.func @transform_8(%arg0: i32) -> (i32, i32) {
    %c0_i32 = arith.constant 0 : i32
    %c0_i32_0 = arith.constant 0 : i32
    return %arg0, %c0_i32 : i32, i32
  }
}

module attributes {stable_mosaic.version = 11 : i64} {
  func.func @kernel(%arg0: i32, %arg1: memref<192x32xf32, #tpu.memory_space<vmem>>, %arg2: memref<192x32xf32, #tpu.memory_space<vmem>>, %arg3: memref<1x32xf32, #tpu.memory_space<vmem>>, %arg4: memref<1x32xf32, #tpu.memory_space<vmem>>, %arg5: memref<32x128xf32, #tpu.memory_space<vmem>>, %arg6: memref<1x128xf32, #tpu.memory_space<vmem>>, %arg7: memref<128x32xf32, #tpu.memory_space<vmem>>, %arg8: memref<1x32xf32, #tpu.memory_space<vmem>>, %arg9: memref<192x32xf32, #tpu.memory_space<vmem>>) attributes {dimension_semantics = [#tpu.dimension_semantics<parallel>], iteration_bounds = array<i64: 2>, scalar_prefetch = 0 : i64, scratch_operands = 0 : i64, tpu.core_type = #tpu.core_type<tc>, window_params = [{transform_indices = @transform_0, window_bounds = array<i64: 192, 32>}, {transform_indices = @transform_1, window_bounds = array<i64: 192, 32>}, {pipeline_mode = #tpu.pipeline_mode<synchronous>, transform_indices = @transform_2, window_bounds = array<i64: 1, 32>}, {pipeline_mode = #tpu.pipeline_mode<synchronous>, transform_indices = @transform_3, window_bounds = array<i64: 1, 32>}, {pipeline_mode = #tpu.pipeline_mode<synchronous>, transform_indices = @transform_4, window_bounds = array<i64: 32, 128>}, {pipeline_mode = #tpu.pipeline_mode<synchronous>, transform_indices = @transform_5, window_bounds = array<i64: 1, 128>}, {pipeline_mode = #tpu.pipeline_mode<synchronous>, transform_indices = @transform_6, window_bounds = array<i64: 128, 32>}, {pipeline_mode = #tpu.pipeline_mode<synchronous>, transform_indices = @transform_7, window_bounds = array<i64: 1, 32>}, {transform_indices = @transform_8, window_bounds = array<i64: 192, 32>}]} {
    %c0 = arith.constant 0 : index
    %c0_0 = arith.constant 0 : index
    %0 = vector.load %arg1[%c0, %c0_0] : memref<192x32xf32, #tpu.memory_space<vmem>>, vector<192x32xf32>
    %c0_1 = arith.constant 0 : index
    %c0_2 = arith.constant 0 : index
    %1 = vector.load %arg2[%c0_1, %c0_2] : memref<192x32xf32, #tpu.memory_space<vmem>>, vector<192x32xf32>
    %2 = arith.addf %0, %1 : vector<192x32xf32>
    %cst = arith.constant dense<0.000000e+00> : vector<192xf32>
    %3 = vector.multi_reduction <add>, %2, %cst [1] : vector<192x32xf32> to vector<192xf32>
    %4 = vector.shape_cast %3 : vector<192xf32> to vector<192x1xf32>
    %cst_3 = arith.constant 3.200000e+01 : f32
    %5 = vector.broadcast %cst_3 : f32 to vector<192x1xf32>
    %6 = arith.divf %4, %5 : vector<192x1xf32>
    %7 = vector.broadcast %6 : vector<192x1xf32> to vector<192x32xf32>
    %8 = arith.subf %2, %7 : vector<192x32xf32>
    %9 = arith.mulf %8, %8 : vector<192x32xf32>
    %cst_4 = arith.constant dense<0.000000e+00> : vector<192xf32>
    %10 = vector.multi_reduction <add>, %9, %cst_4 [1] : vector<192x32xf32> to vector<192xf32>
    %11 = vector.shape_cast %10 : vector<192xf32> to vector<192x1xf32>
    %cst_5 = arith.constant 3.200000e+01 : f32
    %12 = vector.broadcast %cst_5 : f32 to vector<192x1xf32>
    %13 = arith.divf %11, %12 : vector<192x1xf32>
    %14 = vector.broadcast %6 : vector<192x1xf32> to vector<192x32xf32>
    %15 = arith.subf %2, %14 : vector<192x32xf32>
    %cst_6 = arith.constant 9.99999974E-6 : f32
    %16 = vector.broadcast %cst_6 : f32 to vector<192x1xf32>
    %17 = arith.addf %13, %16 : vector<192x1xf32>
    %18 = math.rsqrt %17 : vector<192x1xf32>
    %19 = vector.broadcast %18 : vector<192x1xf32> to vector<192x32xf32>
    %20 = arith.mulf %15, %19 : vector<192x32xf32>
    %c0_7 = arith.constant 0 : index
    %c0_8 = arith.constant 0 : index
    %21 = vector.load %arg3[%c0_7, %c0_8] : memref<1x32xf32, #tpu.memory_space<vmem>>, vector<1x32xf32>
    %22 = vector.broadcast %21 : vector<1x32xf32> to vector<192x32xf32>
    %23 = arith.mulf %20, %22 : vector<192x32xf32>
    %c0_9 = arith.constant 0 : index
    %c0_10 = arith.constant 0 : index
    %24 = vector.load %arg4[%c0_9, %c0_10] : memref<1x32xf32, #tpu.memory_space<vmem>>, vector<1x32xf32>
    %25 = vector.broadcast %24 : vector<1x32xf32> to vector<192x32xf32>
    %26 = arith.addf %23, %25 : vector<192x32xf32>
    %c0_11 = arith.constant 0 : index
    %c0_12 = arith.constant 0 : index
    %27 = vector.load %arg5[%c0_11, %c0_12] : memref<32x128xf32, #tpu.memory_space<vmem>>, vector<32x128xf32>
    %cst_13 = arith.constant dense<0.000000e+00> : vector<192x128xf32>
    %28 = tpu.matmul %26, %27, %cst_13 {dimension_numbers = #tpu.dot_dimension_numbers<[1], [0], [0], [1], [0, 0, 1, 1], [], []>} : vector<192x32xf32>, vector<32x128xf32>, vector<192x128xf32> -> vector<192x128xf32>
    %c0_14 = arith.constant 0 : index
    %c0_15 = arith.constant 0 : index
    %29 = vector.load %arg6[%c0_14, %c0_15] : memref<1x128xf32, #tpu.memory_space<vmem>>, vector<1x128xf32>
    %30 = vector.broadcast %29 : vector<1x128xf32> to vector<192x128xf32>
    %31 = arith.addf %28, %30 : vector<192x128xf32>
    %cst_16 = arith.constant 5.000000e-01 : f32
    %32 = vector.broadcast %cst_16 : f32 to vector<192x128xf32>
    %33 = arith.mulf %32, %31 : vector<192x128xf32>
    %cst_17 = arith.constant 0.707106769 : f32
    %34 = vector.broadcast %cst_17 : f32 to vector<192x128xf32>
    %35 = arith.mulf %31, %34 : vector<192x128xf32>
    %36 = math.absf %35 : vector<192x128xf32>
    %cst_18 = arith.constant 0.327591091 : f32
    %37 = vector.broadcast %cst_18 : f32 to vector<192x128xf32>
    %38 = arith.mulf %37, %36 : vector<192x128xf32>
    %cst_19 = arith.constant 1.000000e+00 : f32
    %39 = vector.broadcast %cst_19 : f32 to vector<192x128xf32>
    %40 = arith.addf %39, %38 : vector<192x128xf32>
    %cst_20 = arith.constant 1.000000e+00 : f32
    %41 = vector.broadcast %cst_20 : f32 to vector<192x128xf32>
    %42 = arith.divf %41, %40 : vector<192x128xf32>
    %cst_21 = arith.constant 1.06140542 : f32
    %43 = vector.broadcast %cst_21 : f32 to vector<192x128xf32>
    %44 = arith.mulf %43, %42 : vector<192x128xf32>
    %cst_22 = arith.constant -1.45315206 : f32
    %45 = vector.broadcast %cst_22 : f32 to vector<192x128xf32>
    %46 = arith.addf %44, %45 : vector<192x128xf32>
    %47 = arith.mulf %46, %42 : vector<192x128xf32>
    %cst_23 = arith.constant 1.42141378 : f32
    %48 = vector.broadcast %cst_23 : f32 to vector<192x128xf32>
    %49 = arith.addf %47, %48 : vector<192x128xf32>
    %50 = arith.mulf %49, %42 : vector<192x128xf32>
    %cst_24 = arith.constant -0.284496725 : f32
    %51 = vector.broadcast %cst_24 : f32 to vector<192x128xf32>
    %52 = arith.addf %50, %51 : vector<192x128xf32>
    %53 = arith.mulf %52, %42 : vector<192x128xf32>
    %cst_25 = arith.constant 0.254829586 : f32
    %54 = vector.broadcast %cst_25 : f32 to vector<192x128xf32>
    %55 = arith.addf %53, %54 : vector<192x128xf32>
    %56 = arith.mulf %55, %42 : vector<192x128xf32>
    %cst_26 = arith.constant 0.000000e+00 : f32
    %57 = vector.broadcast %cst_26 : f32 to vector<192x128xf32>
    %58 = arith.subf %57, %36 : vector<192x128xf32>
    %59 = arith.mulf %58, %36 : vector<192x128xf32>
    %60 = math.exp %59 : vector<192x128xf32>
    %61 = arith.mulf %56, %60 : vector<192x128xf32>
    %cst_27 = arith.constant 1.000000e+00 : f32
    %62 = vector.broadcast %cst_27 : f32 to vector<192x128xf32>
    %63 = arith.subf %62, %61 : vector<192x128xf32>
    %cst_28 = arith.constant 0.000000e+00 : f32
    %64 = vector.broadcast %cst_28 : f32 to vector<192x128xf32>
    %65 = arith.cmpf oge, %35, %64 : vector<192x128xf32>
    %cst_29 = arith.constant 0.000000e+00 : f32
    %66 = vector.broadcast %cst_29 : f32 to vector<192x128xf32>
    %67 = arith.subf %66, %63 : vector<192x128xf32>
    %68 = arith.select %65, %63, %67 : vector<192x128xi1>, vector<192x128xf32>
    %cst_30 = arith.constant 1.000000e+00 : f32
    %69 = vector.broadcast %cst_30 : f32 to vector<192x128xf32>
    %70 = arith.addf %69, %68 : vector<192x128xf32>
    %71 = arith.mulf %33, %70 : vector<192x128xf32>
    %c0_31 = arith.constant 0 : index
    %c0_32 = arith.constant 0 : index
    %72 = vector.load %arg7[%c0_31, %c0_32] : memref<128x32xf32, #tpu.memory_space<vmem>>, vector<128x32xf32>
    %cst_33 = arith.constant dense<0.000000e+00> : vector<192x32xf32>
    %73 = tpu.matmul %71, %72, %cst_33 {dimension_numbers = #tpu.dot_dimension_numbers<[1], [0], [0], [1], [0, 0, 1, 1], [], []>} : vector<192x128xf32>, vector<128x32xf32>, vector<192x32xf32> -> vector<192x32xf32>
    %c0_34 = arith.constant 0 : index
    %c0_35 = arith.constant 0 : index
    %74 = vector.load %arg8[%c0_34, %c0_35] : memref<1x32xf32, #tpu.memory_space<vmem>>, vector<1x32xf32>
    %75 = vector.broadcast %74 : vector<1x32xf32> to vector<192x32xf32>
    %76 = arith.addf %73, %75 : vector<192x32xf32>
    %77 = arith.addf %2, %76 : vector<192x32xf32>
    %c0_36 = arith.constant 0 : index
    %c0_37 = arith.constant 0 : index
    %78 = vector.load %arg9[%c0_36, %c0_37] : memref<192x32xf32, #tpu.memory_space<vmem>>, vector<192x32xf32>
    tpu.vector_store %arg9[%c0_36, %c0_37], %77 {strides = array<i32>} : memref<192x32xf32, #tpu.memory_space<vmem>>, vector<192x32xf32>,
    return
  }
  func.func @transform_0(%arg0: i32) -> (i32, i32) {
    %c0_i32 = arith.constant 0 : i32
    %c0_i32_0 = arith.constant 0 : i32
    return %arg0, %c0_i32 : i32, i32
  }
  func.func @transform_1(%arg0: i32) -> (i32, i32) {
    %c0_i32 = arith.constant 0 : i32
    %c0_i32_0 = arith.constant 0 : i32
    return %arg0, %c0_i32 : i32, i32
  }
  func.func @transform_2(%arg0: i32) -> (i32, i32) {
    %c0_i32 = arith.constant 0 : i32
    %c0_i32_0 = arith.constant 0 : i32
    %c0_i32_1 = arith.constant 0 : i32
    return %c0_i32, %c0_i32_0 : i32, i32
  }
  func.func @transform_3(%arg0: i32) -> (i32, i32) {
    %c0_i32 = arith.constant 0 : i32
    %c0_i32_0 = arith.constant 0 : i32
    %c0_i32_1 = arith.constant 0 : i32
    return %c0_i32, %c0_i32_0 : i32, i32
  }
  func.func @transform_4(%arg0: i32) -> (i32, i32) {
    %c0_i32 = arith.constant 0 : i32
    %c0_i32_0 = arith.constant 0 : i32
    %c0_i32_1 = arith.constant 0 : i32
    return %c0_i32, %c0_i32_0 : i32, i32
  }
  func.func @transform_5(%arg0: i32) -> (i32, i32) {
    %c0_i32 = arith.constant 0 : i32
    %c0_i32_0 = arith.constant 0 : i32
    %c0_i32_1 = arith.constant 0 : i32
    return %c0_i32, %c0_i32_0 : i32, i32
  }
  func.func @transform_6(%arg0: i32) -> (i32, i32) {
    %c0_i32 = arith.constant 0 : i32
    %c0_i32_0 = arith.constant 0 : i32
    %c0_i32_1 = arith.constant 0 : i32
    return %c0_i32, %c0_i32_0 : i32, i32
  }
  func.func @transform_7(%arg0: i32) -> (i32, i32) {
    %c0_i32 = arith.constant 0 : i32
    %c0_i32_0 = arith.constant 0 : i32
    %c0_i32_1 = arith.constant 0 : i32
    return %c0_i32, %c0_i32_0 : i32, i32
  }
  func.func @transform_8(%arg0: i32) -> (i32, i32) {
    %c0_i32 = arith.constant 0 : i32
    %c0_i32_0 = arith.constant 0 : i32
    return %arg0, %c0_i32 : i32, i32
  }
}

</mosaic_0001>

<bundles_post_ra>
// kernel: transformer3d_block.3
= control target key start
LH: loop header
LB: loop body
LE: loop exit
PB: predicated region body
PF: predicated region fallthrough
CT: control target
= control target key end

     0   :  { %s2637_s27 = smov 0   ;;  %s4658_s0 = inlined_call_operand.vmem [shape: f32[384,32], index: 0, kind: input, shape index: {}]   ;;  %s4659_s1 = inlined_call_operand.vmem [shape: f32[384,32], index: 1, kind: input, shape index: {}]   ;;  %s4660_s2 = inlined_call_operand.vmem [shape: f32[1,32], index: 2, kind: input, shape index: {}]   ;;  %s4661_s3 = inlined_call_operand.vmem [shape: f32[1,32], index: 3, kind: input, shape index: {}]   ;;  %s4662_s4 = inlined_call_operand.vmem [shape: f32[32,128], index: 4, kind: input, shape index: {}]   ;;  %s4663_s5 = inlined_call_operand.vmem [shape: f32[1,128], index: 5, kind: input, shape index: {}]   ;;  %s4664_s6 = inlined_call_operand.vmem [shape: f32[128,32], index: 6, kind: input, shape index: {}]   ;;  %s4665_s7 = inlined_call_operand.vmem [shape: f32[1,32], index: 7, kind: input, shape index: {}]   ;;  %s4666_s8 = inlined_call_operand.vmem [shape: f32[384,32], index: 8, kind: output, shape index: {}]  }
   0x1 LB: > { %s2349_s28 = sadd.s32 4294967295, %s2589_s27   ;;  %p2353_p0 = scmp.ge.s32.totalorder %s2589_s27, 1  ;;  %s2589_s27 = sphi %s2637_s27, %s18_s27  }
   0x2   : > { %p274_p1 = scmp.lt.s32.totalorder %s2589_s27, 3 }
   0x4   : > { %p275_p2 = pnand %p2353_p0, %p274_p1 }
   0x6   : > { %278 = sbr.rel (%p275_p2) target bundleno = 934 (0x3a6), region = 52 }
   0xb   : > { %s313_s29 = smul.u32 24, %s2349_s28  ;;  %vm403_vm0 = vcmask 261120   ;;  %v2591_v28 = vmov 32.0  }
   0xc   : > { %2432 = vrcp.f32 %v2591_v28 }
   0xd   : > { %p314_p3 = scmp.lt.s32.totalorder %s313_s29, 47 }
   0xf   : > { %s4837_s29 = smov (!%p314_p3, %s313_s29), 47 }
  0x10   : > { %s2645_s30 = sshll.u32 %s4837_s29, 3 }
  0x11   : > { %s2651_s11 = scalar_lea.vmem %s4658_s0, %s2645_s30  ;;  %s2657_s14 = scalar_lea.vmem %s4659_s1, %s2645_s30 }
  0x12   : > { %v333_v0 = vld [vmem:[%s2651_s11 + $0x10] sm:$0xff]  ;;  %v331_v2 = vld [vmem:[%s2651_s11] sm:$0xff]  ;;  %v332_v9 = vld [vmem:[%s2651_s11 + $0x8] sm:$0xff]  ;;  %v2433_v29 = vpop.eup %2432 }
  0x13   : > { %v357_v1 = vld [vmem:[%s2657_s14 + $0x10] sm:$0xff]  ;;  %v355_v4 = vld [vmem:[%s2657_s14] sm:$0xff]  ;;  %v356_v10 = vld [vmem:[%s2657_s14 + $0x8] sm:$0xff]  ;;  %v477_v30 = vmul.f32 32.0, %v2433_v29  ;;  %vm481_vm1 = vweird.f32 %v2433_v29 }
  0x14   : > { %v2662_v3 = vadd.f32 %v357_v1, %v333_v0  ;;  %v335_v5 = vld [vmem:[%s2651_s11 + $0x20] sm:$0xff]  ;;  %v2667_v7 = vadd.f32 %v355_v4, %v331_v2  ;;  %v336_v11 = vld [vmem:[%s2651_s11 + $0x28] sm:$0xff]  ;;  %v334_v14 = vld [vmem:[%s2651_s11 + $0x18] sm:$0xff]  ;;  %v2685_v19 = vadd.f32 %v356_v10, %v332_v9 }
  0x15   : > { %v359_v6 = vld [vmem:[%s2657_s14 + $0x20] sm:$0xff]  ;;  %v360_v13 = vld [vmem:[%s2657_s14 + $0x28] sm:$0xff]  ;;  %v358_v15 = vld [vmem:[%s2657_s14 + $0x18] sm:$0xff]  ;;  %v478_v31 = vsub.f32 1.0, %v477_v30 }
  0x16   : > { %4699 = vst [vmem:[#allocation2_spill] sm:$0xff] %v2662_v3  ;;  %v2669_v8 = vadd.f32 %v359_v6, %v335_v5  ;;  %v410_v12 = vsel %vm403_vm0, %v2662_v3, 0.0  ;;  %v404_v16 = vsel %vm403_vm0, %v2667_v7, 0.0  ;;  %v2683_v18 = vadd.f32 %v358_v15, %v334_v14  ;;  %v337_v24 = vld [vmem:[%s2651_s11 + $0x30] sm:$0xff]  ;;  %v340_v44 = vld [vmem:[%s2651_s11 + $0x48] sm:$0xff]  ;;  %v338_v47 = vld [vmem:[%s2651_s11 + $0x38] sm:$0xff] }
  0x17   : > { %4700 = vst [vmem:[#allocation3_spill] sm:$0xff] %v2667_v7  ;;  %411 = vadd.xlane.f32.xlu1 %v410_v12  ;;  %405 = vadd.xlane.f32.xlu0 %v404_v16  ;;  %v2687_v20 = vadd.f32 %v360_v13, %v336_v11  ;;  %v407_v22 = vsel %vm403_vm0, %v2685_v19, 0.0  ;;  %v361_v25 = vld [vmem:[%s2657_s14 + $0x30] sm:$0xff]  ;;  %v479_v32 = vmul.f32 %v2433_v29, %v478_v31  ;;  %v364_v45 = vld [vmem:[%s2657_s14 + $0x48] sm:$0xff]  ;;  %v362_v48 = vld [vmem:[%s2657_s14 + $0x38] sm:$0xff] }
  0x18   : > { %4701 = vst [vmem:[#allocation4_spill] sm:$0xff] %v2669_v8  ;;  %v416_v17 = vsel %vm403_vm0, %v2669_v8, 0.0  ;;  %v413_v21 = vsel %vm403_vm0, %v2683_v18, 0.0  ;;  %v2697_v26 = vadd.f32 %v361_v25, %v337_v24  ;;  %v2721_v53 = vadd.f32 %v364_v45, %v340_v44  ;;  %v339_v0 = vld [vmem:[%s2651_s11 + $0x40] sm:$0xff]  ;;  %v369_v30 = vld [vmem:[%s2657_s14 + $0x70] sm:$0xff]  ;;  %v342_v31 = vld [vmem:[%s2651_s11 + $0x58] sm:$0xff] }
  0x19   : > { %417 = vadd.xlane.f32.xlu2 %v416_v17  ;;  %4702 = vst [vmem:[#allocation5_spill] sm:$0xff] %v2683_v18  ;;  %v419_v23 = vsel %vm403_vm0, %v2687_v20, 0.0  ;;  %v480_v33 = vadd.f32 %v2433_v29, %v479_v32  ;;  %v2726_v57 = vadd.f32 %v362_v48, %v338_v47  ;;  %v363_v1 = vld [vmem:[%s2657_s14 + $0x40] sm:$0xff]  ;;  %v341_v17 = vld [vmem:[%s2651_s11 + $0x50] sm:$0xff]  ;;  %v366_v32 = vld [vmem:[%s2657_s14 + $0x58] sm:$0xff] }
  0x1a   : > { %4703 = vst [vmem:[#allocation6_spill] sm:$0xff] %v2685_v19  ;;  %v422_v27 = vsel %vm403_vm0, %v2697_v26, 0.0  ;;  %v431_v60 = vsel %vm403_vm0, %v2721_v53, 0.0  ;;  %v2752_v11 = vadd.f32 %v363_v1, %v339_v0  ;;  %v347_v48 = vld [vmem:[%s2651_s11 + $0x80] sm:$0xff]  ;;  %v998_v1 = vld [vmem:[%s4662_s4 + $0x18] sm:$0xff] }
  0x1b   : > { %4704 = vst [vmem:[#allocation7_spill] sm:$0xff] %v2687_v20  ;;  %v2701_v34 = vsel %vm481_vm1, %v2433_v29, %v480_v33  ;;  %v425_v62 = vsel %vm403_vm0, %v2726_v57, 0.0  ;;  %v345_v29 = vld [vmem:[%s2651_s11 + $0x70] sm:$0xff]  ;;  %1087 = vmatpush.msra.mxu0 %v998_v1  ;;  %2383 = vmatpush.msra.mxu3 %v998_v1 }
  0x1c   : > { %4705 = vst [vmem:[#allocation8_spill] sm:$0xff] %v2697_v26  ;;  %v428_v16 = vsel %vm403_vm0, %v2752_v11, 0.0  ;;  %v2780_v33 = vadd.f32 %v369_v30, %v345_v29 }
  0x1d   : > { %4706 = vst [vmem:[#allocation9_spill] sm:$0xff] %v2721_v53 }
  0x1e   : > { %4707 = vst [vmem:[#allocation10_spill] sm:$0xff] %v2726_v57 }
  0x1f   : > { %414 = vadd.xlane.f32.xlu1 %v413_v21  ;;  %408 = vadd.xlane.f32.xlu0 %v407_v22  ;;  %4708 = vst [vmem:[#allocation11_spill] sm:$0xff] %v2752_v11  ;;  %v365_v21 = vld [vmem:[%s2657_s14 + $0x50] sm:$0xff] }
  0x20   : > { %4710 = vst [vmem:[#allocation13_spill] sm:$0xff] %v2780_v33 }
  0x21   : > { %420 = vadd.xlane.f32.xlu2 %v419_v23  ;;  %v2768_v23 = vadd.f32 %v365_v21, %v341_v17 }
  0x23   : > { %4709 = vst [vmem:[#allocation12_spill] sm:$0xff] %v2768_v23 }
  0x27   : > { %423 = vadd.xlane.f32.xlu1 %v422_v27  ;;  %v434_v27 = vsel %vm403_vm0, %v2768_v23, 0.0 }
  0x8a   : > { %v412_v35 = vpop.xlane.xlu1 %411  ;;  %v406_v37 = vpop.xlane.xlu0 %405 }
  0x8b   : > { %v485_v36 = vmul.f32 %v2701_v34, %v412_v35  ;;  %v483_v39 = vmul.f32 %v2701_v34, %v406_v37  ;;  %v2782_v35 = vadd.f32 %v366_v32, %v342_v31 }
  0x8c   : > { %v418_v38 = vpop.xlane.xlu2 %417 }
  0x8d   : > { %v2706_v40 = vsub.f32 %v2662_v3, %v485_v36  ;;  %v2709_v41 = vsub.f32 %v2667_v7, %v483_v39  ;;  %v487_v9 = vmul.f32 %v2701_v34, %v418_v38  ;;  %4711 = vst [vmem:[#allocation14_spill] sm:$0xff] %v2782_v35  ;;  %v446_v36 = vsel %vm403_vm0, %v2780_v33, 0.0  ;;  %v346_v38 = vld [vmem:[%s2651_s11 + $0x78] sm:$0xff] }
  0x8e   : > { %v437_v37 = vsel %vm403_vm0, %v2782_v35, 0.0  ;;  %v370_v39 = vld [vmem:[%s2657_s14 + $0x78] sm:$0xff] }
  0x8f   : > { %v533_v42 = vmul.f32 %v2706_v40, %v2706_v40  ;;  %v531_v43 = vmul.f32 %v2709_v41, %v2709_v41  ;;  %v2759_v14 = vsub.f32 %v2669_v8, %v487_v9  ;;  %v2792_v44 = vadd.f32 %v370_v39, %v346_v38  ;;  %v350_v38 = vld [vmem:[%s2651_s11 + $0x98] sm:$0xff] }
  0x90   : > { %v374_v39 = vld [vmem:[%s2657_s14 + $0x98] sm:$0xff] }
  0x91   : > { %v561_v46 = vsel %vm403_vm0, %v533_v42, 0.0  ;;  %v555_v49 = vsel %vm403_vm0, %v531_v43, 0.0  ;;  %v535_v24 = vmul.f32 %v2759_v14, %v2759_v14  ;;  %v343_v42 = vld [vmem:[%s2651_s11 + $0x60] sm:$0xff]  ;;  %4712 = vst [vmem:[#allocation15_spill] sm:$0xff] %v2792_v44 }
  0x92   : > { %562 = vadd.xlane.f32.xlu1 %v561_v46  ;;  %v415_v50 = vpop.xlane.xlu1 %414  ;;  %556 = vadd.xlane.f32.xlu0 %v555_v49  ;;  %v409_v51 = vpop.xlane.xlu0 %408  ;;  %v367_v43 = vld [vmem:[%s2657_s14 + $0x60] sm:$0xff]  ;;  %v449_v46 = vsel %vm403_vm0, %v2792_v44, 0.0 }
  0x93   : > { %v484_v54 = vmul.f32 %v2701_v34, %v409_v51  ;;  %v486_v56 = vmul.f32 %v2701_v34, %v415_v50  ;;  %v567_v28 = vsel %vm403_vm0, %v535_v24, 0.0  ;;  %v2794_v45 = vadd.f32 %v367_v43, %v343_v42  ;;  %v371_v49 = vld [vmem:[%s2657_s14 + $0x80] sm:$0xff]  ;;  %v344_v50 = vld [vmem:[%s2651_s11 + $0x68] sm:$0xff] }
  0x94   : > { %v421_v52 = vpop.xlane.xlu2 %420  ;;  %v368_v51 = vld [vmem:[%s2657_s14 + $0x68] sm:$0xff] }
  0x95   : > { %v488_v55 = vmul.f32 %v2701_v34, %v421_v52  ;;  %v2729_v58 = vsub.f32 %v2685_v19, %v484_v54  ;;  %v2737_v61 = vsub.f32 %v2683_v18, %v486_v56  ;;  %4713 = vst [vmem:[#allocation16_spill] sm:$0xff] %v2794_v45  ;;  %v440_v47 = vsel %vm403_vm0, %v2794_v45, 0.0 }
  0x96   : > { %v2804_v52 = vadd.f32 %v371_v49, %v347_v48  ;;  %v2806_v54 = vadd.f32 %v368_v51, %v344_v50  ;;  %v2859_v50 = vadd.f32 %v374_v39, %v350_v38  ;;  %v373_v38 = vld [vmem:[%s2657_s14 + $0x90] sm:$0xff] }
  0x97   : > { %v2732_v59 = vsub.f32 %v2687_v20, %v488_v55  ;;  %v532_v63 = vmul.f32 %v2729_v58, %v2729_v58  ;;  %v534_v10 = vmul.f32 %v2737_v61, %v2737_v61 }
  0x98   : > { %4714 = vst [vmem:[#allocation17_spill] sm:$0xff] %v2804_v52  ;;  %v452_v55 = vsel %vm403_vm0, %v2804_v52, 0.0  ;;  %v443_v56 = vsel %vm403_vm0, %v2806_v54, 0.0 }
  0x99   : > { %v558_v2 = vsel %vm403_vm0, %v532_v63, 0.0  ;;  %v536_v5 = vmul.f32 %v2732_v59, %v2732_v59  ;;  %v564_v15 = vsel %vm403_vm0, %v534_v10, 0.0  ;;  %4715 = vst [vmem:[#allocation18_spill] sm:$0xff] %v2806_v54 }
  0x9a   : > { %432 = vadd.xlane.f32.xlu1 %v431_v60  ;;  %v424_v4 = vpop.xlane.xlu1 %423  ;;  %426 = vadd.xlane.f32.xlu0 %v425_v62  ;;  %v348_v60 = vld [vmem:[%s2651_s11 + $0x88] sm:$0xff]  ;;  %4717 = vst [vmem:[#allocation20_spill] sm:$0xff] %v2859_v50 }
  0x9b   : > { %559 = vadd.xlane.f32.xlu2 %v558_v2  ;;  %v489_v6 = vmul.f32 %v2701_v34, %v424_v4  ;;  %v570_v12 = vsel %vm403_vm0, %v536_v5, 0.0  ;;  %v372_v62 = vld [vmem:[%s2657_s14 + $0x88] sm:$0xff]  ;;  %v997_v2 = vld [vmem:[%s4662_s4 + $0x10] sm:$0xff]  ;;  %v995_v5 = vld [vmem:[%s4662_s4] sm:$0xff] }
  0x9c   : > { %v2814_v63 = vadd.f32 %v372_v62, %v348_v60  ;;  %1088 = vmatpush.msra.mxu0 %v997_v2  ;;  %2384 = vmatpush.msra.mxu3 %v997_v2  ;;  %v996_v4 = vld [vmem:[%s4662_s4 + $0x8] sm:$0xff] }
  0x9d   : > { %v2756_v13 = vsub.f32 %v2697_v26, %v489_v6 }
  0x9e   : > { %4716 = vst [vmem:[#allocation19_spill] sm:$0xff] %v2814_v63  ;;  %v455_v0 = vsel %vm403_vm0, %v2814_v63, 0.0  ;;  %1089 = vmatpush.msra.mxu0 %v996_v4  ;;  %2385 = vmatpush.msra.mxu3 %v996_v4 }
  0x9f   : > { %v537_v22 = vmul.f32 %v2756_v13, %v2756_v13 }
  0xa0   : > { %1090 = vmatpush.msra.mxu0 %v995_v5  ;;  %2386 = vmatpush.msra.mxu3 %v995_v5 }
  0xa1   : > { %v573_v25 = vsel %vm403_vm0, %v537_v22, 0.0 }
  0xa2   : > { %571 = vadd.xlane.f32.xlu1 %v570_v12  ;;  %565 = vadd.xlane.f32.xlu0 %v564_v15 }
  0xa3   : > { %429 = vadd.xlane.f32.xlu2 %v428_v16 }
  0xaa   : > { %574 = vadd.xlane.f32.xlu1 %v573_v25  ;;  %435 = vadd.xlane.f32.xlu0 %v434_v27 }
  0xab   : > { %568 = vadd.xlane.f32.xlu2 %v567_v28 }
  0xb2   : > { %447 = vadd.xlane.f32.xlu0 %v446_v36 }
  0xb3   : > { %438 = vadd.xlane.f32.xlu2 %v437_v37 }
  0xba   : > { %450 = vadd.xlane.f32.xlu0 %v449_v46 }
  0xbb   : > { %441 = vadd.xlane.f32.xlu2 %v440_v47 }
  0xc2   : > { %453 = vadd.xlane.f32.xlu0 %v452_v55 }
  0xc3   : > { %444 = vadd.xlane.f32.xlu2 %v443_v56 }
  0xcb   : > { %456 = vadd.xlane.f32.xlu2 %v455_v0 }
 0x105   : > { %v563_v6 = vpop.xlane.xlu1 %562  ;;  %v557_v10 = vpop.xlane.xlu0 %556 }
 0x106   : > { %v629_v9 = vmul.f32 %v563_v6, %v2701_v34  ;;  %v627_v12 = vmul.f32 %v557_v10, %v2701_v34  ;;  %v461_v6 = vsel %vm403_vm0, %v2859_v50, 0.0  ;;  %v375_v10 = vld [vmem:[%s2657_s14 + $0xa0] sm:$0xff] }
 0x108   : > { %v2832_v15 = vadd.f32 1e-05, %v629_v9  ;;  %v651_v16 = vadd.f32 1e-05, %v627_v12  ;;  %v351_v9 = vld [vmem:[%s2651_s11 + $0xa0] sm:$0xff] }
 0x10a   : > { %2434 = vrsqrt.f32 %v2832_v15  ;;  %vm681_vm3 = vweird.f32 %v651_v16  ;;  %vm701_vm6 = vweird.f32 %v2832_v15 }
 0x10b   : > { %2436 = vrsqrt.f32 %v651_v16 }
 0x10d   : > { %v433_v17 = vpop.xlane.xlu1 %432  ;;  %v427_v24 = vpop.xlane.xlu0 %426 }
 0x10e   : > { %v492_v21 = vmul.f32 %v2701_v34, %v433_v17  ;;  %v560_v22 = vpop.xlane.xlu2 %559  ;;  %v490_v27 = vmul.f32 %v2701_v34, %v427_v24 }
 0x10f   : > { %v628_v25 = vmul.f32 %v560_v22, %v2701_v34 }
 0x110   : > { %v2838_v28 = vpop.eup %2434  ;;  %v2841_v29 = vsub.f32 %v2721_v53, %v492_v21  ;;  %v2846_v32 = vsub.f32 %v2726_v57, %v490_v27 }
 0x111   : > { %v2437_v30 = vpop.eup %2436  ;;  %v2843_v31 = vadd.f32 1e-05, %v628_v25  ;;  %v696_v42 = vmul.f32 %v2838_v28, %v2832_v15  ;;  %vm702_vm7 = vweird.f32 %v2838_v28 }
 0x112   : > { %v676_v36 = vmul.f32 %v2437_v30, %v651_v16  ;;  %v540_v37 = vmul.f32 %v2841_v29, %v2841_v29  ;;  %v538_v43 = vmul.f32 %v2846_v32, %v2846_v32  ;;  %vm682_vm2 = vweird.f32 %v2437_v30  ;;  %v349_v16 = vld [vmem:[%s2651_s11 + $0x90] sm:$0xff]  ;;  %vm2932_vm10 = vmor %vm701_vm6, %vm702_vm7 }
 0x113   : > { %2438 = vrsqrt.f32 %v2843_v31  ;;  %v697_v60 = vmul.f32 %v2838_v28, %v696_v42  ;;  %vm683_vm4 = vmor %vm681_vm3, %vm682_vm2  ;;  %vm691_vm8 = vweird.f32 %v2843_v31 }
 0x114   : > { %v677_v46 = vmul.f32 %v2437_v30, %v676_v36  ;;  %v582_v47 = vsel %vm403_vm0, %v540_v37, 0.0  ;;  %v576_v49 = vsel %vm403_vm0, %v538_v43, 0.0  ;;  %v2881_v36 = vld [vmem:[%s4660_s2] ss:$0 sm:$0xff]  ;;  %v2883_v37 = vadd.f32 %v375_v10, %v351_v9 }
 0x115   : > { %v572_v48 = vpop.xlane.xlu1 %571  ;;  %583 = vadd.xlane.f32.xlu0 %v582_v47  ;;  %577 = vadd.xlane.f32.xlu1 %v576_v49  ;;  %v566_v56 = vpop.xlane.xlu0 %565  ;;  %v698_v22 = vmul.f32 0.5, %v697_v60 }
 0x116   : > { %v678_v51 = vmul.f32 0.5, %v677_v46  ;;  %v430_v55 = vpop.xlane.xlu2 %429  ;;  %v630_v0 = vmul.f32 %v566_v56, %v2701_v34  ;;  %v632_v21 = vmul.f32 %v572_v48, %v2701_v34  ;;  %4718 = vst [vmem:[#allocation21_spill] sm:$0xff] %v2883_v37 }
 0x117   : > { %v491_v62 = vmul.f32 %v2701_v34, %v430_v55  ;;  %v699_v48 = vsub.f32 1.5, %v698_v22  ;;  %v2893_v55 = vadd.f32 %v373_v38, %v349_v16 }
 0x118   : > { %v679_v1 = vsub.f32 1.5, %v678_v51  ;;  %v2867_v5 = vadd.f32 1e-05, %v630_v0  ;;  %v2888_v43 = vadd.f32 1e-05, %v632_v21  ;;  %v464_v0 = vsel %vm403_vm0, %v2883_v37, 0.0 }
 0x119   : > { %v2439_v2 = vpop.eup %2438  ;;  %v2865_v4 = vsub.f32 %v2752_v11, %v491_v62  ;;  %4719 = vst [vmem:[#allocation22_spill] sm:$0xff] %v2893_v55  ;;  %v2899_v62 = vld [vmem:[%s4661_s3] ss:$0 sm:$0xff]  ;;  %v458_v22 = vsel %vm403_vm0, %v2893_v55, 0.0 }
 0x11a   : > { %v680_v12 = vmul.f32 %v2437_v30, %v679_v1  ;;  %v686_v17 = vmul.f32 %v2439_v2, %v2843_v31  ;;  %2440 = vrsqrt.f32 %v2867_v5  ;;  %vm692_vm5 = vweird.f32 %v2439_v2 }
 0x11b   : > { %v539_v27 = vmul.f32 %v2865_v4, %v2865_v4  ;;  %2442 = vrsqrt.f32 %v2888_v43  ;;  %vm693_vm9 = vmor %vm691_vm8, %vm692_vm5  ;;  %vm711_vm11 = vweird.f32 %v2867_v5  ;;  %vm731_vm2 = vweird.f32 %v2888_v43 }
 0x11c   : > { %v684_v24 = vsel %vm683_vm4, %v2437_v30, %v680_v12  ;;  %v687_v25 = vmul.f32 %v2439_v2, %v686_v17  ;;  %v700_v17 = vmul.f32 %v2838_v28, %v699_v48 }
 0x11d   : > { %462 = vadd.xlane.f32.xlu0 %v461_v6  ;;  %v915_v39 = vmul.f32 %v684_v24, %v2709_v41  ;;  %v579_v46 = vsel %vm403_vm0, %v539_v27, 0.0  ;;  %v436_v47 = vpop.xlane.xlu0 %435  ;;  %v575_v60 = vpop.xlane.xlu1 %574  ;;  %v352_v24 = vld [vmem:[%s2651_s11 + $0xa8] sm:$0xff] }
 0x11e   : > { %v688_v42 = vmul.f32 0.5, %v687_v25  ;;  %v569_v30 = vpop.xlane.xlu2 %568  ;;  %580 = vadd.xlane.f32.xlu1 %v579_v46  ;;  %v493_v51 = vmul.f32 %v2701_v34, %v436_v47  ;;  %v633_v21 = vmul.f32 %v575_v60, %v2701_v34  ;;  %v376_v25 = vld [vmem:[%s2657_s14 + $0xa8] sm:$0xff] }
 0x11f   : > { %v631_v49 = vmul.f32 %v569_v30, %v2701_v34  ;;  %v943_v41 = vmul.f32 %v2881_v36, %v915_v39  ;;  %v2939_v48 = vadd.f32 %v376_v25, %v352_v24 }
 0x120   : > { %v689_v56 = vsub.f32 1.5, %v688_v42  ;;  %v2903_v1 = vpop.eup %2440  ;;  %v2910_v9 = vsub.f32 %v2768_v23, %v493_v51  ;;  %v2949_v60 = vadd.f32 1e-05, %v633_v21  ;;  %v353_v21 = vld [vmem:[%s2651_s11 + $0xb0] sm:$0xff] }
 0x121   : > { %v2907_v6 = vadd.f32 1e-05, %v631_v49  ;;  %v706_v12 = vmul.f32 %v2903_v1, %v2867_v5  ;;  %v971_v16 = vadd.f32 %v2899_v62, %v943_v41  ;;  %4722 = vst [vmem:[#allocation23_spill] sm:$0xff] %v2939_v48  ;;  %v467_v24 = vsel %vm403_vm0, %v2939_v48, 0.0 }
 0x122   : > { %v690_v10 = vmul.f32 %v2439_v2, %v689_v56  ;;  %v541_v38 = vmul.f32 %v2910_v9, %v2910_v9  ;;  %v704_v56 = vsel %vm2932_vm10, %v2838_v28, %v700_v17  ;;  %vm712_vm12 = vweird.f32 %v2903_v1 }
 0x123   : > { %2444 = vrsqrt.f32 %v2907_v6  ;;  %v707_v31 = vmul.f32 %v2903_v1, %v706_v12  ;;  %2357 = vmatmul.msk.f32.vlgmr.msra.gmra.mxu0 %vm403_vm0, %v971_v16  ;;  %v917_v17 = vmul.f32 %v704_v56, %v2706_v40  ;;  %vm713_vm13 = vmor %vm711_vm11, %vm712_vm12  ;;  %vm721_vm14 = vweird.f32 %v2907_v6 }
 0x124   : > { %v694_v27 = vsel %vm693_vm9, %v2439_v2, %v690_v10  ;;  %v585_v46 = vsel %vm403_vm0, %v541_v38, 0.0  ;;  %2446 = vrsqrt.f32 %v2949_v60  ;;  %vm741_vm5 = vweird.f32 %v2949_v60 }
 0x125   : > { %465 = vadd.xlane.f32.xlu0 %v464_v0  ;;  %v916_v42 = vmul.f32 %v694_v27, %v2729_v58  ;;  %v708_v30 = vmul.f32 0.5, %v707_v31  ;;  %v448_v47 = vpop.xlane.xlu0 %447  ;;  %586 = vadd.xlane.f32.xlu2 %v585_v46  ;;  %v2944_v58 = vpop.eup %2442  ;;  %v377_v27 = vld [vmem:[%s2657_s14 + $0xb0] sm:$0xff]  ;;  %v945_v56 = vmul.f32 %v2881_v36, %v917_v17 }
 0x126   : > { %v439_v2 = vpop.xlane.xlu2 %438  ;;  %459 = vadd.xlane.f32.xlu1 %v458_v22  ;;  %v497_v15 = vmul.f32 %v2701_v34, %v448_v47  ;;  %v726_v31 = vmul.f32 %v2944_v58, %v2888_v43  ;;  %v2981_v47 = vadd.f32 %v377_v27, %v353_v21  ;;  %vm732_vm3 = vweird.f32 %v2944_v58  ;;  %v354_v43 = vld [vmem:[%s2651_s11 + $0xb8] sm:$0xff]  ;;  %s4198_s11 = scalar_lea.vmem %s4666_s8, %s2645_s30 }
 0x127   : > { %v494_v49 = vmul.f32 %v2701_v34, %v439_v2  ;;  %v944_v51 = vmul.f32 %v2881_v36, %v916_v42  ;;  %v709_v0 = vsub.f32 1.5, %v708_v30  ;;  %v973_v27 = vadd.f32 %v2899_v62, %v945_v56  ;;  %vm3044_vm4 = vmor %vm731_vm2, %vm732_vm3 }
 0x128   : > { %v2959_v22 = vsub.f32 %v2780_v33, %v497_v15  ;;  %4723 = vst [vmem:[#allocation24_spill] sm:$0xff] %v2981_v47  ;;  %v470_v21 = vsel %vm403_vm0, %v2981_v47, 0.0 }
 0x129   : > { %v2951_v41 = vpop.eup %2444  ;;  %v2954_v10 = vsub.f32 %v2782_v35, %v494_v49  ;;  %v972_v25 = vadd.f32 %v2899_v62, %v944_v51  ;;  %v710_v39 = vmul.f32 %v2903_v1, %v709_v0  ;;  %v727_v51 = vmul.f32 %v2944_v58, %v726_v31 }
 0x12a   : > { %v716_v12 = vmul.f32 %v2951_v41, %v2907_v6  ;;  %v545_v38 = vmul.f32 %v2959_v22, %v2959_v22  ;;  %vm722_vm15 = vweird.f32 %v2951_v41 }
 0x12b   : > { %v542_v28 = vmul.f32 %v2954_v10, %v2954_v10  ;;  %2358 = vmatmul.msk.f32.gmra.mxu0 %vm403_vm0, %v972_v25  ;;  %v714_v0 = vsel %vm713_vm13, %v2903_v1, %v710_v39  ;;  %v728_v17 = vmul.f32 0.5, %v727_v51  ;;  %vm3013_vm1 = vmor %vm721_vm14, %vm722_vm15 }
 0x12c   : > { %v717_v16 = vmul.f32 %v2951_v41, %v716_v12  ;;  %v597_v2 = vsel %vm403_vm0, %v545_v38, 0.0  ;;  %v918_v31 = vmul.f32 %v714_v0, %v2737_v61 }
 0x12d   : > { %468 = vadd.xlane.f32.xlu0 %v467_v24  ;;  %v588_v40 = vsel %vm403_vm0, %v542_v28, 0.0  ;;  %v451_v46 = vpop.xlane.xlu0 %450  ;;  %598 = vadd.xlane.f32.xlu2 %v597_v2  ;;  %v2996_v28 = vpop.eup %2446 }
 0x12e   : > { %v718_v42 = vmul.f32 0.5, %v717_v16  ;;  %v442_v30 = vpop.xlane.xlu2 %441  ;;  %589 = vadd.xlane.f32.xlu1 %v588_v40  ;;  %v498_v15 = vmul.f32 %v2701_v34, %v451_v46  ;;  %v736_v16 = vmul.f32 %v2996_v28, %v2949_v60  ;;  %v729_v46 = vsub.f32 1.5, %v728_v17 }
 0x12f   : > { %v495_v49 = vmul.f32 %v2701_v34, %v442_v30  ;;  %vm742_vm6 = vweird.f32 %v2996_v28 }
 0x130   : > { %v719_v12 = vsub.f32 1.5, %v718_v42  ;;  %v2994_v25 = vsub.f32 %v2792_v44, %v498_v15  ;;  %v737_v15 = vmul.f32 %v2996_v28, %v736_v16  ;;  %v378_v16 = vld [vmem:[%s2657_s14 + $0xb8] sm:$0xff]  ;;  %vm743_vm7 = vmor %vm741_vm5, %vm742_vm6 }
 0x131   : > { %v2991_v24 = vsub.f32 %v2794_v45, %v495_v49  ;;  %v946_v49 = vmul.f32 %v2881_v36, %v918_v31  ;;  %v3051_v40 = vadd.f32 %v378_v16, %v354_v43 }
 0x132   : > { %v546_v1 = vmul.f32 %v2994_v25, %v2994_v25  ;;  %v720_v38 = vmul.f32 %v2951_v41, %v719_v12  ;;  %v738_v17 = vmul.f32 0.5, %v737_v15 }
 0x133   : > { %v543_v5 = vmul.f32 %v2991_v24, %v2991_v24  ;;  %2359 = vmatmul.msk.f32.gmra.mxu0 %vm403_vm0, %v973_v27  ;;  %4728 = vst [vmem:[#allocation25_spill] sm:$0xff] %v3051_v40 }
 0x134   : > { %v600_v39 = vsel %vm403_vm0, %v546_v1, 0.0  ;;  %v724_v51 = vsel %vm3013_vm1, %v2951_v41, %v720_v38  ;;  %v730_v1 = vmul.f32 %v2944_v58, %v729_v46 }
 0x135   : > { %471 = vadd.xlane.f32.xlu0 %v470_v21  ;;  %v591_v6 = vsel %vm403_vm0, %v543_v5, 0.0  ;;  %v454_v30 = vpop.xlane.xlu0 %453  ;;  %601 = vadd.xlane.f32.xlu2 %v600_v39  ;;  %v974_v5 = vadd.f32 %v2899_v62, %v946_v49  ;;  %v919_v41 = vmul.f32 %v724_v51, %v2759_v14  ;;  %v473_v49 = vsel %vm403_vm0, %v3051_v40, 0.0 }
 0x136   : > { %v445_v42 = vpop.xlane.xlu2 %444  ;;  %592 = vadd.xlane.f32.xlu1 %v591_v6  ;;  %v499_v2 = vmul.f32 %v2701_v34, %v454_v30  ;;  %v739_v30 = vsub.f32 1.5, %v738_v17 }
 0x137   : > { %v496_v61 = vmul.f32 %v2701_v34, %v445_v42  ;;  %v947_v14 = vmul.f32 %v2881_v36, %v919_v41  ;;  %v734_v42 = vsel %vm3044_vm4, %v2944_v58, %v730_v1 }
 0x138   : > { %v3029_v0 = vsub.f32 %v2804_v52, %v499_v2  ;;  %v920_v15 = vmul.f32 %v734_v42, %v2732_v59  ;;  %v740_v58 = vmul.f32 %v2996_v28, %v739_v30 }
 0x139   : > { %v3026_v56 = vsub.f32 %v2806_v54, %v496_v61  ;;  %v975_v46 = vadd.f32 %v2899_v62, %v947_v14 }
 0x13a   : > { %v547_v21 = vmul.f32 %v3029_v0, %v3029_v0  ;;  %v948_v60 = vmul.f32 %v2881_v36, %v920_v15 }
 0x13b   : > { %v544_v12 = vmul.f32 %v3026_v56, %v3026_v56  ;;  %2360 = vmatmul.msk.f32.gmra.mxu0 %vm403_vm0, %v974_v5 }
 0x13c   : > { %v603_v31 = vsel %vm403_vm0, %v547_v21, 0.0  ;;  %v976_v21 = vadd.f32 %v2899_v62, %v948_v60 }
 0x13d   : > { %v594_v27 = vsel %vm403_vm0, %v544_v12, 0.0  ;;  %604 = vadd.xlane.f32.xlu2 %v603_v31  ;;  %v744_v12 = vsel %vm743_vm7, %v2996_v28, %v740_v58 }
 0x13e   : > { %v457_v6 = vpop.xlane.xlu2 %456  ;;  %595 = vadd.xlane.f32.xlu1 %v594_v27  ;;  %v921_v5 = vmul.f32 %v744_v12, %v2756_v13 }
 0x13f   : > { %v500_v39 = vmul.f32 %v2701_v34, %v457_v6 }
 0x140   : > { %v949_v59 = vmul.f32 %v2881_v36, %v921_v5 }
 0x141   : > { %v3057_v61 = vsub.f32 %v2814_v63, %v500_v39 }
 0x142   : > { %v977_v41 = vadd.f32 %v2899_v62, %v949_v59 }
 0x143   : > { %v548_v2 = vmul.f32 %v3057_v61, %v3057_v61  ;;  %2361 = vmatmul.msk.f32.gmra.mxu0 %vm403_vm0, %v975_v46 }
 0x145   : > { %v606_v51 = vsel %vm403_vm0, %v548_v2, 0.0  ;;  %474 = vadd.xlane.f32.xlu2 %v473_v49 }
 0x146   : > { %607 = vadd.xlane.f32.xlu1 %v606_v51 }
 0x14b   : > { %2362 = vmatmul.msk.f32.gmra.mxu0 %vm403_vm0, %v976_v21 }
 0x153   : > { %2363 = vmatmul.msk.f32.gmra.mxu0 %vm403_vm0, %v977_v41 }
 0x188   : > { %v584_v1 = vpop.xlane.xlu0 %583  ;;  %v578_v17 = vpop.xlane.xlu1 %577 }
 0x189   : > { %v636_v27 = vmul.f32 %v584_v1, %v2701_v34  ;;  %v634_v31 = vmul.f32 %v578_v17, %v2701_v34 }
 0x18b   : > { %v658_v43 = vadd.f32 1e-05, %v634_v31  ;;  %v3080_v28 = vadd.f32 1e-05, %v636_v27 }
 0x18d   : > { %2448 = vrsqrt.f32 %v658_v43  ;;  %vm751_vm9 = vweird.f32 %v658_v43  ;;  %vm771_vm14 = vweird.f32 %v3080_v28 }
 0x18e   : > { %2450 = vrsqrt.f32 %v3080_v28 }
 0x190   : > { %v463_v16 = vpop.xlane.xlu0 %462 }
 0x191   : > { %v502_v13 = vmul.f32 %v2701_v34, %v463_v16  ;;  %v581_v38 = vpop.xlane.xlu1 %580 }
 0x192   : > { %v635_v6 = vmul.f32 %v581_v38, %v2701_v34 }
 0x193   : > { %v3086_v39 = vsub.f32 %v2859_v50, %v502_v13  ;;  %v2449_v14 = vpop.eup %2448 }
 0x194   : > { %v746_v42 = vmul.f32 %v2449_v14, %v658_v43  ;;  %v659_v30 = vadd.f32 1e-05, %v635_v6  ;;  %v3090_v46 = vpop.eup %2450  ;;  %vm752_vm8 = vweird.f32 %v2449_v14 }
 0x195   : > { %v550_v2 = vmul.f32 %v3086_v39, %v3086_v39  ;;  %v766_v12 = vmul.f32 %v3090_v46, %v3080_v28  ;;  %vm753_vm10 = vmor %vm751_vm9, %vm752_vm8  ;;  %vm772_vm15 = vweird.f32 %v3090_v46 }
 0x196   : > { %v747_v49 = vmul.f32 %v2449_v14, %v746_v42  ;;  %2452 = vrsqrt.f32 %v659_v30  ;;  %vm761_vm12 = vweird.f32 %v659_v30  ;;  %vm3171_vm1 = vmor %vm771_vm14, %vm772_vm15 }
 0x197   : > { %v612_v15 = vsel %vm403_vm0, %v550_v2, 0.0  ;;  %v767_v38 = vmul.f32 %v3090_v46, %v766_v12 }
 0x198   : > { %613 = vadd.xlane.f32.xlu1 %v612_v15  ;;  %v466_v58 = vpop.xlane.xlu0 %465  ;;  %v748_v51 = vmul.f32 0.5, %v747_v49  ;;  %v587_v5 = vpop.xlane.xlu2 %586 }
 0x199   : > { %v503_v60 = vmul.f32 %v2701_v34, %v466_v58  ;;  %v460_v21 = vpop.xlane.xlu1 %459  ;;  %v637_v1 = vmul.f32 %v587_v5, %v2701_v34 }
 0x19a   : > { %v749_v59 = vsub.f32 1.5, %v748_v51  ;;  %v501_v41 = vmul.f32 %v2701_v34, %v460_v21  ;;  %v768_v21 = vmul.f32 0.5, %v767_v38 }
 0x19b   : > { %v3099_v17 = vsub.f32 %v2883_v37, %v503_v60  ;;  %v3110_v2 = vadd.f32 1e-05, %v637_v1  ;;  %v3120_v60 = vld [vmem:[%s4663_s5] ss:$0 sm:$0xff] }
 0x19c   : > { %v3101_v27 = vpop.eup %2452  ;;  %v750_v31 = vmul.f32 %v2449_v14, %v749_v59  ;;  %v3104_v16 = vsub.f32 %v2893_v55, %v501_v41 }
 0x19d   : > { %v551_v13 = vmul.f32 %v3099_v17, %v3099_v17  ;;  %v756_v6 = vmul.f32 %v3101_v27, %v659_v30  ;;  %2454 = vrsqrt.f32 %v3110_v2  ;;  %vm762_vm11 = vweird.f32 %v3101_v27 }
 0x19e   : > { %v754_v42 = vsel %vm753_vm10, %v2449_v14, %v750_v31  ;;  %v549_v49 = vmul.f32 %v3104_v16, %v3104_v16  ;;  %vm3147_vm13 = vmor %vm761_vm12, %vm762_vm11  ;;  %vm781_vm2 = vweird.f32 %v3110_v2 }
 0x19f   : > { %v757_v15 = vmul.f32 %v3101_v27, %v756_v6  ;;  %v615_v43 = vsel %vm403_vm0, %v551_v13, 0.0  ;;  %v922_v51 = vmul.f32 %v754_v42, %v2846_v32 }
 0x1a0   : > { %v469_v58 = vpop.xlane.xlu0 %468  ;;  %v609_v12 = vsel %vm403_vm0, %v549_v49, 0.0  ;;  %616 = vadd.xlane.f32.xlu2 %v615_v43  ;;  %v599_v41 = vpop.xlane.xlu2 %598 }
 0x1a1   : > { %v504_v14 = vmul.f32 %v2701_v34, %v469_v58  ;;  %v758_v5 = vmul.f32 0.5, %v757_v15  ;;  %610 = vadd.xlane.f32.xlu0 %v609_v12  ;;  %v590_v59 = vpop.xlane.xlu1 %589  ;;  %v950_v1 = vmul.f32 %v2881_v36, %v922_v51  ;;  %v1092_v32 = vpop.f32.mrf.mxu0  ;;  %v641_v13 = vmul.f32 %v599_v41, %v2701_v34  ;;  %v2139_v12 = vld [vmem:[%s4664_s6 + $0x78] sm:$0xff] }
 0x1a2   : > { %v638_v31 = vmul.f32 %v590_v59, %v2701_v34  ;;  %v3134_v49 = vadd.f32 %v3120_v60, %v1092_v32  ;;  %2144 = vmatpush.msra.mxu1 %v2139_v12  ;;  %2387 = vmatpush.msra.mxu2 %v2139_v12 }
 0x1a3   : > { %v3129_v6 = vsub.f32 %v2939_v48, %v504_v14  ;;  %v759_v42 = vsub.f32 1.5, %v758_v5  ;;  %v978_v38 = vadd.f32 %v2899_v62, %v950_v1  ;;  %v3138_v43 = vadd.f32 1e-05, %v641_v13  ;;  %2388 = vmatpush.msrb.mxu3 %v2139_v12  ;;  %v3160_v41 = vpop.eup %2454 }
 0x1a4   : > { %v3136_v15 = vadd.f32 1e-05, %v638_v31  ;;  %v769_v14 = vsub.f32 1.5, %v768_v21  ;;  %v2138_v21 = vld [vmem:[%s4664_s6 + $0x70] sm:$0xff]  ;;  %v3165_v1 = vmul.f32 0.70710677, %v3134_v49  ;;  %vm782_vm3 = vweird.f32 %v3160_v41 }
 0x1a5   : > { %v552_v58 = vmul.f32 %v3129_v6, %v3129_v6  ;;  %v760_v51 = vmul.f32 %v3101_v27, %v759_v42  ;;  %2364 = vmatmul.msk.f32.gmra.mxu0 %vm403_vm0, %v978_v38  ;;  %2145 = vmatpush.msra.mxu1 %v2138_v21  ;;  %vm821_vm5 = vweird.f32 %v3138_v43  ;;  %vm3287_vm7 = vmor %vm781_vm2, %vm782_vm3 }
 0x1a6   : > { %2456 = vrsqrt.f32 %v3136_v15  ;;  %2389 = vmatpush.msra.mxu2 %v2138_v21  ;;  %2390 = vmatpush.msrb.mxu3 %v2138_v21  ;;  %v770_v31 = vmul.f32 %v3090_v46, %v769_v14  ;;  %v1212_v5 = vand.u32 2147483647, %v3165_v1  ;;  %vm791_vm4 = vweird.f32 %v3136_v15 }
 0x1a7   : > { %v764_v59 = vsel %vm3147_vm13, %v3101_v27, %v760_v51  ;;  %2458 = vrsqrt.f32 %v3138_v43  ;;  %v618_v30 = vsel %vm403_vm0, %v552_v58, 0.0  ;;  %v776_v51 = vmul.f32 %v3160_v41, %v3110_v2 }
 0x1a8   : > { %v602_v32 = vpop.xlane.xlu2 %601  ;;  %v923_v28 = vmul.f32 %v764_v59, %v2865_v4  ;;  %v472_v21 = vpop.xlane.xlu0 %471  ;;  %v774_v4 = vsel %vm3171_vm1, %v3090_v46, %v770_v31  ;;  %v1236_v50 = vmul.f32 0.3275911, %v1212_v5  ;;  %v1860_v52 = vsub.f32 0.0, %v1212_v5 }
 0x1a9   : > { %v593_v27 = vpop.xlane.xlu1 %592  ;;  %619 = vadd.xlane.f32.xlu0 %v618_v30  ;;  %v1095_v13 = vpop.f32.mrf.mxu0  ;;  %v642_v38 = vmul.f32 %v602_v32, %v2701_v34  ;;  %v777_v48 = vmul.f32 %v3160_v41, %v776_v51  ;;  %v505_v55 = vmul.f32 %v2701_v34, %v472_v21  ;;  %v924_v31 = vmul.f32 %v774_v4, %v2841_v29  ;;  %v2136_v4 = vld [vmem:[%s4664_s6 + $0x60] sm:$0xff] }
 0x1aa   : > { %v639_v42 = vmul.f32 %v593_v27, %v2701_v34  ;;  %v951_v32 = vmul.f32 %v2881_v36, %v923_v28 }
 0x1ab   : > { %v3189_v27 = vadd.f32 1e-05, %v642_v38  ;;  %v2137_v38 = vld [vmem:[%s4664_s6 + $0x68] sm:$0xff]  ;;  %v778_v21 = vmul.f32 0.5, %v777_v48  ;;  %v952_v44 = vmul.f32 %v2881_v36, %v924_v31 }
 0x1ac   : > { %v3177_v12 = vpop.eup %2456  ;;  %v3182_v14 = vadd.f32 1e-05, %v639_v42  ;;  %v3196_v42 = vadd.f32 %v3120_v60, %v1095_v13  ;;  %v979_v58 = vadd.f32 %v2899_v62, %v951_v32  ;;  %2146 = vmatpush.msra.mxu1 %v2137_v38  ;;  %2391 = vmatpush.msra.mxu2 %v2137_v38  ;;  %v3218_v32 = vsub.f32 %v2981_v47, %v505_v55 }
 0x1ad   : > { %v3180_v30 = vpop.eup %2458  ;;  %v786_v59 = vmul.f32 %v3177_v12, %v3136_v15  ;;  %2392 = vmatpush.msrb.mxu3 %v2137_v38  ;;  %v1884_v47 = vmul.f32 %v1860_v52, %v1212_v5  ;;  %vm792_vm6 = vweird.f32 %v3177_v12  ;;  %v3317_v15 = vmul.f32 0.5, %v3134_v49 }
 0x1ae   : > { %v816_v37 = vmul.f32 %v3180_v30, %v3138_v43  ;;  %2460 = vrsqrt.f32 %v3182_v14  ;;  %v3210_v29 = vmul.f32 0.70710677, %v3196_v42  ;;  %4733 = vst [vmem:[#allocation26_spill] sm:$0xff] %v3218_v32  ;;  %2365 = vmatmul.msk.f32.gmra.mxu0 %vm403_vm0, %v979_v58  ;;  %2147 = vmatpush.msra.mxu1 %v2136_v4  ;;  %vm3303_vm8 = vmor %vm791_vm4, %vm792_vm6  ;;  %vm822_vm9 = vweird.f32 %v3180_v30 }
 0x1af   : > { %v787_v28 = vmul.f32 %v3177_v12, %v786_v59  ;;  %2462 = vrsqrt.f32 %v3189_v27  ;;  %v3215_v59 = vadd.f32 1.0, %v1236_v50  ;;  %v2135_v50 = vld [vmem:[%s4664_s6 + $0x58] sm:$0xff]  ;;  %2393 = vmatpush.msra.mxu2 %v2136_v4  ;;  %2394 = vmatpush.msrb.mxu3 %v2136_v4  ;;  %v779_v4 = vsub.f32 1.5, %v778_v21  ;;  %v2133_v21 = vld [vmem:[%s4664_s6 + $0x48] sm:$0xff]  ;;  %vm3339_vm11 = vmor %vm821_vm5, %vm822_vm9 }
 0x1b0   : > { %v817_v63 = vmul.f32 %v3180_v30, %v816_v37  ;;  %v605_v48 = vpop.xlane.xlu2 %604  ;;  %2148 = vmatpush.msra.mxu1 %v2135_v50  ;;  %v1908_v11 = vmul.f32 1.442695, %v1884_v47  ;;  %vm831_vm10 = vweird.f32 %v3189_v27  ;;  %vm801_vm12 = vweird.f32 %v3182_v14 }
 0x1b1   : > { %v596_v46 = vpop.xlane.xlu1 %595  ;;  %v1098_v13 = vpop.f32.mrf.mxu0  ;;  %v788_v38 = vmul.f32 0.5, %v787_v28  ;;  %v643_v31 = vmul.f32 %v605_v48, %v2701_v34  ;;  %2395 = vmatpush.msra.mxu2 %v2135_v50  ;;  %2396 = vmatpush.msrb.mxu3 %v2135_v50  ;;  %v980_v50 = vadd.f32 %v2899_v62, %v952_v44  ;;  %v780_v53 = vmul.f32 %v3160_v41, %v779_v4 }
 0x1b2   : > { %v640_v51 = vmul.f32 %v596_v46, %v2701_v34  ;;  %v3224_v37 = vadd.f32 %v3120_v60, %v1098_v13  ;;  %v818_v58 = vmul.f32 0.5, %v817_v63  ;;  %v3235_v13 = vand.u32 2147483647, %v3210_v29 }
 0x1b3   : > { %v553_v63 = vmul.f32 %v3218_v32, %v3218_v32  ;;  %v789_v52 = vsub.f32 1.5, %v788_v38  ;;  %v3262_v44 = vadd.f32 1e-05, %v643_v31 }
 0x1b4   : > { %v3221_v46 = vadd.f32 1e-05, %v640_v51  ;;  %v3231_v55 = vpop.eup %2460  ;;  %v2134_v51 = vld [vmem:[%s4664_s6 + $0x50] sm:$0xff]  ;;  %v3251_v54 = vmul.f32 0.70710677, %v3224_v37  ;;  %v819_v45 = vsub.f32 1.5, %v818_v58 }
 0x1b5   : > { %v3241_v28 = vpop.eup %2462  ;;  %2149 = vmatpush.msra.mxu1 %v2134_v51  ;;  %v796_v33 = vmul.f32 %v3231_v55, %v3182_v14  ;;  %2397 = vmatpush.msra.mxu2 %v2134_v51  ;;  %v1237_v35 = vmul.f32 0.3275911, %v3235_v13  ;;  %v621_v57 = vsel %vm403_vm0, %v553_v63, 0.0  ;;  %v2132_v58 = vld [vmem:[%s4664_s6 + $0x40] sm:$0xff]  ;;  %v1861_v31 = vsub.f32 0.0, %v3235_v13 }
 0x1b6   : > { %2464 = vrsqrt.f32 %v3221_v46  ;;  %v826_v48 = vmul.f32 %v3241_v28, %v3189_v27  ;;  %2398 = vmatpush.msrb.mxu3 %v2134_v51  ;;  %2366 = vmatmul.msk.f32.gmra.mxu0 %vm403_vm0, %v980_v50  ;;  %v3276_v26 = vand.u32 2147483647, %v3251_v54  ;;  %vm802_vm13 = vweird.f32 %v3231_v55 }
 0x1b7   : > { %2466 = vrcp.f32 %v3215_v59  ;;  %2150 = vmatpush.msra.mxu1 %v2133_v21  ;;  %2399 = vmatpush.msra.mxu2 %v2133_v21  ;;  %vm832_vm14 = vweird.f32 %v3241_v28  ;;  %vm811_vm15 = vweird.f32 %v3221_v46  ;;  %vm841_vm3 = vweird.f32 %v3262_v44  ;;  %vm3444_vm5 = vmor %vm801_vm12, %vm802_vm13 }
 0x1b8   : > { %v827_v23 = vmul.f32 %v3241_v28, %v826_v48  ;;  %2400 = vmatpush.msrb.mxu3 %v2133_v21  ;;  %v797_v48 = vmul.f32 %v3231_v55, %v796_v33  ;;  %622 = vadd.xlane.f32.xlu1 %v621_v57  ;;  %v3292_v33 = vmul.f32 %v3177_v12, %v789_v52  ;;  %2468 = vrsqrt.f32 %v3262_v44  ;;  %v475_v49 = vpop.xlane.xlu2 %474  ;;  %vm3407_vm1 = vmor %vm831_vm10, %vm832_vm14 }
 0x1b9   : > { %v1101_v5 = vpop.f32.mrf.mxu0  ;;  %v608_v51 = vpop.xlane.xlu1 %607  ;;  %2151 = vmatpush.msra.mxu1 %v2132_v58  ;;  %2401 = vmatpush.msra.mxu2 %v2132_v58  ;;  %v3309_v52 = vadd.f32 1.0, %v1237_v35  ;;  %2470 = vpow2.f32 %v1908_v11  ;;  %v1238_v63 = vmul.f32 0.3275911, %v3276_v26  ;;  %v2129_v11 = vld [vmem:[%s4664_s6 + $0x28] sm:$0xff] }
 0x1ba   : > { %v3279_v47 = vadd.f32 %v3120_v60, %v1101_v5  ;;  %v828_v50 = vmul.f32 0.5, %v827_v23  ;;  %v644_v57 = vmul.f32 %v608_v51, %v2701_v34  ;;  %v2131_v5 = vld [vmem:[%s4664_s6 + $0x38] sm:$0xff]  ;;  %2402 = vmatpush.msrb.mxu3 %v2132_v58  ;;  %v820_v23 = vmul.f32 %v3180_v30, %v819_v45  ;;  %v2130_v45 = vld [vmem:[%s4664_s6 + $0x30] sm:$0xff] }
 0x1bb   : > { %2152 = vmatpush.msra.mxu1 %v2131_v5  ;;  %v784_v51 = vsel %vm3287_vm7, %v3160_v41, %v780_v53  ;;  %2403 = vmatpush.msra.mxu2 %v2131_v5  ;;  %v798_v58 = vmul.f32 0.5, %v797_v48  ;;  %v3344_v48 = vmul.f32 %v1861_v31, %v3235_v13  ;;  %2472 = vrcp.f32 %v3309_v52 }
 0x1bc   : > { %v3264_v38 = vpop.eup %2464  ;;  %2404 = vmatpush.msrb.mxu3 %v2131_v5  ;;  %v3329_v53 = vmul.f32 0.70710677, %v3279_v47  ;;  %v829_v5 = vsub.f32 1.5, %v828_v50  ;;  %v3347_v20 = vadd.f32 1e-05, %v644_v57  ;;  %v824_v43 = vsel %vm3339_vm11, %v3180_v30, %v820_v23  ;;  %v2128_v30 = vld [vmem:[%s4664_s6 + $0x20] sm:$0xff] }
 0x1bd   : > { %v3281_v4 = vpop.eup %2466  ;;  %v806_v21 = vmul.f32 %v3264_v38, %v3221_v46  ;;  %2153 = vmatpush.msra.mxu1 %v2130_v45  ;;  %2405 = vmatpush.msra.mxu2 %v2130_v45  ;;  %v506_v57 = vmul.f32 %v2701_v34, %v475_v49  ;;  %v799_v23 = vsub.f32 1.5, %v798_v58  ;;  %v929_v19 = vmul.f32 %v824_v43, %v2959_v22  ;;  %v2125_v43 = vld [vmem:[%s4664_s6 + $0x8] sm:$0xff] }
 0x1be   : > { %v3325_v35 = vmul.f32 %v3281_v4, %v3215_v59  ;;  %2406 = vmatpush.msrb.mxu3 %v2130_v45  ;;  %v3358_v31 = vand.u32 2147483647, %v3329_v53  ;;  %v3360_v50 = vpop.eup %2468  ;;  %2474 = vrsqrt.f32 %v3347_v20  ;;  %v925_v45 = vmul.f32 %v784_v51, %v2910_v9  ;;  %v2127_v51 = vld [vmem:[%s4664_s6 + $0x18] sm:$0xff] }
 0x1bf   : > { %v807_v13 = vmul.f32 %v3264_v38, %v806_v21  ;;  %2154 = vmatpush.msra.mxu1 %v2129_v11  ;;  %2407 = vmatpush.msra.mxu2 %v2129_v11  ;;  %v3369_v21 = vadd.f32 1.0, %v1238_v63  ;;  %v836_v41 = vmul.f32 %v3360_v50, %v3262_v44  ;;  %v3374_v3 = vpop.eup %2470  ;;  %v830_v49 = vmul.f32 %v3241_v28, %v829_v5 }
 0x1c0   : > { %2408 = vmatpush.msrb.mxu3 %v2129_v11  ;;  %v1239_v18 = vmul.f32 0.3275911, %v3358_v31  ;;  %v953_v9 = vmul.f32 %v2881_v36, %v925_v45  ;;  %v3389_v7 = vsub.f32 %v3051_v40, %v506_v57  ;;  %v3401_v22 = vmul.f32 %v3231_v55, %v799_v23 }
 0x1c1   : > { %v1104_v8 = vpop.f32.mrf.mxu0  ;;  %2155 = vmatpush.msra.mxu1 %v2128_v30  ;;  %2409 = vmatpush.msra.mxu2 %v2128_v30  ;;  %v808_v63 = vmul.f32 0.5, %v807_v13  ;;  %v837_v11 = vmul.f32 %v3360_v50, %v836_v41  ;;  %v2126_v13 = vld [vmem:[%s4664_s6 + $0x10] sm:$0xff]  ;;  %v3398_v41 = vpop.eup %2472  ;;  %2476 = vrcp.f32 %v3369_v21  ;;  %vm812_vm2 = vweird.f32 %v3264_v38 }
 0x1c2   : > { %2410 = vmatpush.msrb.mxu3 %v2128_v30  ;;  %v3386_v5 = vadd.f32 1.0, %v1239_v18  ;;  %4740 = vst [vmem:[#allocation27_spill] sm:$0xff] %v3389_v7  ;;  %v981_v45 = vadd.f32 %v2899_v62, %v953_v9  ;;  %v3393_v32 = vadd.f32 %v3120_v60, %v1104_v8  ;;  %v834_v27 = vsel %vm3407_vm1, %v3241_v28, %v830_v49  ;;  %vm3472_vm6 = vmor %vm811_vm15, %vm812_vm2 }
 0x1c3   : > { %2156 = vmatpush.msra.mxu1 %v2127_v51  ;;  %2411 = vmatpush.msra.mxu2 %v2127_v51  ;;  %v838_v8 = vmul.f32 0.5, %v837_v11  ;;  %v957_v30 = vmul.f32 %v2881_v36, %v929_v19  ;;  %v809_v11 = vsub.f32 1.5, %v808_v63  ;;  %vm842_vm4 = vweird.f32 %v3360_v50 }
 0x1c4   : > { %2412 = vmatpush.msrb.mxu3 %v2127_v51  ;;  %v3416_v57 = vpop.eup %2474  ;;  %2367 = vmatmul.msk.f32.gmra.mxu0 %vm403_vm0, %v981_v45  ;;  %v3425_v23 = vmul.f32 0.70710677, %v3393_v32  ;;  %v2124_v51 = vld [vmem:[%s4664_s6] sm:$0xff]  ;;  %2478 = vrcp.f32 %v3386_v5  ;;  %v554_v45 = vmul.f32 %v3389_v7, %v3389_v7  ;;  %v930_v40 = vmul.f32 %v834_v27, %v2994_v25  ;;  %vm3486_vm7 = vmor %vm841_vm3, %vm842_vm4 }
 0x1c5   : > { %2157 = vmatpush.msra.mxu1 %v2126_v13  ;;  %2413 = vmatpush.msra.mxu2 %v2126_v13  ;;  %v839_v58 = vsub.f32 1.5, %v838_v8  ;;  %v846_v28 = vmul.f32 %v3416_v57, %v3347_v20  ;;  %v985_v19 = vadd.f32 %v2899_v62, %v957_v30  ;;  %v4745_v8 = vsel %vm3303_vm8, %v3177_v12, %v3292_v33 }
 0x1c6   : > { %2414 = vmatpush.msrb.mxu3 %v2126_v13  ;;  %v3436_v49 = vand.u32 2147483647, %v3425_v23  ;;  %v926_v30 = vmul.f32 %v4745_v8, %v2954_v10  ;;  %v1300_v14 = vmul.f32 %v3398_v41, %v3309_v52  ;;  %v810_v10 = vmul.f32 %v3264_v38, %v809_v11 }
 0x1c7   : > { %2158 = vmatpush.msra.mxu1 %v2125_v43  ;;  %2415 = vmatpush.msra.mxu2 %v2125_v43  ;;  %v840_v13 = vmul.f32 %v3360_v50, %v839_v58  ;;  %v847_v18 = vmul.f32 %v3416_v57, %v846_v28  ;;  %v624_v58 = vsel %vm403_vm0, %v554_v45, 0.0  ;;  %v3465_v2 = vpop.eup %2476  ;;  %v958_v27 = vmul.f32 %v2881_v36, %v930_v40 }
 0x1c8   : > { %2371 = vmatmul.msk.f32.vlgmr.msra.gmra.mxu3 %vm403_vm0, %v985_v19  ;;  %v1240_v7 = vmul.f32 0.3275911, %v3436_v49  ;;  %625 = vadd.xlane.f32.xlu2 %v624_v58  ;;  %v954_v33 = vmul.f32 %v2881_v36, %v926_v30  ;;  %vm851_vm8 = vweird.f32 %v3347_v20  ;;  %vm852_vm9 = vweird.f32 %v3416_v57 }
 0x1c9   : > { %v1107_v9 = vpop.f32.mrf.mxu0  ;;  %2159 = vmatpush.msra.mxu1 %v2124_v51  ;;  %2417 = vmatpush.msra.mxu2 %v2124_v51  ;;  %v848_v12 = vmul.f32 0.5, %v847_v18  ;;  %v844_v36 = vsel %vm3486_vm7, %v3360_v50, %v840_v13  ;;  %v4750_v19 = vsub.f32 0.0, %v3276_v26  ;;  %v986_v45 = vadd.f32 %v2899_v62, %v958_v27  ;;  %vm3517_vm10 = vmor %vm851_vm8, %vm852_vm9 }
 0x1ca   : > { %v3463_v28 = vadd.f32 %v3120_v60, %v1107_v9  ;;  %2416 = vmatpush.msrb.mxu3 %v2125_v43  ;;  %v804_v9 = vsel %vm3444_vm5, %v3231_v55, %v3401_v22  ;;  %v3492_v11 = vadd.f32 1.0, %v1240_v7  ;;  %v982_v55 = vadd.f32 %v2899_v62, %v954_v33  ;;  %v3501_v44 = vpop.eup %2478 }
 0x1cb   : > { %v849_v40 = vsub.f32 1.5, %v848_v12  ;;  %v1286_v43 = vsub.f32 1.0, %v3325_v35  ;;  %v1886_v7 = vmul.f32 %v4750_v19, %v3276_v26  ;;  %v814_v63 = vsel %vm3472_vm6, %v3264_v38, %v810_v10 }
 0x1cc   : > { %v3499_v22 = vmul.f32 0.70710677, %v3463_v28  ;;  %2418 = vmatpush.msrb.mxu3 %v2124_v51  ;;  %2480 = vrcp.f32 %v3492_v11  ;;  %2368 = vmatmul.msk.f32.gmra.mxu0 %vm403_vm0, %v982_v55  ;;  %v927_v51 = vmul.f32 %v804_v9, %v2991_v24  ;;  %vm1289_vm11 = vweird.f32 %v3215_v59  ;;  %v3540_v24 = vld [vmem:[%s4660_s2] ss:$0 sm:$0xff] }
 0x1cd   : > { %v850_v13 = vmul.f32 %v3416_v57, %v849_v40  ;;  %v1301_v38 = vsub.f32 1.0, %v1300_v14  ;;  %v1315_v18 = vmul.f32 %v3465_v2, %v3369_v21  ;;  %v931_v8 = vmul.f32 %v844_v36, %v3029_v0 }
 0x1ce   : > { %v3523_v26 = vand.u32 2147483647, %v3499_v22  ;;  %v1330_v30 = vmul.f32 %v3501_v44, %v3386_v5  ;;  %v1863_v58 = vsub.f32 0.0, %v3358_v31  ;;  %v955_v14 = vmul.f32 %v3540_v24, %v927_v51 }
 0x1cf   : > { %v854_v0 = vsel %vm3517_vm10, %v3416_v57, %v850_v13  ;;  %v928_v12 = vmul.f32 %v814_v63, %v3026_v56  ;;  %v1287_v33 = vmul.f32 %v3281_v4, %v1286_v43  ;;  %vm1304_vm12 = vweird.f32 %v3309_v52 }
 0x1d0   : > { %v1241_v10 = vmul.f32 0.3275911, %v3523_v26  ;;  %2372 = vmatmul.msk.f32.gmra.mxu3 %vm403_vm0, %v986_v45  ;;  %v1910_v27 = vmul.f32 1.442695, %v3344_v48  ;;  %v1302_v57 = vmul.f32 %v3398_v41, %v1301_v38  ;;  %v1316_v36 = vsub.f32 1.0, %v1315_v18 }
 0x1d1   : > { %v1110_v50 = vpop.f32.mrf.mxu0  ;;  %v1912_v40 = vmul.f32 1.442695, %v1886_v7  ;;  %v1887_v19 = vmul.f32 %v1863_v58, %v3358_v31  ;;  %v983_v56 = vadd.f32 %v2899_v62, %v955_v14  ;;  %v932_v43 = vmul.f32 %v854_v0, %v3057_v61  ;;  %v3574_v7 = vld [vmem:[%s4661_s3] ss:$0 sm:$0xff] }
 0x1d2   : > { %v3531_v20 = vadd.f32 %v3120_v60, %v1110_v50  ;;  %v959_v60 = vmul.f32 %v3540_v24, %v931_v8  ;;  %v3555_v9 = vadd.f32 1.0, %v1241_v10  ;;  %v3557_v46 = vpop.eup %2480  ;;  %v1331_v48 = vsub.f32 1.0, %v1330_v30 }
 0x1d3   : > { %v3569_v45 = vmul.f32 %v3557_v46, %v3492_v11  ;;  %v956_v31 = vmul.f32 %v3540_v24, %v928_v12  ;;  %vm1319_vm13 = vweird.f32 %v3369_v21  ;;  %v1288_v62 = vadd.f32 %v3281_v4, %v1287_v33 }
 0x1d4   : > { %v3549_v25 = vmul.f32 0.70710677, %v3531_v20  ;;  %2482 = vrcp.f32 %v3555_v9  ;;  %v987_v50 = vadd.f32 %v3574_v7, %v959_v60  ;;  %2369 = vmatmul.msk.f32.gmra.mxu0 %vm403_vm0, %v983_v56  ;;  %vm1290_vm14 = vweird.f32 %v3281_v4 }
 0x1d5   : > { %2484 = vpow2.f32 %v1910_v27  ;;  %v1317_v61 = vmul.f32 %v3465_v2, %v1316_v36  ;;  %v1293_v13 = vand.u32 2147483647, %v3215_v59  ;;  %vm1334_vm15 = vweird.f32 %v3386_v5  ;;  %vm3589_vm1 = vmor %vm1289_vm11, %vm1290_vm14 }
 0x1d6   : > { %v3561_v55 = vand.u32 2147483647, %v3549_v25  ;;  %2486 = vpow2.f32 %v1912_v40  ;;  %v1914_v35 = vmul.f32 1.442695, %v1887_v19  ;;  %v960_v51 = vmul.f32 %v3540_v24, %v932_v43 }
 0x1d7   : > { %v1295_v18 = vand.u32 2147483648, %v3215_v59  ;;  %v1303_v8 = vadd.f32 %v3398_v41, %v1302_v57  ;;  %v1332_v30 = vmul.f32 %v3501_v44, %v1331_v48  ;;  %v1346_v58 = vsub.f32 1.0, %v3569_v45 }
 0x1d8   : > { %v1242_v63 = vmul.f32 0.3275911, %v3561_v55  ;;  %2373 = vmatmul.msk.f32.gmra.mxu3 %vm403_vm0, %v987_v50  ;;  %v984_v10 = vadd.f32 %v3574_v7, %v956_v31  ;;  %v1292_v14 = vsel %vm3589_vm1, %v3281_v4, %v1288_v62  ;;  %vm1305_vm2 = vweird.f32 %v3398_v41 }
 0x1d9   : > { %v1296_v60 = vor.u32 1.1754944e-38, %v1295_v18  ;;  %v1308_v59 = vand.u32 2147483647, %v3309_v52  ;;  %v1310_v12 = vand.u32 2147483648, %v3309_v52  ;;  %vm1294_vm3 = vcmp.eq.f32.partialorder %v1293_v13, 8.507059e+37  ;;  %vm1306_vm4 = vmor %vm1304_vm12, %vm1305_vm2 }
 0x1da   : > { %v3602_v0 = vpop.eup %2482  ;;  %v3607_v33 = vadd.f32 1.0, %v1242_v63  ;;  %v1318_v27 = vadd.f32 %v3465_v2, %v1317_v61  ;;  %vm1320_vm5 = vweird.f32 %v3465_v2  ;;  %v988_v57 = vadd.f32 %v3574_v7, %v960_v51 }
 0x1db   : > { %v3613_v4 = vpop.eup %2484  ;;  %v3616_v36 = vsel %vm1294_vm3, %v1296_v60, %v1292_v14  ;;  %v1307_v40 = vsel %vm1306_vm4, %v3398_v41, %v1303_v8  ;;  %v1311_v19 = vor.u32 1.1754944e-38, %v1310_v12  ;;  %v1360_v43 = vmul.f32 %v3602_v0, %v3555_v9  ;;  %vm3630_vm7 = vmor %vm1319_vm13, %vm1320_vm5 }
 0x1dc   : > { %v3619_v56 = vpop.eup %2486  ;;  %v1644_v52 = vmul.f32 1.0614054, %v3616_v36  ;;  %vm1309_vm6 = vcmp.eq.f32.partialorder %v1308_v59, 8.507059e+37  ;;  %v1323_v48 = vand.u32 2147483647, %v3369_v21  ;;  %2370 = vmatmul.msk.f32.gmra.mxu0 %vm403_vm0, %v984_v10  ;;  %v1325_v41 = vand.u32 2147483648, %v3369_v21 }
 0x1dd   : > { %v3626_v45 = vsel %vm1309_vm6, %v1311_v19, %v1307_v40  ;;  %v1333_v31 = vadd.f32 %v3501_v44, %v1332_v30  ;;  %vm1335_vm8 = vweird.f32 %v3501_v44  ;;  %2488 = vrcp.f32 %v3607_v33 }
 0x1de   : > { %v1668_v62 = vadd.f32 -1.4531521, %v1644_v52  ;;  %v1645_v61 = vmul.f32 1.0614054, %v3626_v45  ;;  %v1322_v63 = vsel %vm3630_vm7, %v3465_v2, %v1318_v27  ;;  %2490 = vpow2.f32 %v1914_v35  ;;  %vm3648_vm10 = vmor %vm1334_vm15, %vm1335_vm8 }
 0x1df   : > { %v1864_v13 = vsub.f32 0.0, %v3436_v49  ;;  %v1326_v51 = vor.u32 1.1754944e-38, %v1325_v41  ;;  %v1338_v38 = vand.u32 2147483647, %v3386_v5  ;;  %vm1324_vm9 = vcmp.eq.f32.partialorder %v1323_v48, 8.507059e+37 }
 0x1e0   : > { %2374 = vmatmul.msk.f32.gmra.mxu3 %vm403_vm0, %v988_v57  ;;  %v1692_v21 = vmul.f32 %v1668_v62, %v3616_v36  ;;  %v1669_v18 = vadd.f32 -1.4531521, %v1645_v61  ;;  %v1340_v2 = vand.u32 2147483648, %v3386_v5  ;;  %v1347_v35 = vmul.f32 %v3557_v46, %v1346_v58 }
 0x1e1   : > { %v1361_v30 = vsub.f32 1.0, %v1360_v43  ;;  %v3654_v10 = vsel %vm1324_vm9, %v1326_v51, %v1322_v63  ;;  %v1337_v14 = vsel %vm3648_vm10, %v3501_v44, %v1333_v31  ;;  %vm1339_vm11 = vcmp.eq.f32.partialorder %v1338_v38, 8.507059e+37 }
 0x1e2   : > { %v1716_v60 = vadd.f32 1.4214138, %v1692_v21  ;;  %v1693_v59 = vmul.f32 %v1669_v18, %v3626_v45  ;;  %v1646_v12 = vmul.f32 1.0614054, %v3654_v10  ;;  %v1341_v27 = vor.u32 1.1754944e-38, %v1340_v2 }
 0x1e3   : > { %vm1350_vm12 = vweird.f32 %v3557_v46  ;;  %v1353_v5 = vand.u32 2147483647, %v3492_v11  ;;  %v1355_v58 = vand.u32 2147483648, %v3492_v11  ;;  %v3664_v57 = vpop.eup %2488  ;;  %vm1349_vm13 = vweird.f32 %v3492_v11 }
 0x1e4   : > { %v1740_v40 = vmul.f32 %v1716_v60, %v3616_v36  ;;  %v1717_v19 = vadd.f32 1.4214138, %v1693_v59  ;;  %v1670_v43 = vadd.f32 -1.4531521, %v1646_v12  ;;  %v3667_v44 = vsel %vm1339_vm11, %v1341_v27, %v1337_v14  ;;  %v3669_v52 = vpop.eup %2490  ;;  %vm1351_vm14 = vmor %vm1349_vm13, %vm1350_vm12 }
 0x1e5   : > { %v1362_v48 = vmul.f32 %v3602_v0, %v1361_v30  ;;  %v1647_v50 = vmul.f32 1.0614054, %v3667_v44  ;;  %v1348_v41 = vadd.f32 %v3557_v46, %v1347_v35  ;;  %v1356_v63 = vor.u32 1.1754944e-38, %v1355_v58 }
 0x1e6   : > { %v1764_v31 = vadd.f32 -0.28449672, %v1740_v40  ;;  %v1741_v62 = vmul.f32 %v1717_v19, %v3626_v45  ;;  %v1694_v61 = vmul.f32 %v1670_v43, %v3654_v10  ;;  %v1375_v51 = vmul.f32 %v3664_v57, %v3607_v33 }
 0x1e7   : > { %v1671_v38 = vadd.f32 -1.4531521, %v1647_v50  ;;  %v1352_v11 = vsel %vm1351_vm14, %v3557_v46, %v1348_v41  ;;  %vm1354_vm15 = vcmp.eq.f32.partialorder %v1353_v5, 8.507059e+37  ;;  %v1368_v14 = vand.u32 2147483647, %v3555_v9 }
 0x1e8   : > { %v1788_v21 = vmul.f32 %v1764_v31, %v3616_v36  ;;  %v1765_v18 = vadd.f32 -0.28449672, %v1741_v62  ;;  %v1718_v8 = vadd.f32 1.4214138, %v1694_v61  ;;  %v3683_v2 = vsel %vm1354_vm15, %v1356_v63, %v1352_v11 }
 0x1e9   : > { %v1695_v35 = vmul.f32 %v1671_v38, %v3667_v44  ;;  %v1648_v30 = vmul.f32 1.0614054, %v3683_v2  ;;  %v1370_v60 = vand.u32 2147483648, %v3555_v9  ;;  %vm1365_vm1 = vweird.f32 %v3602_v0 }
 0x1ea   : > { %v1812_v59 = vadd.f32 0.2548296, %v1788_v21  ;;  %v1789_v12 = vmul.f32 %v1765_v18, %v3626_v45  ;;  %v1742_v46 = vmul.f32 %v1718_v8, %v3654_v10  ;;  %vm2004_vm2 = vcmp.ge.f32.partialorder %v3165_v1, 0.0 }
 0x1eb   : > { %vm1364_vm3 = vweird.f32 %v3555_v9  ;;  %v1376_v27 = vsub.f32 1.0, %v1375_v51  ;;  %v1719_v5 = vadd.f32 1.4214138, %v1695_v35  ;;  %v1672_v58 = vadd.f32 -1.4531521, %v1648_v30 }
 0x1ec   : > { %v1836_v40 = vmul.f32 %v1812_v59, %v3616_v36  ;;  %v1813_v19 = vadd.f32 0.2548296, %v1789_v12  ;;  %v1766_v43 = vadd.f32 -0.28449672, %v1742_v46  ;;  %v1363_v50 = vadd.f32 %v3602_v0, %v1362_v48  ;;  %vm1366_vm5 = vmor %vm1364_vm3, %vm1365_vm1 }
 0x1ed   : > { %vm2005_vm4 = vcmp.ge.f32.partialorder %v3210_v29, 0.0  ;;  %v1743_v41 = vmul.f32 %v1719_v5, %v3667_v44  ;;  %v1696_v31 = vmul.f32 %v1672_v58, %v3683_v2  ;;  %vm1369_vm6 = vcmp.eq.f32.partialorder %v1368_v14, 8.507059e+37 }
 0x1ee   : > { %v1371_v62 = vor.u32 1.1754944e-38, %v1370_v60  ;;  %v1956_v9 = vmul.f32 %v3374_v3, %v1836_v40  ;;  %v1837_v61 = vmul.f32 %v1813_v19, %v3626_v45  ;;  %v1790_v63 = vmul.f32 %v1766_v43, %v3654_v10 }
 0x1ef   : > { %v1367_v36 = vsel %vm1366_vm5, %v3602_v0, %v1363_v50  ;;  %v1888_v48 = vmul.f32 %v1864_v13, %v3436_v49  ;;  %v1767_v51 = vadd.f32 -0.28449672, %v1743_v41  ;;  %v1720_v38 = vadd.f32 1.4214138, %v1696_v31 }
 0x1f0   : > { %v3706_v11 = vsel %vm1369_vm6, %v1371_v62, %v1367_v36  ;;  %v1980_v21 = vsub.f32 1.0, %v1956_v9  ;;  %v1957_v18 = vmul.f32 %v3613_v4, %v1837_v61  ;;  %v1814_v8 = vadd.f32 0.2548296, %v1790_v63 }
 0x1f1   : > { %v1649_v3 = vmul.f32 1.0614054, %v3706_v11  ;;  %v1377_v45 = vmul.f32 %v3664_v57, %v1376_v27  ;;  %v1791_v35 = vmul.f32 %v1767_v51, %v3667_v44  ;;  %v1744_v0 = vmul.f32 %v1720_v38, %v3683_v2 }
 0x1f2   : > { %v1383_v30 = vand.u32 2147483647, %v3607_v33  ;;  %v2028_v14 = vsub.f32 0.0, %v1980_v21  ;;  %v1981_v49 = vsub.f32 1.0, %v1957_v18  ;;  %v1838_v13 = vmul.f32 %v1814_v8, %v3654_v10 }
 0x1f3   : > { %v1673_v60 = vadd.f32 -1.4531521, %v1649_v3  ;;  %v1815_v59 = vadd.f32 0.2548296, %v1791_v35  ;;  %v1768_v12 = vadd.f32 -0.28449672, %v1744_v0  ;;  %vm1380_vm7 = vweird.f32 %v3664_v57 }
 0x1f4   : > { %v1385_v4 = vand.u32 2147483648, %v3607_v33  ;;  %v2052_v46 = vsel %vm2004_vm2, %v1980_v21, %v2028_v14  ;;  %v2029_v27 = vsub.f32 0.0, %v1981_v49  ;;  %v1958_v5 = vmul.f32 %v3619_v56, %v1838_v13 }
 0x1f5   : > { %v1697_v58 = vmul.f32 %v1673_v60, %v3706_v11  ;;  %v2076_v40 = vadd.f32 1.0, %v2052_v46  ;;  %v1839_v19 = vmul.f32 %v1815_v59, %v3667_v44  ;;  %v1792_v10 = vmul.f32 %v1768_v12, %v3683_v2 }
 0x1f6   : > { %v1378_v43 = vadd.f32 %v3664_v57, %v1377_v45  ;;  %vm1379_vm8 = vweird.f32 %v3607_v33  ;;  %v2053_v50 = vsel %vm2005_vm4, %v1981_v49, %v2029_v27  ;;  %v1982_v41 = vsub.f32 1.0, %v1958_v5 }
 0x1f7   : > { %v1721_v1 = vadd.f32 1.4214138, %v1697_v58  ;;  %v1916_v31 = vmul.f32 1.442695, %v1888_v48  ;;  %v1865_v62 = vsub.f32 0.0, %v3523_v26  ;;  %v2100_v56 = vmul.f32 %v2076_v40, %v3317_v15  ;;  %vm1381_vm9 = vmor %vm1379_vm8, %vm1380_vm7 }
 0x1f8   : > { %v1386_v44 = vor.u32 1.1754944e-38, %v1385_v4  ;;  %v1382_v61 = vsel %vm1381_vm9, %v3664_v57, %v1378_v43  ;;  %vm1384_vm10 = vcmp.eq.f32.partialorder %v1383_v30, 8.507059e+37  ;;  %v2077_v33 = vadd.f32 1.0, %v2053_v50 }
 0x1f9   : > { %v1745_v9 = vmul.f32 %v1721_v1, %v3706_v11  ;;  %2160 = vmatmul.f32.vlgmr.msra.gmra.mxu1 %v2100_v56  ;;  %v1959_v29 = vmul.f32 %v3669_v52, %v1839_v19  ;;  %v1816_v63 = vadd.f32 0.2548296, %v1792_v10  ;;  %v2030_v48 = vsub.f32 0.0, %v1982_v41 }
 0x1fa   : > { %v1387_v36 = vsel %vm1384_vm10, %v1386_v44, %v1382_v61  ;;  %v1165_v15 = vmul.f32 0.5, %v3196_v42  ;;  %2492 = vpow2.f32 %v1916_v31  ;;  %v1889_v21 = vmul.f32 %v1865_v62, %v3523_v26 }
 0x1fb   : > { %v1769_v51 = vadd.f32 -0.28449672, %v1745_v9  ;;  %v1650_v38 = vmul.f32 1.0614054, %v1387_v36  ;;  %vm2006_vm11 = vcmp.ge.f32.partialorder %v3251_v54, 0.0  ;;  %v1983_v57 = vsub.f32 1.0, %v1959_v29 }
 0x1fc   : > { %v2101_v8 = vmul.f32 %v2077_v33, %v1165_v15  ;;  %v2054_v3 = vsel %vm2006_vm11, %v1982_v41, %v2030_v48  ;;  %v1840_v45 = vmul.f32 %v1816_v63, %v3683_v2  ;;  %v1918_v0 = vmul.f32 1.442695, %v1889_v21 }
 0x1fd   : > { %v1674_v18 = vadd.f32 -1.4531521, %v1650_v38  ;;  %v1793_v52 = vmul.f32 %v1769_v51, %v3706_v11  ;;  %v1866_v30 = vsub.f32 0.0, %v3561_v55  ;;  %v2078_v42 = vadd.f32 1.0, %v2054_v3 }
 0x1fe   : > { %v2031_v13 = vsub.f32 0.0, %v1983_v57  ;;  %v1166_v54 = vmul.f32 0.5, %v3224_v37  ;;  %2494 = vpow2.f32 %v1918_v0  ;;  %vm2007_vm12 = vcmp.ge.f32.partialorder %v3329_v53, 0.0 }
 0x1ff   : > { %v1698_v35 = vmul.f32 %v1674_v18, %v1387_v36  ;;  %v1817_v60 = vadd.f32 0.2548296, %v1793_v52  ;;  %v1890_v12 = vmul.f32 %v1866_v30, %v3561_v55  ;;  %v1167_v55 = vmul.f32 0.5, %v3279_v47 }
 0x200   : > { %v2493_v49 = vpop.eup %2492  ;;  %v2102_v4 = vmul.f32 %v2078_v42, %v1166_v54  ;;  %v2055_v46 = vsel %vm2007_vm12, %v1983_v57, %v2031_v13  ;;  %vm2008_vm13 = vcmp.ge.f32.partialorder %v3425_v23, 0.0  ;;  %v1168_v23 = vmul.f32 0.5, %v3393_v32 }
 0x201   : > { %v1722_v14 = vadd.f32 1.4214138, %v1698_v35  ;;  %2163 = vmatmul.f32.gmra.mxu1 %v2101_v8  ;;  %v1960_v26 = vmul.f32 %v2493_v49, %v1840_v45  ;;  %v1841_v5 = vmul.f32 %v1817_v60, %v3706_v11  ;;  %v1920_v40 = vmul.f32 1.442695, %v1890_v12 }
 0x202   : > { %v2079_v10 = vadd.f32 1.0, %v2055_v46  ;;  %vm2009_vm14 = vcmp.ge.f32.partialorder %v3499_v22, 0.0  ;;  %v1169_v0 = vmul.f32 0.5, %v3463_v28  ;;  %vm2010_vm15 = vcmp.ge.f32.partialorder %v3549_v25, 0.0 }
 0x203   : > { %v1746_v59 = vmul.f32 %v1722_v14, %v1387_v36  ;;  %v1984_v27 = vsub.f32 1.0, %v1960_v26  ;;  %2496 = vpow2.f32 %v1920_v40 }
 0x204   : > { %v2495_v19 = vpop.eup %2494  ;;  %v2103_v31 = vmul.f32 %v2079_v10, %v1167_v55 }
 0x205   : > { %v1770_v2 = vadd.f32 -0.28449672, %v1746_v59  ;;  %v2032_v50 = vsub.f32 0.0, %v1984_v27  ;;  %v1961_v41 = vmul.f32 %v2495_v19, %v1841_v5  ;;  %v3772_v59 = vld [vmem:[%s4663_s5] ss:$0 sm:$0xff] }
 0x207   : > { %v1794_v58 = vmul.f32 %v1770_v2, %v1387_v36  ;;  %v2056_v62 = vsel %vm2008_vm13, %v1984_v27, %v2032_v50  ;;  %v1985_v56 = vsub.f32 1.0, %v1961_v41  ;;  %v1170_v27 = vmul.f32 0.5, %v3531_v20 }
 0x208   : > { %v2080_v47 = vadd.f32 1.0, %v2056_v62 }
 0x209   : > { %2166 = vmatmul.f32.gmra.mxu1 %v2102_v4  ;;  %v1818_v37 = vadd.f32 0.2548296, %v1794_v58  ;;  %v2497_v29 = vpop.eup %2496  ;;  %v2033_v48 = vsub.f32 0.0, %v1985_v56 }
 0x20b   : > { %v614_v43 = vpop.xlane.xlu1 %613  ;;  %v1842_v44 = vmul.f32 %v1818_v37, %v1387_v36  ;;  %v2104_v36 = vmul.f32 %v2080_v47, %v1168_v23  ;;  %v2057_v21 = vsel %vm2009_vm14, %v1985_v56, %v2033_v48 }
 0x20c   : > { %v646_v1 = vmul.f32 %v614_v43, %v2701_v34  ;;  %v2081_v32 = vadd.f32 1.0, %v2057_v21 }
 0x20d   : > { %v1962_v51 = vmul.f32 %v2497_v29, %v1842_v44 }
 0x20e   : > { %v3746_v53 = vadd.f32 1e-05, %v646_v1  ;;  %v2105_v13 = vmul.f32 %v2081_v32, %v1169_v0 }
 0x20f   : > { %v1986_v18 = vsub.f32 1.0, %v1962_v51 }
 0x210   : > { %2498 = vrsqrt.f32 %v3746_v53  ;;  %vm871_vm4 = vweird.f32 %v3746_v53 }
 0x211   : > { %2169 = vmatmul.f32.gmra.mxu1 %v2103_v31  ;;  %v2034_v52 = vsub.f32 0.0, %v1986_v18 }
 0x213   : > { %v617_v11 = vpop.xlane.xlu2 %616  ;;  %v2058_v26 = vsel %vm2010_vm15, %v1986_v18, %v2034_v52 }
 0x214   : > { %v611_v9 = vpop.xlane.xlu0 %610  ;;  %v647_v61 = vmul.f32 %v617_v11, %v2701_v34  ;;  %v2082_v25 = vadd.f32 1.0, %v2058_v26 }
 0x215   : > { %v645_v33 = vmul.f32 %v611_v9, %v2701_v34 }
 0x216   : > { %v3753_v38 = vadd.f32 1e-05, %v647_v61  ;;  %v3755_v15 = vpop.eup %2498  ;;  %v2106_v19 = vmul.f32 %v2082_v25, %v1170_v27 }
 0x217   : > { %v669_v63 = vadd.f32 1e-05, %v645_v33  ;;  %v866_v57 = vmul.f32 %v3755_v15, %v3746_v53  ;;  %vm872_vm5 = vweird.f32 %v3755_v15 }
 0x218   : > { %vm3795_vm6 = vmor %vm871_vm4, %vm872_vm5  ;;  %vm881_vm7 = vweird.f32 %v3753_v38 }
 0x219   : > { %2500 = vrsqrt.f32 %v669_v63  ;;  %2172 = vmatmul.f32.gmra.mxu1 %v2104_v36  ;;  %v867_v22 = vmul.f32 %v3755_v15, %v866_v57  ;;  %vm861_vm2 = vweird.f32 %v669_v63 }
 0x21a   : > { %2502 = vrsqrt.f32 %v3753_v38 }
 0x21b   : > { %v868_v54 = vmul.f32 0.5, %v867_v22 }
 0x21c   : > { %v620_v8 = vpop.xlane.xlu0 %619 }
 0x21d   : > { %v648_v3 = vmul.f32 %v620_v8, %v2701_v34  ;;  %v869_v5 = vsub.f32 1.5, %v868_v54 }
 0x21f   : > { %v2501_v45 = vpop.eup %2500  ;;  %v3764_v14 = vadd.f32 1e-05, %v648_v3  ;;  %v870_v20 = vmul.f32 %v3755_v15, %v869_v5 }
 0x220   : > { %v856_v35 = vmul.f32 %v2501_v45, %v669_v63  ;;  %v3766_v42 = vpop.eup %2502  ;;  %vm862_vm1 = vweird.f32 %v2501_v45 }
 0x221   : > { %v876_v12 = vmul.f32 %v3766_v42, %v3753_v38  ;;  %2504 = vrsqrt.f32 %v3764_v14  ;;  %2175 = vmatmul.f32.gmra.mxu1 %v2105_v13  ;;  %vm863_vm3 = vmor %vm861_vm2, %vm862_vm1  ;;  %v874_v56 = vsel %vm3795_vm6, %v3755_v15, %v870_v20  ;;  %vm882_vm8 = vweird.f32 %v3766_v42 }
 0x222   : > { %v857_v30 = vmul.f32 %v2501_v45, %v856_v35  ;;  %v1113_v49 = vpop.f32.mrf.mxu0  ;;  %v934_v47 = vmul.f32 %v874_v56, %v3086_v39  ;;  %vm3818_vm9 = vmor %vm881_vm7, %vm882_vm8  ;;  %vm891_vm10 = vweird.f32 %v3764_v14  ;;  %v4767_v56 = vld [vmem:[#allocation26_spill] sm:$0xff] }
 0x223   : > { %v3775_v28 = vadd.f32 %v3772_v59, %v1113_v49  ;;  %v877_v58 = vmul.f32 %v3766_v42, %v876_v12 }
 0x224   : > { %v858_v60 = vmul.f32 0.5, %v857_v30  ;;  %v962_v15 = vmul.f32 %v3540_v24, %v934_v47 }
 0x225   : > { %v3781_v46 = vmul.f32 0.70710677, %v3775_v28  ;;  %v878_v37 = vmul.f32 0.5, %v877_v58 }
 0x226   : > { %v859_v2 = vsub.f32 1.5, %v858_v60  ;;  %v990_v36 = vadd.f32 %v3574_v7, %v962_v15 }
 0x227   : > { %v3786_v43 = vpop.eup %2504  ;;  %v3791_v50 = vand.u32 2147483647, %v3781_v46  ;;  %v879_v44 = vsub.f32 1.5, %v878_v37 }
 0x228   : > { %v860_v4 = vmul.f32 %v2501_v45, %v859_v2  ;;  %vm892_vm11 = vweird.f32 %v3786_v43 }
 0x229   : > { %2178 = vmatmul.f32.gmra.mxu1 %v2106_v19  ;;  %v1243_v53 = vmul.f32 0.3275911, %v3791_v50  ;;  %v880_v63 = vmul.f32 %v3766_v42, %v879_v44  ;;  %vm3841_vm12 = vmor %vm891_vm10, %vm892_vm11  ;;  %v1867_v58 = vsub.f32 0.0, %v3791_v50 }
 0x22a   : > { %v864_v40 = vsel %vm863_vm3, %v2501_v45, %v860_v4 }
 0x22b   : > { %v933_v10 = vmul.f32 %v864_v40, %v3104_v16  ;;  %v886_v16 = vmul.f32 %v3786_v43, %v3764_v14  ;;  %v623_v31 = vpop.xlane.xlu1 %622  ;;  %v1116_v62 = vpop.f32.mrf.mxu0  ;;  %v3814_v29 = vadd.f32 1.0, %v1243_v53  ;;  %v884_v39 = vsel %vm3818_vm9, %v3766_v42, %v880_v63 }
 0x22c   : > { %v649_v11 = vmul.f32 %v623_v31, %v2701_v34  ;;  %v3810_v33 = vadd.f32 %v3772_v59, %v1116_v62  ;;  %v935_v45 = vmul.f32 %v884_v39, %v3099_v17  ;;  %v1891_v53 = vmul.f32 %v1867_v58, %v3791_v50 }
 0x22d   : > { %v961_v41 = vmul.f32 %v3540_v24, %v933_v10  ;;  %v887_v9 = vmul.f32 %v3786_v43, %v886_v16  ;;  %v1400_v16 = vand.u32 2147483648, %v3814_v29  ;;  %vm1394_vm2 = vweird.f32 %v3814_v29 }
 0x22e   : > { %v673_v61 = vadd.f32 1e-05, %v649_v11  ;;  %v3823_v23 = vmul.f32 0.70710677, %v3810_v33  ;;  %v963_v22 = vmul.f32 %v3540_v24, %v935_v45 }
 0x22f   : > { %v989_v55 = vadd.f32 %v3574_v7, %v961_v41  ;;  %v888_v51 = vmul.f32 0.5, %v887_v9  ;;  %v1401_v48 = vor.u32 1.1754944e-38, %v1400_v16 }
 0x230   : > { %2506 = vrsqrt.f32 %v673_v61  ;;  %v1220_v8 = vand.u32 2147483647, %v3823_v23  ;;  %v991_v13 = vadd.f32 %v3574_v7, %v963_v22  ;;  %vm901_vm13 = vweird.f32 %v673_v61 }
 0x231   : > { %2375 = vmatmul.msk.f32.gmra.mxu3 %vm403_vm0, %v989_v55  ;;  %2508 = vrcp.f32 %v3814_v29  ;;  %v889_v18 = vsub.f32 1.5, %v888_v51  ;;  %v1398_v55 = vand.u32 2147483647, %v3814_v29 }
 0x232   : > { %v1244_v0 = vmul.f32 0.3275911, %v1220_v8  ;;  %v1868_v20 = vsub.f32 0.0, %v1220_v8 }
 0x233   : > { %v1119_v38 = vpop.f32.mrf.mxu0  ;;  %v890_v35 = vmul.f32 %v3786_v43, %v889_v18  ;;  %vm1399_vm4 = vcmp.eq.f32.partialorder %v1398_v55, 8.507059e+37 }
 0x234   : > { %v3834_v3 = vadd.f32 %v3772_v59, %v1119_v38  ;;  %v3853_v54 = vadd.f32 1.0, %v1244_v0  ;;  %v1892_v47 = vmul.f32 %v1868_v20, %v1220_v8  ;;  %v1922_v38 = vmul.f32 1.442695, %v1891_v53 }
 0x235   : > { %v894_v60 = vsel %vm3841_vm12, %v3786_v43, %v890_v35 }
 0x236   : > { %v2507_v21 = vpop.eup %2506  ;;  %v3846_v42 = vmul.f32 0.70710677, %v3834_v3  ;;  %v936_v5 = vmul.f32 %v894_v60, %v3129_v6  ;;  %2510 = vrcp.f32 %v3853_v54  ;;  %v1924_v35 = vmul.f32 1.442695, %v1892_v47 }
 0x237   : > { %v896_v57 = vmul.f32 %v2507_v21, %v673_v61  ;;  %v2509_v32 = vpop.eup %2508  ;;  %vm902_vm14 = vweird.f32 %v2507_v21  ;;  %vm1409_vm5 = vweird.f32 %v3853_v54 }
 0x238   : > { %v1390_v14 = vmul.f32 %v2509_v32, %v3814_v29  ;;  %v1221_v2 = vand.u32 2147483647, %v3846_v42  ;;  %vm3862_vm15 = vmor %vm901_vm13, %vm902_vm14  ;;  %v964_v43 = vmul.f32 %v3540_v24, %v936_v5  ;;  %vm1395_vm1 = vweird.f32 %v2509_v32 }
 0x239   : > { %2376 = vmatmul.msk.f32.gmra.mxu3 %vm403_vm0, %v990_v36  ;;  %v897_v52 = vmul.f32 %v2507_v21, %v896_v57  ;;  %vm1396_vm3 = vmor %vm1394_vm2, %vm1395_vm1 }
 0x23a   : > { %v1391_v25 = vsub.f32 1.0, %v1390_v14  ;;  %v1245_v19 = vmul.f32 0.3275911, %v1221_v2  ;;  %v992_v1 = vadd.f32 %v3574_v7, %v964_v43  ;;  %v1869_v63 = vsub.f32 0.0, %v1221_v2 }
 0x23b   : > { %v898_v49 = vmul.f32 0.5, %v897_v52  ;;  %v626_v26 = vpop.xlane.xlu2 %625 }
 0x23c   : > { %v650_v12 = vmul.f32 %v626_v26, %v2701_v34  ;;  %v1392_v41 = vmul.f32 %v2509_v32, %v1391_v25  ;;  %v3881_v31 = vadd.f32 1.0, %v1245_v19  ;;  %v3884_v11 = vpop.eup %2510  ;;  %v1893_v0 = vmul.f32 %v1869_v63, %v1221_v2 }
 0x23d   : > { %v899_v17 = vsub.f32 1.5, %v898_v49  ;;  %v1405_v29 = vmul.f32 %v3884_v11, %v3853_v54  ;;  %v3912_v49 = vmul.f32 0.5, %v3775_v28  ;;  %v3924_v25 = vmul.f32 0.5, %v3810_v33 }
 0x23e   : > { %v3858_v27 = vadd.f32 1e-05, %v650_v12  ;;  %v1393_v9 = vadd.f32 %v2509_v32, %v1392_v41  ;;  %v3928_v28 = vmul.f32 0.5, %v3834_v3  ;;  %v1926_v5 = vmul.f32 1.442695, %v1893_v0  ;;  %v4776_v0 = vld [vmem:[#allocation27_spill] sm:$0xff] }
 0x23f   : > { %v900_v4 = vmul.f32 %v2507_v21, %v899_v17  ;;  %v1406_v14 = vsub.f32 1.0, %v1405_v29  ;;  %vm1410_vm9 = vweird.f32 %v3884_v11  ;;  %vm1424_vm13 = vweird.f32 %v3881_v31 }
 0x240   : > { %2512 = vrsqrt.f32 %v3858_v27  ;;  %v1397_v15 = vsel %vm1396_vm3, %v2509_v32, %v1393_v9  ;;  %vm911_vm6 = vweird.f32 %v3858_v27  ;;  %v1413_v9 = vand.u32 2147483647, %v3853_v54  ;;  %vm3984_vm10 = vmor %vm1409_vm5, %vm1410_vm9 }
 0x241   : > { %2377 = vmatmul.msk.f32.gmra.mxu3 %vm403_vm0, %v991_v13  ;;  %v1122_v34 = vpop.f32.mrf.mxu0  ;;  %v904_v6 = vsel %vm3862_vm15, %v2507_v21, %v900_v4  ;;  %2514 = vrcp.f32 %v3881_v31  ;;  %v3897_v39 = vsel %vm1399_vm4, %v1401_v48, %v1397_v15  ;;  %vm2011_vm15 = vcmp.ge.f32.partialorder %v3781_v46, 0.0 }
 0x242   : > { %v3869_v10 = vadd.f32 %v3772_v59, %v1122_v34  ;;  %v937_v44 = vmul.f32 %v904_v6, %v4767_v56  ;;  %v1651_v45 = vmul.f32 1.0614054, %v3897_v39  ;;  %2516 = vpow2.f32 %v1922_v38 }
 0x243   : > { %2518 = vpow2.f32 %v1924_v35  ;;  %v1407_v34 = vmul.f32 %v3884_v11, %v1406_v14  ;;  %vm3988_vm11 = vcmp.eq.f32.partialorder %v1413_v9, 8.507059e+37  ;;  %vm2012_vm9 = vcmp.ge.f32.partialorder %v3823_v23, 0.0 }
 0x244   : > { %v3875_v37 = vmul.f32 0.70710677, %v3869_v10  ;;  %v965_v51 = vmul.f32 %v3540_v24, %v937_v44  ;;  %v1675_v17 = vadd.f32 -1.4531521, %v1651_v45  ;;  %v3970_v29 = vmul.f32 0.5, %v3869_v10 }
 0x245   : > { %v1408_v48 = vadd.f32 %v3884_v11, %v1407_v34 }
 0x246   : > { %v1222_v62 = vand.u32 2147483647, %v3875_v37  ;;  %v3889_v61 = vpop.eup %2512  ;;  %v993_v52 = vadd.f32 %v3574_v7, %v965_v51  ;;  %v1699_v33 = vmul.f32 %v1675_v17, %v3897_v39 }
 0x247   : > { %v906_v50 = vmul.f32 %v3889_v61, %v3858_v27  ;;  %v3921_v2 = vpop.eup %2514  ;;  %vm912_vm7 = vweird.f32 %v3889_v61  ;;  %v1412_v17 = vsel %vm3984_vm10, %v3884_v11, %v1408_v48 }
 0x248   : > { %v1246_v18 = vmul.f32 0.3275911, %v1222_v62  ;;  %v1870_v58 = vsub.f32 0.0, %v1222_v62  ;;  %v1420_v41 = vmul.f32 %v3921_v2, %v3881_v31  ;;  %v3947_v53 = vpop.eup %2516  ;;  %vm3954_vm8 = vmor %vm911_vm6, %vm912_vm7  ;;  %v1723_v63 = vadd.f32 1.4214138, %v1699_v33 }
 0x249   : > { %2378 = vmatmul.msk.f32.gmra.mxu3 %vm403_vm0, %v992_v1  ;;  %v1125_v36 = vpop.f32.mrf.mxu0  ;;  %v907_v21 = vmul.f32 %v3889_v61, %v906_v50  ;;  %v1415_v50 = vand.u32 2147483648, %v3853_v54  ;;  %v3961_v51 = vpop.eup %2518  ;;  %vm1425_vm12 = vweird.f32 %v3921_v2 }
 0x24a   : > { %v3901_v57 = vadd.f32 %v3772_v59, %v1125_v36  ;;  %v3918_v60 = vadd.f32 1.0, %v1246_v18  ;;  %v1894_v56 = vmul.f32 %v1870_v58, %v1222_v62  ;;  %v1421_v62 = vsub.f32 1.0, %v1420_v41  ;;  %vm4099_vm1 = vmor %vm1424_vm13, %vm1425_vm12 }
 0x24b   : > { %v1134_v8 = vpop.f32.mrf.mxu3  ;;  %v908_v22 = vmul.f32 0.5, %v907_v21  ;;  %v1747_v14 = vmul.f32 %v1723_v63, %v3897_v39 }
 0x24c   : > { %v3905_v32 = vadd.f32 %v3772_v59, %v1134_v8  ;;  %v3909_v30 = vmul.f32 0.70710677, %v3901_v57  ;;  %2520 = vrcp.f32 %v3918_v60  ;;  %v1928_v8 = vmul.f32 1.442695, %v1894_v56 }
 0x24d   : > { %v909_v26 = vsub.f32 1.5, %v908_v22  ;;  %2522 = vpow2.f32 %v1926_v5  ;;  %v1771_v9 = vadd.f32 -0.28449672, %v1747_v14  ;;  %v4025_v48 = vmul.f32 0.5, %v3901_v57 }
 0x24e   : > { %v3915_v13 = vmul.f32 0.70710677, %v3905_v32  ;;  %v1223_v12 = vand.u32 2147483647, %v3909_v30  ;;  %vm1439_vm14 = vweird.f32 %v3918_v60 }
 0x24f   : > { %v910_v3 = vmul.f32 %v3889_v61, %v909_v26  ;;  %v1422_v26 = vmul.f32 %v3921_v2, %v1421_v62  ;;  %v1795_v10 = vmul.f32 %v1771_v9, %v3897_v39 }
 0x250   : > { %v1226_v4 = vand.u32 2147483647, %v3915_v13  ;;  %v1247_v40 = vmul.f32 0.3275911, %v1223_v12  ;;  %v1871_v1 = vsub.f32 0.0, %v1223_v12 }
 0x251   : > { %2379 = vmatmul.msk.f32.gmra.mxu3 %vm403_vm0, %v993_v52  ;;  %v1128_v43 = vpop.f32.mrf.mxu0  ;;  %v914_v15 = vsel %vm3954_vm8, %v3889_v61, %v910_v3 }
 0x252   : > { %v1250_v19 = vmul.f32 0.3275911, %v1226_v4  ;;  %v3939_v6 = vadd.f32 1.0, %v1247_v40  ;;  %v3945_v55 = vadd.f32 %v3772_v59, %v1128_v43  ;;  %v1874_v38 = vsub.f32 0.0, %v1226_v4  ;;  %v3976_v18 = vpop.eup %2520 }
 0x253   : > { %v1137_v20 = vpop.f32.mrf.mxu3  ;;  %v1895_v36 = vmul.f32 %v1871_v1, %v1223_v12  ;;  %v938_v22 = vmul.f32 %v914_v15, %v4776_v0  ;;  %v3998_v54 = vpop.eup %2522  ;;  %v1416_v40 = vor.u32 1.1754944e-38, %v1415_v50  ;;  %v4003_v34 = vmul.f32 %v3976_v18, %v3918_v60 }
 0x254   : > { %v3942_v16 = vadd.f32 %v3772_v59, %v1137_v20  ;;  %v3949_v44 = vadd.f32 1.0, %v1250_v19  ;;  %2524 = vrcp.f32 %v3939_v6  ;;  %v3974_v21 = vmul.f32 0.70710677, %v3945_v55 }
 0x255   : > { %v1898_v12 = vmul.f32 %v1874_v38, %v1226_v4  ;;  %v1930_v19 = vmul.f32 1.442695, %v1895_v36  ;;  %v4015_v4 = vsel %vm3988_vm11, %v1416_v40, %v1412_v17  ;;  %v966_v56 = vmul.f32 %v3540_v24, %v938_v22 }
 0x256   : > { %4768 = vst [vmem:[#allocation26_spill] sm:$0xff] %v3942_v16  ;;  %v3967_v27 = vmul.f32 0.70710677, %v3942_v16  ;;  %2526 = vrcp.f32 %v3949_v44  ;;  %v1224_v52 = vand.u32 2147483647, %v3974_v21  ;;  %v1436_v38 = vsub.f32 1.0, %v4003_v34 }
 0x257   : > { %2528 = vpow2.f32 %v1928_v8  ;;  %v1936_v63 = vmul.f32 1.442695, %v1898_v12  ;;  %v1652_v15 = vmul.f32 1.0614054, %v4015_v4  ;;  %vm1454_vm2 = vweird.f32 %v3939_v6 }
 0x258   : > { %4771 = vst [vmem:[#allocation28_spill] sm:$0xff] %v3967_v27  ;;  %v1227_v61 = vand.u32 2147483647, %v3967_v27  ;;  %v1248_v33 = vmul.f32 0.3275911, %v1224_v52  ;;  %v1872_v50 = vsub.f32 0.0, %v1224_v52  ;;  %vm1440_vm3 = vweird.f32 %v3976_v18 }
 0x259   : > { %v1131_v35 = vpop.f32.mrf.mxu0  ;;  %vm4130_vm5 = vmor %vm1439_vm14, %vm1440_vm3  ;;  %v4152_v27 = vld [vmem:[%s4665_s7] ss:$0 sm:$0xff] }
 0x25a   : > { %v1251_v5 = vmul.f32 0.3275911, %v1227_v61  ;;  %v1875_v43 = vsub.f32 0.0, %v1227_v61  ;;  %v4011_v11 = vadd.f32 %v3772_v59, %v1131_v35  ;;  %v4017_v20 = vpop.eup %2524  ;;  %v4019_v1 = vadd.f32 1.0, %v1248_v33 }
 0x25b   : > { %v1140_v58 = vpop.f32.mrf.mxu3  ;;  %v1450_v8 = vmul.f32 %v4017_v20, %v3939_v6  ;;  %v1896_v45 = vmul.f32 %v1872_v50, %v1224_v52  ;;  %vm1455_vm8 = vweird.f32 %v4017_v20 }
 0x25c   : > { %v4005_v41 = vadd.f32 1.0, %v1251_v5  ;;  %v4008_v3 = vadd.f32 %v3772_v59, %v1140_v58  ;;  %v4022_v47 = vpop.eup %2526  ;;  %v1899_v62 = vmul.f32 %v1875_v43, %v1227_v61  ;;  %v4036_v36 = vmul.f32 0.70710677, %v4011_v11  ;;  %vm4179_vm11 = vmor %vm1454_vm2, %vm1455_vm8 }
 0x25d   : > { %v1495_v57 = vmul.f32 %v4022_v47, %v3949_v44  ;;  %v994_v61 = vadd.f32 %v3574_v7, %v966_v56  ;;  %v4049_v14 = vpop.eup %2528  ;;  %v1819_v5 = vadd.f32 0.2548296, %v1795_v10  ;;  %v1676_v7 = vadd.f32 -1.4531521, %v1652_v15 }
 0x25e   : > { %4777 = vst [vmem:[#allocation27_spill] sm:$0xff] %v4008_v3  ;;  %2530 = vrcp.f32 %v4005_v41  ;;  %v4033_v24 = vmul.f32 0.70710677, %v4008_v3  ;;  %v1225_v0 = vand.u32 2147483647, %v4036_v36  ;;  %v1451_v56 = vsub.f32 1.0, %v1450_v8 }
 0x25f   : > { %2532 = vrcp.f32 %v4019_v1  ;;  %v1938_v17 = vmul.f32 1.442695, %v1899_v62  ;;  %2380 = vmatmul.msk.f32.gmra.mxu3 %vm403_vm0, %v994_v61  ;;  %v1496_v33 = vsub.f32 1.0, %v1495_v57  ;;  %v1932_v62 = vmul.f32 1.442695, %v1896_v45 }
 0x260   : > { %2534 = vpow2.f32 %v1930_v19  ;;  %4778 = vst [vmem:[#allocation29_spill] sm:$0xff] %v4033_v24  ;;  %v4046_v35 = vand.u32 2147483647, %v4033_v24  ;;  %v1249_v40 = vmul.f32 0.3275911, %v1225_v0  ;;  %v1873_v34 = vsub.f32 0.0, %v1225_v0 }
 0x261   : > { %2536 = vpow2.f32 %v1936_v63  ;;  %v1423_v19 = vadd.f32 %v3921_v2, %v1422_v26  ;;  %v1843_v8 = vmul.f32 %v1819_v5, %v3897_v39  ;;  %v1700_v61 = vmul.f32 %v1676_v7, %v4015_v4 }
 0x262   : > { %v1252_v52 = vmul.f32 0.3275911, %v4046_v35  ;;  %v4073_v26 = vadd.f32 1.0, %v1249_v40  ;;  %2538 = vpow2.f32 %v1938_v17  ;;  %v1897_v45 = vmul.f32 %v1873_v34, %v1225_v0 }
 0x263   : > { %v1143_v22 = vpop.f32.mrf.mxu3  ;;  %v1452_v17 = vmul.f32 %v4017_v20, %v1451_v56  ;;  %v4092_v39 = vmul.f32 %v4022_v47, %v1496_v33  ;;  %v1963_v7 = vmul.f32 %v3947_v53, %v1843_v8  ;;  %v1724_v34 = vadd.f32 1.4214138, %v1700_v61 }
 0x264   : > { %v4052_v12 = vadd.f32 %v3772_v59, %v1143_v22  ;;  %v4055_v58 = vpop.eup %2530  ;;  %v4071_v15 = vadd.f32 1.0, %v1252_v52  ;;  %v1437_v22 = vmul.f32 %v3976_v18, %v1436_v38  ;;  %v1428_v52 = vand.u32 2147483647, %v3881_v31 }
 0x265   : > { %v4059_v43 = vpop.eup %2532  ;;  %v1510_v59 = vmul.f32 %v4055_v58, %v4005_v41  ;;  %v1427_v33 = vsel %vm4099_vm1, %v3921_v2, %v1423_v19  ;;  %v1934_v56 = vmul.f32 1.442695, %v1897_v45  ;;  %v1987_v53 = vsub.f32 1.0, %v1963_v7 }
 0x266   : > { %4779 = vst [vmem:[#allocation30_spill] sm:$0xff] %v4052_v12  ;;  %v4064_v9 = vmul.f32 0.70710677, %v4052_v12  ;;  %v4066_v63 = vpop.eup %2534  ;;  %v1465_v50 = vmul.f32 %v4059_v43, %v4019_v1  ;;  %2540 = vrcp.f32 %v4071_v15  ;;  %v4088_v12 = vmul.f32 0.5, %v3945_v55 }
 0x267   : > { %v4080_v10 = vpop.eup %2536  ;;  %v1511_v40 = vsub.f32 1.0, %v1510_v59  ;;  %2542 = vrcp.f32 %v4073_v26  ;;  %v1748_v8 = vmul.f32 %v1724_v34, %v4015_v4  ;;  %vm1429_vm4 = vcmp.eq.f32.partialorder %v1428_v52, 8.507059e+37 }
 0x268   : > { %4780 = vst [vmem:[#allocation31_spill] sm:$0xff] %v4064_v9  ;;  %v4076_v57 = vand.u32 2147483647, %v4064_v9  ;;  %v1466_v5 = vsub.f32 1.0, %v1465_v50  ;;  %2544 = vpow2.f32 %v1932_v62  ;;  %v1430_v50 = vand.u32 2147483648, %v3881_v31  ;;  %v4113_v9 = vpop.eup %2538 }
 0x269   : > { %v1438_v62 = vadd.f32 %v3976_v18, %v1437_v22  ;;  %v4116_v55 = vmul.f32 %v4055_v58, %v1511_v40  ;;  %v2035_v45 = vsub.f32 0.0, %v1987_v53  ;;  %v1772_v40 = vadd.f32 -0.28449672, %v1748_v8 }
 0x26a   : > { %v1253_v38 = vmul.f32 0.3275911, %v4076_v57  ;;  %v1467_v19 = vmul.f32 %v4059_v43, %v1466_v5  ;;  %v1431_v31 = vor.u32 1.1754944e-38, %v1430_v50  ;;  %v1443_v0 = vand.u32 2147483647, %v3918_v60 }
 0x26b   : > { %vm1469_vm6 = vweird.f32 %v4019_v1  ;;  %v1442_v34 = vsel %vm4130_vm5, %v3976_v18, %v1438_v62  ;;  %v2059_v8 = vsel %vm2011_vm15, %v1987_v53, %v2035_v45  ;;  %v1796_v3 = vmul.f32 %v1772_v40, %v4015_v4 }
 0x26c   : > { %v4109_v59 = vadd.f32 1.0, %v1253_v38  ;;  %v4120_v2 = vpop.eup %2540  ;;  %v4140_v7 = vsel %vm1429_vm4, %v1431_v31, %v1427_v33  ;;  %v2083_v33 = vadd.f32 1.0, %v2059_v8  ;;  %v1453_v31 = vadd.f32 %v4017_v20, %v1452_v17 }
 0x26d   : > { %v4124_v61 = vpop.eup %2542  ;;  %v1525_v22 = vmul.f32 %v4120_v2, %v4071_v15  ;;  %v1653_v24 = vmul.f32 1.0614054, %v4140_v7  ;;  %v1820_v18 = vadd.f32 0.2548296, %v1796_v3  ;;  %vm4156_vm7 = vcmp.eq.f32.partialorder %v1443_v0, 8.507059e+37 }
 0x26e   : > { %2546 = vrcp.f32 %v4109_v59  ;;  %v4135_v5 = vpop.eup %2544  ;;  %v1480_v52 = vmul.f32 %v4124_v61, %v4073_v26  ;;  %vm1484_vm10 = vweird.f32 %v4073_v26  ;;  %v1460_v8 = vand.u32 2147483648, %v3939_v6 }
 0x26f   : > { %2548 = vpow2.f32 %v1934_v56  ;;  %v1526_v50 = vsub.f32 1.0, %v1525_v22  ;;  %v1445_v56 = vand.u32 2147483648, %v3918_v60  ;;  %v1677_v62 = vadd.f32 -1.4531521, %v1653_v24 }
 0x270   : > { %v1481_v16 = vsub.f32 1.0, %v1480_v52  ;;  %v2107_v60 = vmul.f32 %v2083_v33, %v3912_v49  ;;  %v1458_v24 = vand.u32 2147483647, %v3939_v6  ;;  %v1844_v38 = vmul.f32 %v1820_v18, %v4015_v4 }
 0x271   : > { %v4165_v22 = vmul.f32 %v4120_v2, %v1526_v50  ;;  %v1446_v3 = vor.u32 1.1754944e-38, %v1445_v56  ;;  %v1701_v0 = vmul.f32 %v1677_v62, %v4140_v7  ;;  %v1457_v4 = vsel %vm4179_vm11, %v4017_v20, %v1453_v31 }
 0x272   : > { %v1482_v17 = vmul.f32 %v4124_v61, %v1481_v16  ;;  %2181 = vmatmul.f32.gmra.mxu1 %v2107_v60  ;;  %v1964_v33 = vmul.f32 %v3961_v51, %v1844_v38  ;;  %vm1459_vm12 = vcmp.eq.f32.partialorder %v1458_v24, 8.507059e+37  ;;  %v1461_v46 = vor.u32 1.1754944e-38, %v1460_v8 }
 0x273   : > { %v4188_v16 = vsel %vm4156_vm7, %v1446_v3, %v1442_v34  ;;  %v1725_v56 = vadd.f32 1.4214138, %v1701_v0  ;;  %v4789_v34 = vld [vmem:[#allocation3_spill] sm:$0xff]  ;;  %v1468_v60 = vadd.f32 %v4059_v43, %v1467_v19  ;;  %vm1470_vm13 = vweird.f32 %v4059_v43 }
 0x274   : > { %v4161_v53 = vpop.eup %2546  ;;  %v1654_v18 = vmul.f32 1.0614054, %v4188_v16  ;;  %v1988_v20 = vsub.f32 1.0, %v1964_v33  ;;  %vm4209_vm14 = vmor %vm1469_vm6, %vm1470_vm13  ;;  %vm1499_vm15 = vweird.f32 %v3949_v44  ;;  %v4216_v24 = vsel %vm1459_vm12, %v1461_v46, %v1457_v4 }
 0x275   : > { %v4173_v40 = vmul.f32 %v4161_v53, %v4109_v59  ;;  %v4183_v49 = vpop.eup %2548  ;;  %v1749_v31 = vmul.f32 %v1725_v56, %v4140_v7  ;;  %v1472_v19 = vsel %vm4209_vm14, %v4059_v43, %v1468_v60  ;;  %v1475_v38 = vand.u32 2147483648, %v4019_v1 }
 0x276   : > { %v2161_v45 = vpop.f32.mrf.mxu1  ;;  %v1678_v3 = vadd.f32 -1.4531521, %v1654_v18  ;;  %v2036_v0 = vsub.f32 0.0, %v1988_v20  ;;  %v1655_v8 = vmul.f32 1.0614054, %v4216_v24  ;;  %v1483_v56 = vadd.f32 %v4124_v61, %v1482_v17 }
 0x277   : > { %v2162_v50 = vadd.f32 %v4152_v27, %v2161_v45  ;;  %v1541_v6 = vsub.f32 1.0, %v4173_v40  ;;  %v1473_v45 = vand.u32 2147483647, %v4019_v1  ;;  %v1773_v52 = vadd.f32 -0.28449672, %v1749_v31 }
 0x278   : > { %v1476_v33 = vor.u32 1.1754944e-38, %v1475_v38  ;;  %vm1485_vm2 = vweird.f32 %v4124_v61  ;;  %v2060_v43 = vsel %vm2012_vm9, %v1988_v20, %v2036_v0  ;;  %v1679_v1 = vadd.f32 -1.4531521, %v1655_v8 }
 0x279   : > { %v2233_v62 = vadd.f32 %v2162_v50, %v4789_v34  ;;  %v1702_v50 = vmul.f32 %v1678_v3, %v4188_v16  ;;  %vm1474_vm1 = vcmp.eq.f32.partialorder %v1473_v45, 8.507059e+37  ;;  %v1797_v18 = vmul.f32 %v1773_v52, %v4140_v7  ;;  %vm4232_vm3 = vmor %vm1484_vm10, %vm1485_vm2  ;;  %v4794_v45 = vld [vmem:[#allocation6_spill] sm:$0xff] }
 0x27a   : > { %v2084_v60 = vadd.f32 1.0, %v2060_v43  ;;  %v4237_v17 = vsel %vm1474_vm1, %v1476_v33, %v1472_v19  ;;  %v1487_v23 = vsel %vm4232_vm3, %v4124_v61, %v1483_v56  ;;  %v1703_v3 = vmul.f32 %v1679_v1, %v4216_v24 }
 0x27b   : > { %2257 = vst.msk [vmem:[%s4198_s11] sm:$0xff] %vm403_vm0, %v2233_v62  ;;  %v1726_v34 = vadd.f32 1.4214138, %v1702_v50  ;;  %v1821_v20 = vadd.f32 0.2548296, %v1797_v18  ;;  %vm2013_vm4 = vcmp.ge.f32.partialorder %v3846_v42, 0.0  ;;  %vm1514_vm5 = vweird.f32 %v4005_v41 }
 0x27c   : > { %v1656_v51 = vmul.f32 1.0614054, %v4237_v17  ;;  %v2108_v0 = vmul.f32 %v2084_v60, %v3924_v25  ;;  %v1488_v19 = vand.u32 2147483647, %v4073_v26  ;;  %v1490_v52 = vand.u32 2147483648, %v4073_v26 }
 0x27d   : > { %v1750_v31 = vmul.f32 %v1726_v34, %v4188_v16  ;;  %v1845_v61 = vmul.f32 %v1821_v20, %v4140_v7  ;;  %v1727_v8 = vadd.f32 1.4214138, %v1703_v3  ;;  %vm1500_vm7 = vweird.f32 %v4022_v47 }
 0x27e   : > { %v2164_v4 = vpop.f32.mrf.mxu1  ;;  %v1680_v33 = vadd.f32 -1.4531521, %v1656_v51  ;;  %2184 = vmatmul.f32.gmra.mxu1 %v2108_v0  ;;  %vm1489_vm6 = vcmp.eq.f32.partialorder %v1488_v19, 8.507059e+37  ;;  %v1491_v56 = vor.u32 1.1754944e-38, %v1490_v52  ;;  %vm4263_vm8 = vmor %vm1499_vm15, %vm1500_vm7  ;;  %v1505_v1 = vand.u32 2147483648, %v3949_v44  ;;  %v4797_v0 = vld [vmem:[#allocation2_spill] sm:$0xff] }
 0x27f   : > { %v2165_v46 = vadd.f32 %v4152_v27, %v2164_v4  ;;  %v1774_v50 = vadd.f32 -0.28449672, %v1750_v31  ;;  %v1498_v4 = vadd.f32 %v4022_v47, %v4092_v39  ;;  %v1965_v25 = vmul.f32 %v3998_v54, %v1845_v61 }
 0x280   : > { %v1751_v43 = vmul.f32 %v1727_v8, %v4216_v24  ;;  %v1704_v7 = vmul.f32 %v1680_v33, %v4237_v17  ;;  %v4267_v34 = vsel %vm1489_vm6, %v1491_v56, %v1487_v23  ;;  %v1503_v54 = vand.u32 2147483647, %v3949_v44 }
 0x281   : > { %v2234_v38 = vadd.f32 %v2165_v46, %v4794_v45  ;;  %v1798_v26 = vmul.f32 %v1774_v50, %v4188_v16  ;;  %v1502_v39 = vsel %vm4263_vm8, %v4022_v47, %v1498_v4  ;;  %v1989_v46 = vsub.f32 1.0, %v1965_v25 }
 0x282   : > { %v1775_v20 = vadd.f32 -0.28449672, %v1751_v43  ;;  %v1513_v31 = vadd.f32 %v4055_v58, %v4116_v55  ;;  %vm2014_vm9 = vcmp.ge.f32.partialorder %v3875_v37, 0.0  ;;  %v1728_v3 = vadd.f32 1.4214138, %v1704_v7 }
 0x283   : > { %2258 = vst.msk [vmem:[%s4198_s11 + $0x8] sm:$0xff] %vm403_vm0, %v2234_v38  ;;  %v1822_v60 = vadd.f32 0.2548296, %v1798_v26  ;;  %v1657_v51 = vmul.f32 1.0614054, %v4267_v34  ;;  %vm1504_vm10 = vcmp.eq.f32.partialorder %v1503_v54, 8.507059e+37  ;;  %vm1515_vm11 = vweird.f32 %v4055_v58 }
 0x284   : > { %v2037_v47 = vsub.f32 0.0, %v1989_v46  ;;  %v1799_v44 = vmul.f32 %v1775_v20, %v4216_v24  ;;  %v1506_v38 = vor.u32 1.1754944e-38, %v1505_v1  ;;  %v1752_v52 = vmul.f32 %v1728_v3, %v4237_v17  ;;  %vm4296_vm13 = vmor %vm1514_vm5, %vm1515_vm11 }
 0x285   : > { %v1846_v45 = vmul.f32 %v1822_v60, %v4188_v16  ;;  %v1681_v55 = vadd.f32 -1.4531521, %v1657_v51  ;;  %vm2015_vm12 = vcmp.ge.f32.partialorder %v3909_v30, 0.0  ;;  %vm1529_vm14 = vweird.f32 %v4071_v15 }
 0x286   : > { %v2167_v62 = vpop.f32.mrf.mxu1  ;;  %v2061_v61 = vsel %vm2013_vm4, %v1989_v46, %v2037_v47  ;;  %v1823_v8 = vadd.f32 0.2548296, %v1799_v44  ;;  %v4287_v33 = vsel %vm1504_vm10, %v1506_v38, %v1502_v39  ;;  %v1776_v56 = vadd.f32 -0.28449672, %v1752_v52 }
 0x287   : > { %v2168_v23 = vadd.f32 %v4152_v27, %v2167_v62  ;;  %v1966_v50 = vmul.f32 %v4049_v14, %v1846_v45  ;;  %v2085_v16 = vadd.f32 1.0, %v2061_v61  ;;  %v1705_v4 = vmul.f32 %v1681_v55, %v4267_v34 }
 0x288   : > { %v1658_v25 = vmul.f32 1.0614054, %v4287_v33  ;;  %v1847_v26 = vmul.f32 %v1823_v8, %v4216_v24  ;;  %v1517_v43 = vsel %vm4296_vm13, %v4055_v58, %v1513_v31  ;;  %v1518_v7 = vand.u32 2147483647, %v4005_v41 }
 0x289   : > { %v2235_v19 = vadd.f32 %v2168_v23, %v4797_v0  ;;  %v1990_v14 = vsub.f32 1.0, %v1966_v50  ;;  %v2109_v18 = vmul.f32 %v2085_v16, %v3928_v28  ;;  %v1800_v39 = vmul.f32 %v1776_v56, %v4237_v17 }
 0x28a   : > { %v1729_v54 = vadd.f32 1.4214138, %v1705_v4  ;;  %v1682_v1 = vadd.f32 -1.4531521, %v1658_v25  ;;  %v1967_v60 = vmul.f32 %v4066_v63, %v1847_v26  ;;  %vm4309_vm15 = vcmp.eq.f32.partialorder %v1518_v7, 8.507059e+37 }
 0x28b   : > { %2259 = vst.msk [vmem:[%s4198_s11 + $0x10] sm:$0xff] %vm403_vm0, %v2235_v19  ;;  %v2038_v46 = vsub.f32 0.0, %v1990_v14  ;;  %v1520_v24 = vand.u32 2147483648, %v4005_v41  ;;  %2187 = vmatmul.f32.gmra.mxu1 %v2109_v18  ;;  %v1824_v31 = vadd.f32 0.2548296, %v1800_v39  ;;  %vm2016_vm1 = vcmp.ge.f32.partialorder %v3974_v21, 0.0 }
 0x28c   : > { %v1753_v28 = vmul.f32 %v1729_v54, %v4267_v34  ;;  %v1706_v23 = vmul.f32 %v1682_v1, %v4287_v33  ;;  %v1991_v3 = vsub.f32 1.0, %v1967_v60  ;;  %v1528_v47 = vadd.f32 %v4120_v2, %v4165_v22  ;;  %v4802_v41 = vld [vmem:[#allocation5_spill] sm:$0xff] }
 0x28d   : > { %v2062_v63 = vsel %vm2014_vm9, %v1990_v14, %v2038_v46  ;;  %v1521_v51 = vor.u32 1.1754944e-38, %v1520_v24  ;;  %v1848_v38 = vmul.f32 %v1824_v31, %v4237_v17  ;;  %vm1530_vm2 = vweird.f32 %v4120_v2  ;;  %v4807_v46 = vld [vmem:[#allocation4_spill] sm:$0xff] }
 0x28e   : > { %v2170_v62 = vpop.f32.mrf.mxu1  ;;  %v2086_v44 = vadd.f32 1.0, %v2062_v63  ;;  %v1777_v0 = vadd.f32 -0.28449672, %v1753_v28  ;;  %v2039_v19 = vsub.f32 0.0, %v1991_v3  ;;  %v1730_v52 = vadd.f32 1.4214138, %v1706_v23  ;;  %vm4344_vm3 = vmor %vm1529_vm14, %vm1530_vm2 }
 0x28f   : > { %v2171_v58 = vadd.f32 %v4152_v27, %v2170_v62  ;;  %v4326_v55 = vsel %vm4309_vm15, %v1521_v51, %v1517_v43  ;;  %v1968_v22 = vmul.f32 %v4135_v5, %v1848_v38  ;;  %v1542_v17 = vmul.f32 %v4161_v53, %v1541_v6 }
 0x290   : > { %v2110_v37 = vmul.f32 %v2086_v44, %v3970_v29  ;;  %v1801_v61 = vmul.f32 %v1777_v0, %v4267_v34  ;;  %v1659_v50 = vmul.f32 1.0614054, %v4326_v55  ;;  %v2063_v8 = vsel %vm2015_vm12, %v1991_v3, %v2039_v19 }
 0x291   : > { %v2236_v45 = vadd.f32 %v2171_v58, %v4802_v41  ;;  %v1754_v16 = vmul.f32 %v1730_v52, %v4287_v33  ;;  %v1533_v56 = vand.u32 2147483647, %v4071_v15  ;;  %v2087_v4 = vadd.f32 1.0, %v2063_v8 }
 0x292   : > { %v1992_v25 = vsub.f32 1.0, %v1968_v22  ;;  %v1825_v29 = vadd.f32 0.2548296, %v1801_v61  ;;  %v1683_v42 = vadd.f32 -1.4531521, %v1659_v50  ;;  %v1532_v30 = vsel %vm4344_vm3, %v4120_v2, %v1528_v47  ;;  %v4811_v50 = vld [vmem:[#allocation7_spill] sm:$0xff] }
 0x293   : > { %2260 = vst.msk [vmem:[%s4198_s11 + $0x18] sm:$0xff] %vm403_vm0, %v2236_v45  ;;  %v1778_v14 = vadd.f32 -0.28449672, %v1754_v16  ;;  %vm4351_vm4 = vcmp.eq.f32.partialorder %v1533_v56, 8.507059e+37  ;;  %v1535_v26 = vand.u32 2147483648, %v4071_v15  ;;  %2190 = vmatmul.f32.gmra.mxu1 %v2110_v37  ;;  %v2111_v7 = vmul.f32 %v2087_v4, %v4025_v48 }
 0x294   : > { %v2040_v18 = vsub.f32 0.0, %v1992_v25  ;;  %v1849_v39 = vmul.f32 %v1825_v29, %v4267_v34  ;;  %v1707_v1 = vmul.f32 %v1683_v42, %v4326_v55  ;;  %v1543_v62 = vadd.f32 %v4161_v53, %v1542_v17 }
 0x295   : > { %v1802_v54 = vmul.f32 %v1778_v14, %v4287_v33  ;;  %v1536_v2 = vor.u32 1.1754944e-38, %v1535_v26  ;;  %2193 = vmatmul.f32.vlgmr.msra.gmra.mxu2 %v2111_v7  ;;  %vm1545_vm5 = vweird.f32 %v4161_v53  ;;  %vm1544_vm6 = vweird.f32 %v4109_v59 }
 0x296   : > { %v2173_v40 = vpop.f32.mrf.mxu1  ;;  %v2064_v15 = vsel %vm2016_vm1, %v1992_v25, %v2040_v18  ;;  %v1969_v20 = vmul.f32 %v4183_v49, %v1849_v39  ;;  %v1731_v34 = vadd.f32 1.4214138, %v1707_v1  ;;  %v1548_v23 = vand.u32 2147483647, %v4109_v59  ;;  %vm4376_vm8 = vmor %vm1544_vm6, %vm1545_vm5 }
 0x297   : > { %v2174_v43 = vadd.f32 %v4152_v27, %v2173_v40  ;;  %v2088_v48 = vadd.f32 1.0, %v2064_v15  ;;  %v1826_v24 = vadd.f32 0.2548296, %v1802_v54  ;;  %v1537_v58 = vsel %vm4351_vm4, %v1536_v2, %v1532_v30 }
 0x298   : > { %v1993_v31 = vsub.f32 1.0, %v1969_v20  ;;  %v1660_v28 = vmul.f32 1.0614054, %v1537_v58  ;;  %vm2017_vm7 = vcmp.ge.f32.partialorder %v4036_v36, 0.0  ;;  %v1755_v49 = vmul.f32 %v1731_v34, %v4326_v55  ;;  %v4813_v34 = vld [vmem:[#allocation28_spill] sm:$0xff] }
 0x299   : > { %v2237_v60 = vadd.f32 %v2174_v43, %v4807_v46  ;;  %v1850_v21 = vmul.f32 %v1826_v24, %v4287_v33  ;;  %v1550_v3 = vand.u32 2147483648, %v4109_v59  ;;  %v2112_v51 = vmul.f32 %v2088_v48, %v4088_v12 }
 0x29a   : > { %v2041_v47 = vsub.f32 0.0, %v1993_v31  ;;  %v1684_v41 = vadd.f32 -1.4531521, %v1660_v28  ;;  %v1547_v45 = vsel %vm4376_vm8, %v4161_v53, %v1543_v62  ;;  %v4810_v36 = vsub.f32 0.0, %v4046_v35 }
 0x29b   : > { %2261 = vst.msk [vmem:[%s4198_s11 + $0x20] sm:$0xff] %vm403_vm0, %v2237_v60  ;;  %v1970_v38 = vmul.f32 %v4080_v10, %v1850_v21  ;;  %v1779_v0 = vadd.f32 -0.28449672, %v1755_v49  ;;  %v1551_v19 = vor.u32 1.1754944e-38, %v1550_v3  ;;  %vm1549_vm9 = vcmp.eq.f32.partialorder %v1548_v23, 8.507059e+37 }
 0x29c   : > { %v1900_v33 = vmul.f32 %v4810_v36, %v4046_v35  ;;  %v2065_v59 = vsel %vm2017_vm7, %v1993_v31, %v2041_v47  ;;  %v1708_v12 = vmul.f32 %v1684_v41, %v1537_v58  ;;  %v1877_v37 = vsub.f32 0.0, %v4076_v57  ;;  %v4814_v41 = vld [vmem:[#allocation26_spill] sm:$0xff]  ;;  %v4815_v36 = vld [vmem:[#allocation29_spill] sm:$0xff] }
 0x29d   : > { %v1994_v22 = vsub.f32 1.0, %v1970_v38  ;;  %v1803_v53 = vmul.f32 %v1779_v0, %v4326_v55  ;;  %v1552_v61 = vsel %vm1549_vm9, %v1551_v19, %v1547_v45  ;;  %2196 = vmatmul.f32.gmra.mxu2 %v2112_v51  ;;  %v2089_v35 = vadd.f32 1.0, %v2065_v59 }
 0x29e   : > { %v2176_v44 = vpop.f32.mrf.mxu1  ;;  %v1732_v8 = vadd.f32 1.4214138, %v1708_v12  ;;  %v1661_v10 = vmul.f32 1.0614054, %v1552_v61  ;;  %v1940_v16 = vmul.f32 1.442695, %v1900_v33  ;;  %v1901_v40 = vmul.f32 %v1877_v37, %v4076_v57 }
 0x29f   : > { %v2177_v52 = vadd.f32 %v4152_v27, %v2176_v44  ;;  %v1827_v56 = vadd.f32 0.2548296, %v1803_v53  ;;  %v1177_v4 = vmul.f32 0.5, %v4011_v11  ;;  %v2042_v42 = vsub.f32 0.0, %v1994_v22  ;;  %v2581_v12 = vld [vmem:[%s4663_s5] ss:$0 sm:$0xff] }
 0x2a0   : > { %v1756_v25 = vmul.f32 %v1732_v8, %v1537_v58  ;;  %v1685_v29 = vadd.f32 -1.4531521, %v1661_v10  ;;  %2550 = vpow2.f32 %v1940_v16  ;;  %vm2018_vm10 = vcmp.ge.f32.partialorder %v3915_v13, 0.0 }
 0x2a1   : > { %v2238_v17 = vadd.f32 %v2177_v52, %v4811_v50  ;;  %v1851_v5 = vmul.f32 %v1827_v56, %v4326_v55  ;;  %v2113_v14 = vmul.f32 %v2089_v35, %v1177_v4  ;;  %v2066_v39 = vsel %vm2018_vm10, %v1994_v22, %v2042_v42  ;;  %v4812_v55 = vld [vmem:[#allocation8_spill] sm:$0xff]  ;;  %v4816_v52 = vld [vmem:[#allocation27_spill] sm:$0xff]  ;;  %v4818_v35 = vld [vmem:[#allocation30_spill] sm:$0xff] }
 0x2a2   : > { %v1780_v30 = vadd.f32 -0.28449672, %v1756_v25  ;;  %v1709_v6 = vmul.f32 %v1685_v29, %v1552_v61  ;;  %v1942_v1 = vmul.f32 1.442695, %v1901_v40  ;;  %v2090_v46 = vadd.f32 1.0, %v2066_v39  ;;  %v4817_v22 = vld [vmem:[#allocation31_spill] sm:$0xff] }
 0x2a3   : > { %2262 = vst.msk [vmem:[%s4198_s11 + $0x28] sm:$0xff] %vm403_vm0, %v2238_v17  ;;  %v1971_v43 = vmul.f32 %v4113_v9, %v1851_v5  ;;  %v1178_v13 = vmul.f32 0.5, %v3905_v32  ;;  %vm2019_vm11 = vcmp.ge.f32.partialorder %v4813_v34, 0.0  ;;  %v1179_v45 = vmul.f32 0.5, %v4814_v41 }
 0x2a4   : > { %v1804_v7 = vmul.f32 %v1780_v30, %v1537_v58  ;;  %v1733_v18 = vadd.f32 1.4214138, %v1709_v6  ;;  %2552 = vpow2.f32 %v1942_v1  ;;  %vm2020_vm12 = vcmp.ge.f32.partialorder %v4815_v36, 0.0 }
 0x2a5   : > { %v1995_v54 = vsub.f32 1.0, %v1971_v43  ;;  %2199 = vmatmul.f32.gmra.mxu2 %v2113_v14  ;;  %v2114_v31 = vmul.f32 %v2090_v46, %v1178_v13  ;;  %v1180_v59 = vmul.f32 0.5, %v4816_v52  ;;  %vm2021_vm13 = vcmp.ge.f32.partialorder %v4817_v22, 0.0 }
 0x2a6   : > { %v2179_v26 = vpop.f32.mrf.mxu1  ;;  %v1828_v57 = vadd.f32 0.2548296, %v1804_v7  ;;  %v1757_v62 = vmul.f32 %v1733_v18, %v1552_v61  ;;  %v2551_v9 = vpop.eup %2550  ;;  %v1181_v8 = vmul.f32 0.5, %v4818_v35 }
 0x2a7   : > { %v2180_v11 = vadd.f32 %v4152_v27, %v2179_v26  ;;  %v2043_v20 = vsub.f32 0.0, %v1995_v54 }
 0x2a8   : > { %v1852_v60 = vmul.f32 %v1828_v57, %v1537_v58  ;;  %v1781_v15 = vadd.f32 -0.28449672, %v1757_v62 }
 0x2a9   : > { %v2239_v2 = vadd.f32 %v2180_v11, %v4812_v55  ;;  %v2067_v23 = vsel %vm2019_vm11, %v1995_v54, %v2043_v20 }
 0x2aa   : > { %v1972_v48 = vmul.f32 %v2551_v9, %v1852_v60  ;;  %v1805_v24 = vmul.f32 %v1781_v15, %v1552_v61  ;;  %v2553_v3 = vpop.eup %2552  ;;  %v2091_v51 = vadd.f32 1.0, %v2067_v23 }
 0x2ab   : > { %2263 = vst.msk [vmem:[%s4198_s11 + $0x30] sm:$0xff] %vm403_vm0, %v2239_v2 }
 0x2ac   : > { %v1829_v28 = vadd.f32 0.2548296, %v1805_v24  ;;  %v1996_v21 = vsub.f32 1.0, %v1972_v48  ;;  %v2115_v32 = vmul.f32 %v2091_v51, %v1179_v45 }
 0x2ad   : > { %2202 = vmatmul.f32.gmra.mxu2 %v2114_v31 }
 0x2ae   : > { %v1853_v49 = vmul.f32 %v1829_v28, %v1552_v61  ;;  %v2044_v58 = vsub.f32 0.0, %v1996_v21 }
 0x2b0   : > { %v1973_v47 = vmul.f32 %v2553_v3, %v1853_v49  ;;  %v2068_v33 = vsel %vm2020_vm12, %v1996_v21, %v2044_v58 }
 0x2b1   : > { %v2092_v38 = vadd.f32 1.0, %v2068_v33 }
 0x2b2   : > { %v1997_v44 = vsub.f32 1.0, %v1973_v47 }
 0x2b3   : > { %v2116_v53 = vmul.f32 %v2092_v38, %v1180_v59 }
 0x2b4   : > { %v1146_v63 = vpop.f32.mrf.mxu3  ;;  %v2045_v0 = vsub.f32 0.0, %v1997_v44 }
 0x2b5   : > { %2205 = vmatmul.f32.gmra.mxu2 %v2115_v32  ;;  %v4412_v37 = vadd.f32 %v2581_v12, %v1146_v63 }
 0x2b6   : > { %v2069_v61 = vsel %vm2021_vm13, %v1997_v44, %v2045_v0 }
 0x2b7   : > { %v4416_v50 = vmul.f32 0.70710677, %v4412_v37  ;;  %v2093_v17 = vadd.f32 1.0, %v2069_v61 }
 0x2b9   : > { %v1230_v10 = vand.u32 2147483647, %v4416_v50  ;;  %v2117_v4 = vmul.f32 %v2093_v17, %v1181_v8  ;;  %vm2022_vm12 = vcmp.ge.f32.partialorder %v4416_v50, 0.0 }
 0x2bb   : > { %v1254_v25 = vmul.f32 0.3275911, %v1230_v10  ;;  %v1878_v21 = vsub.f32 0.0, %v1230_v10 }
 0x2bc   : > { %v1149_v19 = vpop.f32.mrf.mxu3 }
 0x2bd   : > { %2208 = vmatmul.f32.gmra.mxu2 %v2116_v53  ;;  %v4420_v16 = vadd.f32 %v2581_v12, %v1149_v19  ;;  %v1278_v42 = vadd.f32 1.0, %v1254_v25  ;;  %v1902_v44 = vmul.f32 %v1878_v21, %v1230_v10 }
 0x2bf   : > { %v4423_v29 = vmul.f32 0.70710677, %v4420_v16  ;;  %2554 = vrcp.f32 %v1278_v42  ;;  %v1565_v13 = vand.u32 2147483648, %v1278_v42  ;;  %v1563_v24 = vand.u32 2147483647, %v1278_v42 }
 0x2c0   : > { %vm1559_vm15 = vweird.f32 %v1278_v42  ;;  %v1944_v17 = vmul.f32 1.442695, %v1902_v44 }
 0x2c1   : > { %v4426_v5 = vand.u32 2147483647, %v4423_v29  ;;  %v1566_v63 = vor.u32 1.1754944e-38, %v1565_v13  ;;  %vm1564_vm2 = vcmp.eq.f32.partialorder %v1563_v24, 8.507059e+37 }
 0x2c3   : > { %v1255_v30 = vmul.f32 0.3275911, %v4426_v5  ;;  %v1879_v10 = vsub.f32 0.0, %v4426_v5 }
 0x2c4   : > { %v1152_v56 = vpop.f32.mrf.mxu3 }
 0x2c5   : > { %2211 = vmatmul.f32.gmra.mxu2 %v2117_v4  ;;  %v4428_v40 = vadd.f32 %v2581_v12, %v1152_v56  ;;  %v1279_v43 = vadd.f32 1.0, %v1255_v30  ;;  %v2555_v7 = vpop.eup %2554 }
 0x2c6   : > { %v1555_v54 = vmul.f32 %v2555_v7, %v1278_v42  ;;  %vm1560_vm14 = vweird.f32 %v2555_v7 }
 0x2c7   : > { %v4432_v6 = vmul.f32 0.70710677, %v4428_v40  ;;  %2556 = vrcp.f32 %v1279_v43  ;;  %vm1561_vm1 = vmor %vm1559_vm15, %vm1560_vm14  ;;  %v1580_v33 = vand.u32 2147483648, %v1279_v43  ;;  %v1578_v0 = vand.u32 2147483647, %v1279_v43 }
 0x2c8   : > { %v1556_v62 = vsub.f32 1.0, %v1555_v54  ;;  %vm1574_vm4 = vweird.f32 %v1279_v43 }
 0x2c9   : > { %v4437_v11 = vand.u32 2147483647, %v4432_v6  ;;  %v1581_v61 = vor.u32 1.1754944e-38, %v1580_v33  ;;  %vm1579_vm6 = vcmp.eq.f32.partialorder %v1578_v0, 8.507059e+37 }
 0x2ca   : > { %v1557_v9 = vmul.f32 %v2555_v7, %v1556_v62 }
 0x2cb   : > { %v1256_v39 = vmul.f32 0.3275911, %v4437_v11 }
 0x2cc   : > { %v1155_v14 = vpop.f32.mrf.mxu3  ;;  %v1558_v28 = vadd.f32 %v2555_v7, %v1557_v9 }
 0x2cd   : > { %v4434_v26 = vadd.f32 %v2581_v12, %v1155_v14  ;;  %v4446_v2 = vadd.f32 1.0, %v1256_v39  ;;  %v2557_v46 = vpop.eup %2556 }
 0x2ce   : > { %v1570_v20 = vmul.f32 %v2557_v46, %v1279_v43  ;;  %v1562_v51 = vsel %vm1561_vm1, %v2555_v7, %v1558_v28  ;;  %vm1575_vm3 = vweird.f32 %v2557_v46  ;;  %v4819_v28 = vld [vmem:[#allocation10_spill] sm:$0xff] }
 0x2cf   : > { %v4440_v18 = vmul.f32 0.70710677, %v4434_v26  ;;  %2558 = vrcp.f32 %v4446_v2  ;;  %v4466_v47 = vsel %vm1564_vm2, %v1566_v63, %v1562_v51  ;;  %vm1576_vm5 = vmor %vm1574_vm4, %vm1575_vm3  ;;  %v1595_v43 = vand.u32 2147483648, %v4446_v2 }
 0x2d0   : > { %v1571_v31 = vsub.f32 1.0, %v1570_v20  ;;  %v1662_v32 = vmul.f32 1.0614054, %v4466_v47  ;;  %v1593_v54 = vand.u32 2147483647, %v4446_v2  ;;  %vm1589_vm8 = vweird.f32 %v4446_v2 }
 0x2d1   : > { %v4444_v55 = vand.u32 2147483647, %v4440_v18  ;;  %v1182_v63 = vmul.f32 0.5, %v4412_v37 }
 0x2d2   : > { %v1572_v41 = vmul.f32 %v2557_v46, %v1571_v31  ;;  %v1686_v38 = vadd.f32 -1.4531521, %v1662_v32  ;;  %v1880_v31 = vsub.f32 0.0, %v4437_v11  ;;  %vm1594_vm10 = vcmp.eq.f32.partialorder %v1593_v54, 8.507059e+37 }
 0x2d3   : > { %v1257_v60 = vmul.f32 0.3275911, %v4444_v55  ;;  %v1881_v0 = vsub.f32 0.0, %v4444_v55 }
 0x2d4   : > { %v1158_v1 = vpop.f32.mrf.mxu3  ;;  %v1710_v22 = vmul.f32 %v1686_v38, %v4466_v47  ;;  %v1573_v53 = vadd.f32 %v2557_v46, %v1572_v41 }
 0x2d5   : > { %v4448_v57 = vadd.f32 %v2581_v12, %v1158_v1  ;;  %v4455_v48 = vadd.f32 1.0, %v1257_v60  ;;  %v4460_v23 = vpop.eup %2558  ;;  %v1903_v1 = vmul.f32 %v1879_v10, %v4426_v5 }
 0x2d6   : > { %v1585_v45 = vmul.f32 %v4460_v23, %v4446_v2  ;;  %v1734_v35 = vadd.f32 1.4214138, %v1710_v22  ;;  %v1577_v8 = vsel %vm1576_vm5, %v2557_v46, %v1573_v53  ;;  %vm1590_vm7 = vweird.f32 %v4460_v23 }
 0x2d7   : > { %v4453_v15 = vmul.f32 0.70710677, %v4448_v57  ;;  %2560 = vrcp.f32 %v4455_v48  ;;  %v4486_v4 = vsel %vm1579_vm6, %v1581_v61, %v1577_v8  ;;  %vm1591_vm9 = vmor %vm1589_vm8, %vm1590_vm7  ;;  %v1610_v22 = vand.u32 2147483648, %v4455_v48 }
 0x2d8   : > { %v1586_v59 = vsub.f32 1.0, %v1585_v45  ;;  %v1758_v14 = vmul.f32 %v1734_v35, %v4466_v47  ;;  %v1663_v30 = vmul.f32 1.0614054, %v4486_v4  ;;  %vm1604_vm13 = vweird.f32 %v4455_v48 }
 0x2d9   : > { %v4458_v34 = vand.u32 2147483647, %v4453_v15  ;;  %vm2023_vm5 = vcmp.ge.f32.partialorder %v4423_v29, 0.0  ;;  %vm2024_vm7 = vcmp.ge.f32.partialorder %v4432_v6, 0.0 }
 0x2da   : > { %v1587_v25 = vmul.f32 %v4460_v23, %v1586_v59  ;;  %v1782_v39 = vadd.f32 -0.28449672, %v1758_v14  ;;  %v1687_v60 = vadd.f32 -1.4531521, %v1663_v30  ;;  %v1611_v14 = vor.u32 1.1754944e-38, %v1610_v22 }
 0x2db   : > { %v1258_v58 = vmul.f32 0.3275911, %v4458_v34 }
 0x2dc   : > { %v1806_v20 = vmul.f32 %v1782_v39, %v4466_v47  ;;  %v1588_v13 = vadd.f32 %v4460_v23, %v1587_v25  ;;  %v1711_v5 = vmul.f32 %v1687_v60, %v4486_v4  ;;  %v1905_v25 = vmul.f32 %v1881_v0, %v4444_v55 }
 0x2dd   : > { %v4474_v19 = vadd.f32 1.0, %v1258_v58  ;;  %v4476_v52 = vpop.eup %2560  ;;  %v1946_v58 = vmul.f32 1.442695, %v1903_v1 }
 0x2de   : > { %v1600_v56 = vmul.f32 %v4476_v52, %v4455_v48  ;;  %v1830_v2 = vadd.f32 0.2548296, %v1806_v20  ;;  %v1592_v51 = vsel %vm1591_vm9, %v4460_v23, %v1588_v13  ;;  %v1735_v45 = vadd.f32 1.4214138, %v1711_v5 }
 0x2df   : > { %2562 = vrcp.f32 %v4474_v19  ;;  %v1904_v23 = vmul.f32 %v1880_v31, %v4437_v11  ;;  %vm1605_vm11 = vweird.f32 %v4476_v52  ;;  %v1625_v54 = vand.u32 2147483648, %v4474_v19 }
 0x2e0   : > { %2564 = vpow2.f32 %v1944_v17  ;;  %v1601_v62 = vsub.f32 1.0, %v1600_v56  ;;  %v1854_v37 = vmul.f32 %v1830_v2, %v4466_v47  ;;  %v1759_v59 = vmul.f32 %v1735_v45, %v4486_v4  ;;  %vm1606_vm14 = vmor %vm1604_vm13, %vm1605_vm11 }
 0x2e1   : > { %v1608_v17 = vand.u32 2147483647, %v4455_v48  ;;  %v1948_v56 = vmul.f32 1.442695, %v1904_v23  ;;  %v1623_v2 = vand.u32 2147483647, %v4474_v19  ;;  %vm1619_vm2 = vweird.f32 %v4474_v19 }
 0x2e2   : > { %v1161_v49 = vpop.f32.mrf.mxu3  ;;  %v1602_v41 = vmul.f32 %v4476_v52, %v1601_v62  ;;  %v1783_v47 = vadd.f32 -0.28449672, %v1759_v59  ;;  %vm2025_vm11 = vcmp.ge.f32.partialorder %v4440_v18, 0.0 }
 0x2e3   : > { %v4463_v3 = vadd.f32 %v2581_v12, %v1161_v49  ;;  %v1596_v49 = vor.u32 1.1754944e-38, %v1595_v43  ;;  %vm1609_vm15 = vcmp.eq.f32.partialorder %v1608_v17, 8.507059e+37  ;;  %vm1624_vm4 = vcmp.eq.f32.partialorder %v1623_v2, 8.507059e+37 }
 0x2e4   : > { %v1603_v10 = vadd.f32 %v4476_v52, %v1602_v41  ;;  %v1184_v2 = vmul.f32 0.5, %v4428_v40 }
 0x2e5   : > { %v4471_v36 = vmul.f32 0.70710677, %v4463_v3  ;;  %v4502_v24 = vpop.eup %2562  ;;  %v4512_v32 = vsel %vm1594_vm10, %v1596_v49, %v1592_v51 }
 0x2e6   : > { %v2565_v33 = vpop.eup %2564  ;;  %v1615_v44 = vmul.f32 %v4502_v24, %v4474_v19  ;;  %v1664_v38 = vmul.f32 1.0614054, %v4512_v32  ;;  %v1607_v48 = vsel %vm1606_vm14, %v4476_v52, %v1603_v10  ;;  %vm1620_vm1 = vweird.f32 %v4502_v24 }
 0x2e7   : > { %v4479_v12 = vand.u32 2147483647, %v4471_v36  ;;  %v1974_v53 = vmul.f32 %v2565_v33, %v1854_v37  ;;  %vm1621_vm3 = vmor %vm1619_vm2, %vm1620_vm1  ;;  %v1626_v37 = vor.u32 1.1754944e-38, %v1625_v54  ;;  %v1882_v19 = vsub.f32 0.0, %v4458_v34 }
 0x2e8   : > { %v1688_v61 = vadd.f32 -1.4531521, %v1664_v38  ;;  %v1616_v35 = vsub.f32 1.0, %v1615_v44  ;;  %vm2027_vm13 = vcmp.ge.f32.partialorder %v4471_v36, 0.0  ;;  %v4826_v36 = vld [vmem:[#allocation13_spill] sm:$0xff] }
 0x2e9   : > { %v1259_v42 = vmul.f32 0.3275911, %v4479_v12  ;;  %v1998_v11 = vsub.f32 1.0, %v1974_v53  ;;  %v1906_v29 = vmul.f32 %v1882_v19, %v4458_v34 }
 0x2ea   : > { %v1712_v8 = vmul.f32 %v1688_v61, %v4512_v32  ;;  %v1617_v55 = vmul.f32 %v4502_v24, %v1616_v35 }
 0x2eb   : > { %v4498_v9 = vadd.f32 1.0, %v1259_v42  ;;  %v1807_v42 = vmul.f32 %v1783_v47, %v4486_v4 }
 0x2ec   : > { %v1736_v39 = vadd.f32 1.4214138, %v1712_v8  ;;  %v1618_v44 = vadd.f32 %v4502_v24, %v1617_v55 }
 0x2ed   : > { %2566 = vrcp.f32 %v4498_v9  ;;  %v1831_v62 = vadd.f32 0.2548296, %v1807_v42  ;;  %vm1634_vm8 = vweird.f32 %v4498_v9 }
 0x2ee   : > { %2568 = vpow2.f32 %v1946_v58  ;;  %v1760_v20 = vmul.f32 %v1736_v39, %v4512_v32  ;;  %v1622_v22 = vsel %vm1621_vm3, %v4502_v24, %v1618_v44 }
 0x2ef   : > { %v2182_v7 = vpop.f32.mrf.mxu1  ;;  %v1855_v49 = vmul.f32 %v1831_v62, %v4486_v4  ;;  %2570 = vpow2.f32 %v1948_v56  ;;  %v1950_v4 = vmul.f32 1.442695, %v1905_v25  ;;  %v4558_v61 = vsel %vm1624_vm4, %v1626_v37, %v1622_v22  ;;  %v4822_v37 = vld [vmem:[#allocation12_spill] sm:$0xff] }
 0x2f0   : > { %v2183_v46 = vadd.f32 %v4152_v27, %v2182_v7  ;;  %v2046_v7 = vsub.f32 0.0, %v1998_v11  ;;  %v1784_v51 = vadd.f32 -0.28449672, %v1760_v20  ;;  %v1666_v35 = vmul.f32 1.0614054, %v4558_v61 }
 0x2f1   : > { %2572 = vpow2.f32 %v1950_v4 }
 0x2f2   : > { %v2240_v21 = vadd.f32 %v2183_v46, %v4819_v28  ;;  %v4536_v46 = vsel %vm1609_vm15, %v1611_v14, %v1607_v48  ;;  %v2070_v60 = vsel %vm2022_vm12, %v1998_v11, %v2046_v7  ;;  %v4820_v28 = vld [vmem:[#allocation11_spill] sm:$0xff]  ;;  %v1808_v45 = vmul.f32 %v1784_v51, %v4512_v32 }
 0x2f3   : > { %v4531_v30 = vpop.eup %2566  ;;  %v1665_v13 = vmul.f32 1.0614054, %v4536_v46  ;;  %v2094_v5 = vadd.f32 1.0, %v2070_v60  ;;  %v1690_v14 = vadd.f32 -1.4531521, %v1666_v35  ;;  %vm2026_vm12 = vcmp.ge.f32.partialorder %v4453_v15, 0.0 }
 0x2f4   : > { %2264 = vst.msk [vmem:[%s4198_s11 + $0x38] sm:$0xff] %vm403_vm0, %v2240_v21  ;;  %v2569_v31 = vpop.eup %2568  ;;  %v1630_v52 = vmul.f32 %v4531_v30, %v4498_v9  ;;  %v1832_v0 = vadd.f32 0.2548296, %v1808_v45  ;;  %vm1635_vm6 = vweird.f32 %v4531_v30 }
 0x2f5   : > { %v1689_v50 = vadd.f32 -1.4531521, %v1665_v13  ;;  %v2118_v58 = vmul.f32 %v2094_v5, %v1182_v63  ;;  %v1975_v41 = vmul.f32 %v2569_v31, %v1855_v49  ;;  %v1183_v63 = vmul.f32 0.5, %v4420_v16  ;;  %v2571_v11 = vpop.eup %2570  ;;  %vm1636_vm9 = vmor %vm1634_vm8, %vm1635_vm6 }
 0x2f6   : > { %v1631_v38 = vsub.f32 1.0, %v1630_v52  ;;  %v1856_v17 = vmul.f32 %v1832_v0, %v4512_v32  ;;  %v1640_v16 = vand.u32 2147483648, %v4498_v9  ;;  %v1714_v54 = vmul.f32 %v1690_v14, %v4558_v61 }
 0x2f7   : > { %v1713_v33 = vmul.f32 %v1689_v50, %v4536_v46  ;;  %2214 = vmatmul.f32.gmra.mxu2 %v2118_v58  ;;  %v1999_v23 = vsub.f32 1.0, %v1975_v41  ;;  %v2573_v13 = vpop.eup %2572  ;;  %v1952_v31 = vmul.f32 1.442695, %v1906_v29  ;;  %v1883_v52 = vsub.f32 0.0, %v4479_v12 }
 0x2f8   : > { %v1632_v24 = vmul.f32 %v4531_v30, %v1631_v38  ;;  %v1976_v25 = vmul.f32 %v2571_v11, %v1856_v17  ;;  %v1738_v60 = vadd.f32 1.4214138, %v1714_v54  ;;  %v1641_v20 = vor.u32 1.1754944e-38, %v1640_v16 }
 0x2f9   : > { %v1737_v59 = vadd.f32 1.4214138, %v1713_v33  ;;  %v2047_v53 = vsub.f32 0.0, %v1999_v23  ;;  %2574 = vpow2.f32 %v1952_v31  ;;  %v1907_v44 = vmul.f32 %v1883_v52, %v4479_v12  ;;  %v4825_v52 = vld [vmem:[#allocation18_spill] sm:$0xff] }
 0x2fa   : > { %v2000_v39 = vsub.f32 1.0, %v1976_v25  ;;  %v1633_v34 = vadd.f32 %v4531_v30, %v1632_v24  ;;  %v1762_v5 = vmul.f32 %v1738_v60, %v4558_v61  ;;  %v1185_v12 = vmul.f32 0.5, %v4434_v26 }
 0x2fb   : > { %v2185_v43 = vpop.f32.mrf.mxu1  ;;  %v1761_v47 = vmul.f32 %v1737_v59, %v4536_v46  ;;  %v2071_v8 = vsel %vm2023_vm5, %v1999_v23, %v2047_v53  ;;  %v1186_v29 = vmul.f32 0.5, %v4448_v57 }
 0x2fc   : > { %v2186_v1 = vadd.f32 %v4152_v27, %v2185_v43  ;;  %v2095_v56 = vadd.f32 1.0, %v2071_v8  ;;  %v1638_v43 = vand.u32 2147483647, %v4498_v9  ;;  %v1786_v45 = vadd.f32 -0.28449672, %v1762_v5 }
 0x2fd   : > { %v1785_v42 = vadd.f32 -0.28449672, %v1761_v47 }
 0x2fe   : > { %v2241_v21 = vadd.f32 %v2186_v1, %v4820_v28  ;;  %v2119_v7 = vmul.f32 %v2095_v56, %v1183_v63  ;;  %v4821_v1 = vld [vmem:[#allocation9_spill] sm:$0xff]  ;;  %v1637_v28 = vsel %vm1636_vm9, %v4531_v30, %v1633_v34  ;;  %vm1639_vm10 = vcmp.eq.f32.partialorder %v1638_v43, 8.507059e+37  ;;  %v4588_v30 = vld [vmem:[%s4665_s7] ss:$0 sm:$0xff] }
 0x2ff   : > { %v1809_v48 = vmul.f32 %v1785_v42, %v4536_v46  ;;  %v1642_v49 = vsel %vm1639_vm10, %v1641_v20, %v1637_v28  ;;  %v1810_v40 = vmul.f32 %v1786_v45, %v4558_v61  ;;  %v1954_v63 = vmul.f32 1.442695, %v1907_v44  ;;  %v2575_v17 = vpop.eup %2574  ;;  %v4823_v56 = vld [vmem:[#allocation14_spill] sm:$0xff] }
 0x300   : > { %2265 = vst.msk [vmem:[%s4198_s11 + $0x40] sm:$0xff] %vm403_vm0, %v2241_v21  ;;  %2217 = vmatmul.f32.gmra.mxu2 %v2119_v7  ;;  %v1667_v50 = vmul.f32 1.0614054, %v1642_v49 }
 0x301   : > { %v1833_v55 = vadd.f32 0.2548296, %v1809_v48  ;;  %v1834_v59 = vadd.f32 0.2548296, %v1810_v40  ;;  %2576 = vpow2.f32 %v1954_v63 }
 0x302   : > { %v1691_v33 = vadd.f32 -1.4531521, %v1667_v50 }
 0x303   : > { %v1857_v21 = vmul.f32 %v1833_v55, %v4536_v46  ;;  %v1858_v53 = vmul.f32 %v1834_v59, %v4558_v61  ;;  %v1187_v55 = vmul.f32 0.5, %v4463_v3  ;;  %v4831_v59 = vld [vmem:[#allocation20_spill] sm:$0xff] }
 0x304   : > { %v1715_v23 = vmul.f32 %v1691_v33, %v1642_v49  ;;  %v4829_v33 = vld [vmem:[#allocation19_spill] sm:$0xff] }
 0x305   : > { %v1977_v41 = vmul.f32 %v2573_v13, %v1857_v21  ;;  %v1978_v24 = vmul.f32 %v2575_v17, %v1858_v53  ;;  %v4832_v53 = vld [vmem:[#allocation21_spill] sm:$0xff] }
 0x306   : > { %v1739_v22 = vadd.f32 1.4214138, %v1715_v23 }
 0x307   : > { %v2001_v4 = vsub.f32 1.0, %v1977_v41  ;;  %v2002_v18 = vsub.f32 1.0, %v1978_v24  ;;  %v2577_v7 = vpop.eup %2576  ;;  %v4828_v41 = vld [vmem:[#allocation17_spill] sm:$0xff] }
 0x308   : > { %v2188_v10 = vpop.f32.mrf.mxu1  ;;  %v1763_v35 = vmul.f32 %v1739_v22, %v1642_v49 }
 0x309   : > { %v2189_v32 = vadd.f32 %v4152_v27, %v2188_v10  ;;  %v2048_v27 = vsub.f32 0.0, %v2000_v39  ;;  %v2049_v0 = vsub.f32 0.0, %v2001_v4  ;;  %v2050_v14 = vsub.f32 0.0, %v2002_v18 }
 0x30a   : > { %v1787_v10 = vadd.f32 -0.28449672, %v1763_v35  ;;  %v4833_v35 = vld [vmem:[#allocation23_spill] sm:$0xff] }
 0x30b   : > { %v2242_v62 = vadd.f32 %v2189_v32, %v4821_v1  ;;  %v2072_v9 = vsel %vm2024_vm7, %v2000_v39, %v2048_v27  ;;  %v2073_v19 = vsel %vm2025_vm11, %v2001_v4, %v2049_v0  ;;  %v2074_v61 = vsel %vm2026_vm12, %v2002_v18, %v2050_v14 }
 0x30c   : > { %v2096_v51 = vadd.f32 1.0, %v2072_v9  ;;  %v2097_v47 = vadd.f32 1.0, %v2073_v19  ;;  %v1811_v42 = vmul.f32 %v1787_v10, %v1642_v49  ;;  %v2098_v32 = vadd.f32 1.0, %v2074_v61 }
 0x30d   : > { %2266 = vst.msk [vmem:[%s4198_s11 + $0x48] sm:$0xff] %vm403_vm0, %v2242_v62  ;;  %v4824_v62 = vld [vmem:[#allocation16_spill] sm:$0xff] }
 0x30e   : > { %v2120_v46 = vmul.f32 %v2096_v51, %v1184_v2  ;;  %v2121_v16 = vmul.f32 %v2097_v47, %v1185_v12  ;;  %v1835_v26 = vadd.f32 0.2548296, %v1811_v42  ;;  %v2122_v54 = vmul.f32 %v2098_v32, %v1186_v29  ;;  %v4827_v2 = vld [vmem:[#allocation15_spill] sm:$0xff] }
 0x310   : > { %v2191_v58 = vpop.f32.mrf.mxu1  ;;  %2220 = vmatmul.f32.gmra.mxu2 %v2120_v46  ;;  %v1859_v43 = vmul.f32 %v1835_v26, %v1642_v49  ;;  %2226 = vmatmul.f32.vlgmr.msrb.gmra.mxu3 %v2122_v54 }
 0x311   : > { %v2192_v6 = vadd.f32 %v4588_v30, %v2191_v58 }
 0x312   : > { %v1979_v1 = vmul.f32 %v2577_v7, %v1859_v43 }
 0x313   : > { %v2243_v38 = vadd.f32 %v2192_v6, %v4822_v37  ;;  %v4830_v37 = vld [vmem:[#allocation22_spill] sm:$0xff] }
 0x314   : > { %v2003_v27 = vsub.f32 1.0, %v1979_v1 }
 0x315   : > { %2267 = vst.msk [vmem:[%s4198_s11 + $0x50] sm:$0xff] %vm403_vm0, %v2243_v38 }
 0x316   : > { %v2051_v15 = vsub.f32 0.0, %v2003_v27 }
 0x318   : > { %v2194_v11 = vpop.f32.mrf.mxu2  ;;  %2223 = vmatmul.f32.gmra.mxu2 %v2121_v16  ;;  %v2075_v57 = vsel %vm2027_vm13, %v2003_v27, %v2051_v15  ;;  %v4834_v16 = vld [vmem:[#allocation24_spill] sm:$0xff] }
 0x319   : > { %v2195_v8 = vadd.f32 %v4588_v30, %v2194_v11  ;;  %v2099_v20 = vadd.f32 1.0, %v2075_v57 }
 0x31b   : > { %v2244_v25 = vadd.f32 %v2195_v8, %v4823_v56  ;;  %v2123_v31 = vmul.f32 %v2099_v20, %v1187_v55 }
 0x31d   : > { %2268 = vst.msk [vmem:[%s4198_s11 + $0x58] sm:$0xff] %vm403_vm0, %v2244_v25  ;;  %2229 = vmatmul.f32.gmra.mxu3 %v2123_v31  ;;  %v4835_v25 = vld [vmem:[#allocation25_spill] sm:$0xff] }
 0x320   : > { %v2197_v39 = vpop.f32.mrf.mxu2 }
 0x321   : > { %v2198_v48 = vadd.f32 %v4588_v30, %v2197_v39 }
 0x323   : > { %v2245_v34 = vadd.f32 %v2198_v48, %v4824_v62 }
 0x325   : > { %2269 = vst.msk [vmem:[%s4198_s11 + $0x60] sm:$0xff] %vm403_vm0, %v2245_v34 }
 0x328   : > { %v2200_v60 = vpop.f32.mrf.mxu2 }
 0x329   : > { %v2201_v13 = vadd.f32 %v4588_v30, %v2200_v60 }
 0x32b   : > { %v2246_v28 = vadd.f32 %v2201_v13, %v4825_v52 }
 0x32d   : > { %2270 = vst.msk [vmem:[%s4198_s11 + $0x68] sm:$0xff] %vm403_vm0, %v2246_v28 }
 0x330   : > { %v2203_v9 = vpop.f32.mrf.mxu2 }
 0x331   : > { %v2204_v21 = vadd.f32 %v4588_v30, %v2203_v9 }
 0x333   : > { %v2247_v5 = vadd.f32 %v2204_v21, %v4826_v36 }
 0x335   : > { %2271 = vst.msk [vmem:[%s4198_s11 + $0x70] sm:$0xff] %vm403_vm0, %v2247_v5 }
 0x338   : > { %v2206_v3 = vpop.f32.mrf.mxu2 }
 0x339   : > { %v2207_v49 = vadd.f32 %v4588_v30, %v2206_v3 }
 0x33b   : > { %v2248_v51 = vadd.f32 %v2207_v49, %v4827_v2 }
 0x33d   : > { %2272 = vst.msk [vmem:[%s4198_s11 + $0x78] sm:$0xff] %vm403_vm0, %v2248_v51 }
 0x340   : > { %v2209_v50 = vpop.f32.mrf.mxu2 }
 0x341   : > { %v2210_v58 = vadd.f32 %v4588_v30, %v2209_v50 }
 0x343   : > { %v2249_v45 = vadd.f32 %v2210_v58, %v4828_v41 }
 0x345   : > { %2273 = vst.msk [vmem:[%s4198_s11 + $0x80] sm:$0xff] %vm403_vm0, %v2249_v45 }
 0x348   : > { %v2212_v6 = vpop.f32.mrf.mxu2 }
 0x349   : > { %v2213_v46 = vadd.f32 %v4588_v30, %v2212_v6 }
 0x34b   : > { %v2250_v44 = vadd.f32 %v2213_v46, %v4829_v33 }
 0x34d   : > { %2274 = vst.msk [vmem:[%s4198_s11 + $0x88] sm:$0xff] %vm403_vm0, %v2250_v44 }
 0x37a   : > { %v2215_v4 = vpop.f32.mrf.mxu2 }
 0x37b   : > { %v2216_v40 = vadd.f32 %v4588_v30, %v2215_v4 }
 0x37d   : > { %v2251_v38 = vadd.f32 %v2216_v40, %v4830_v37 }
 0x37f   : > { %2275 = vst.msk [vmem:[%s4198_s11 + $0x90] sm:$0xff] %vm403_vm0, %v2251_v38 }
 0x383   : > { %v2218_v23 = vpop.f32.mrf.mxu2 }
 0x384   : > { %v2219_v0 = vadd.f32 %v4588_v30, %v2218_v23 }
 0x386   : > { %v2252_v22 = vadd.f32 %v2219_v0, %v4831_v59 }
 0x388   : > { %2276 = vst.msk [vmem:[%s4198_s11 + $0x98] sm:$0xff] %vm403_vm0, %v2252_v22 }
 0x393   : > { %v2221_v63 = vpop.f32.mrf.mxu2  ;;  %v2227_v24 = vpop.f32.mrf.mxu3 }
 0x394   : > { %v2222_v19 = vadd.f32 %v4588_v30, %v2221_v63  ;;  %v2228_v8 = vadd.f32 %v4588_v30, %v2227_v24 }
 0x396   : > { %v2253_v17 = vadd.f32 %v2222_v19, %v4832_v53  ;;  %v2255_v10 = vadd.f32 %v2228_v8, %v4834_v16 }
 0x398   : > { %2277 = vst.msk [vmem:[%s4198_s11 + $0xa0] sm:$0xff] %vm403_vm0, %v2253_v17 }
 0x399   : > { %2279 = vst.msk [vmem:[%s4198_s11 + $0xb0] sm:$0xff] %vm403_vm0, %v2255_v10 }
 0x39b   : > { %v2224_v12 = vpop.f32.mrf.mxu2 }
 0x39c   : > { %v2225_v47 = vadd.f32 %v4588_v30, %v2224_v12 }
 0x39e   : > { %v2254_v11 = vadd.f32 %v2225_v47, %v4833_v35 }
 0x3a0   : > { %2278 = vst.msk [vmem:[%s4198_s11 + $0xa8] sm:$0xff] %vm403_vm0, %v2254_v11  ;;  %v2230_v18 = vpop.f32.mrf.mxu3 }
 0x3a1   : > { %v2231_v56 = vadd.f32 %v4588_v30, %v2230_v18 }
 0x3a3   : > { %v2256_v42 = vadd.f32 %v2231_v56, %v4835_v25 }
 0x3a5   : > { %2280 = vst.msk [vmem:[%s4198_s11 + $0xb8] sm:$0xff] %vm403_vm0, %v2256_v42 }
 0x3a6 PF: > { %s18_s27 = sadd.s32 1, %s2589_s27  }
 0x3a7   : > { %p15_p4 = scmp.ge.s32.totalorder %s18_s27, 4  }
 0x3a9   :  { %17 = sbr.rel (!%p15_p4) target bundleno = 1 (0x1), region = 85 }

// kernel: transformer3d_block.2
= control target key start
LH: loop header
LB: loop body
LE: loop exit
PB: predicated region body
PF: predicated region fallthrough
CT: control target
= control target key end

     0   :  { %s3248_s27 = smov 0   ;;  %s4921_s0 = inlined_call_operand.vmem [shape: f32[384,32], index: 0, kind: input, shape index: {}]   ;;  %s4922_s1 = inlined_call_operand.vmem [shape: bf16[4,4,96,96], index: 1, kind: input, shape index: {}]   ;;  %s4923_s2 = inlined_call_operand.vmem [shape: f32[1,32], index: 2, kind: input, shape index: {}]   ;;  %s4924_s3 = inlined_call_operand.vmem [shape: f32[1,32], index: 3, kind: input, shape index: {}]   ;;  %s4925_s4 = inlined_call_operand.vmem [shape: f32[32,96], index: 4, kind: input, shape index: {}]   ;;  %s4926_s5 = inlined_call_operand.vmem [shape: f32[1,96], index: 5, kind: input, shape index: {}]   ;;  %s4927_s6 = inlined_call_operand.vmem [shape: f32[32,32], index: 6, kind: input, shape index: {}]   ;;  %s4928_s7 = inlined_call_operand.vmem [shape: f32[1,32], index: 7, kind: input, shape index: {}]   ;;  %s4929_s8 = inlined_call_operand.vmem [shape: f32[384,32], index: 8, kind: output, shape index: {}]  }
   0x1 LB: > { %s3254_s28 = sadd.s32 4294967295, %s3198_s27   ;;  %p2553_p0 = scmp.ge.s32.totalorder %s3198_s27, 1  ;;  %s3198_s27 = sphi %s3248_s27, %s18_s27  }
   0x2   : > { %p273_p1 = scmp.lt.s32.totalorder %s3198_s27, 5 }
   0x4   : > { %p274_p2 = pnand %p2553_p0, %p273_p1 }
   0x6   : > { %277 = sbr.rel (%p274_p2) target bundleno = 1724 (0x6bc), region = 52 }
   0xb   : > { %s312_s29 = smul.u32 12, %s3254_s28  ;;  %vm341_vm0 = vcmask 261120   ;;  %v3200_v14 = vmov 32.0   ;;  %s3201_s26 = smov 96  }
   0xc   : > { %2974 = vrcp.f32 %v3200_v14  ;;  %s3202_s9 = smov 64   ;;  %p318_p4 = scmp.lt.s32.totalorder %s3254_s28, 3 }
   0xd   : > { %p313_p3 = scmp.lt.s32.totalorder %s312_s29, 47 }
   0xe   : > { %s4954_s28 = smov (!%p318_p4, %s3254_s28), 3 }
   0xf   : > { %s4952_s29 = smov (!%p313_p3, %s312_s29), 47  ;;  %s2958_s10 = smul.u32 192, %s4954_s28 }
  0x10   : > { %s2554_s30 = sshll.u32 %s4952_s29, 3 }
  0x11   : > { %s3267_s11 = scalar_lea.vmem %s4921_s0, %s2554_s30  ;;  %s4181_s13 = scalar_lea.vmem %s4922_s1, %s2958_s10 }
  0x12   : > { %v334_v0 = vld [vmem:[%s3267_s11 + $0x28] sm:$0xff]  ;;  %v332_v1 = vld [vmem:[%s3267_s11 + $0x18] sm:$0xff]  ;;  %v335_v6 = vld [vmem:[%s3267_s11 + $0x30] sm:$0xff]  ;;  %v2975_v15 = vpop.eup %2974  ;;  %s4892_s25 = scalar_lea.vmem %s4929_s8, %s2554_s30 }
  0x13   : > { %v336_v2 = vld [vmem:[%s3267_s11 + $0x38] sm:$0xff]  ;;  %v357_v3 = vsel %vm341_vm0, %v334_v0, 0.0  ;;  %v351_v4 = vsel %vm341_vm0, %v332_v1, 0.0  ;;  %v333_v7 = vld [vmem:[%s3267_s11 + $0x20] sm:$0xff]  ;;  %v360_v9 = vsel %vm341_vm0, %v335_v6, 0.0  ;;  %v338_v12 = vld [vmem:[%s3267_s11 + $0x48] sm:$0xff]  ;;  %vm383_vm1 = vweird.f32 %v2975_v15 }
  0x14   : > { %v363_v5 = vsel %vm341_vm0, %v336_v2, 0.0  ;;  %358 = vadd.xlane.f32.xlu1 %v357_v3  ;;  %352 = vadd.xlane.f32.xlu0 %v351_v4  ;;  %v337_v8 = vld [vmem:[%s3267_s11 + $0x40] sm:$0xff]  ;;  %v354_v10 = vsel %vm341_vm0, %v333_v7, 0.0  ;;  %v369_v13 = vsel %vm341_vm0, %v338_v12, 0.0  ;;  %v379_v16 = vmul.f32 32.0, %v2975_v15  ;;  %v3305_v39 = vld [vmem:[%s3267_s11 + $0x50] sm:$0xff] }
  0x15   : > { %364 = vadd.xlane.f32.xlu2 %v363_v5  ;;  %v366_v11 = vsel %vm341_vm0, %v337_v8, 0.0  ;;  %v372_v43 = vsel %vm341_vm0, %v3305_v39, 0.0  ;;  %v3324_v52 = vld [vmem:[%s3267_s11 + $0x58] sm:$0xff]  ;;  %v3337_v59 = vld [vmem:[%s3267_s11 + $0x10] sm:$0xff]  ;;  %v3340_v60 = vld [vmem:[%s3267_s11] sm:$0xff] }
  0x16   : > { %v380_v17 = vsub.f32 1.0, %v379_v16  ;;  %v375_v56 = vsel %vm341_vm0, %v3324_v52, 0.0  ;;  %v348_v61 = vsel %vm341_vm0, %v3337_v59, 0.0  ;;  %v342_v62 = vsel %vm341_vm0, %v3340_v60, 0.0  ;;  %v647_v3 = vld [vmem:[%s4925_s4 + $0x10] sm:$0xff]  ;;  %v646_v4 = vld [vmem:[%s4925_s4 + $0x8] sm:$0xff] }
  0x17   : > { %v645_v5 = vld [vmem:[%s4925_s4] sm:$0xff] }
  0x18   : > { %v381_v18 = vmul.f32 %v2975_v15, %v380_v17 }
  0x1a   : > { %v382_v19 = vadd.f32 %v2975_v15, %v381_v18 }
  0x1c   : > { %361 = vadd.xlane.f32.xlu1 %v360_v9  ;;  %355 = vadd.xlane.f32.xlu0 %v354_v10  ;;  %v3283_v20 = vsel %vm383_vm1, %v2975_v15, %v382_v19 }
  0x1d   : > { %367 = vadd.xlane.f32.xlu2 %v366_v11 }
  0x24   : > { %370 = vadd.xlane.f32.xlu1 %v369_v13 }
  0x87   : > { %v359_v21 = vpop.xlane.xlu1 %358  ;;  %v353_v22 = vpop.xlane.xlu0 %352 }
  0x88   : > { %v390_v23 = vmul.f32 %v3283_v20, %v359_v21  ;;  %v388_v24 = vmul.f32 %v3283_v20, %v353_v22  ;;  %v365_v25 = vpop.xlane.xlu2 %364 }
  0x89   : > { %v392_v26 = vmul.f32 %v3283_v20, %v365_v25 }
  0x8a   : > { %v3288_v27 = vsub.f32 %v334_v0, %v390_v23  ;;  %v3290_v28 = vsub.f32 %v332_v1, %v388_v24  ;;  %v3348_v0 = vld [vmem:[%s3267_s11 + $0x8] sm:$0xff] }
  0x8b   : > { %v3292_v29 = vsub.f32 %v336_v2, %v392_v26  ;;  %v345_v1 = vsel %vm341_vm0, %v3348_v0, 0.0  ;;  %v648_v2 = vld [vmem:[%s4925_s4 + $0x18] sm:$0xff] }
  0x8c   : > { %v414_v30 = vmul.f32 %v3288_v27, %v3288_v27  ;;  %v412_v31 = vmul.f32 %v3290_v28, %v3290_v28  ;;  %2930 = vmatpush.msra.mxu3 %v648_v2  ;;  %701 = vmatpush.msra.mxu0 %v648_v2  ;;  %v3408_v2 = vld [vmem:[%s4924_s3] ss:$0 sm:$0xff] }
  0x8d   : > { %v416_v38 = vmul.f32 %v3292_v29, %v3292_v29 }
  0x8e   : > { %v436_v32 = vsel %vm341_vm0, %v414_v30, 0.0  ;;  %v430_v33 = vsel %vm341_vm0, %v412_v31, 0.0  ;;  %2931 = vmatpush.msra.mxu3 %v647_v3  ;;  %702 = vmatpush.msra.mxu0 %v647_v3 }
  0x8f   : > { %437 = vadd.xlane.f32.xlu1 %v436_v32  ;;  %v362_v34 = vpop.xlane.xlu1 %361  ;;  %431 = vadd.xlane.f32.xlu0 %v430_v33  ;;  %v356_v35 = vpop.xlane.xlu0 %355  ;;  %v442_v42 = vsel %vm341_vm0, %v416_v38, 0.0 }
  0x90   : > { %v391_v36 = vmul.f32 %v3283_v20, %v362_v34  ;;  %v389_v37 = vmul.f32 %v3283_v20, %v356_v35  ;;  %v368_v46 = vpop.xlane.xlu2 %367  ;;  %2932 = vmatpush.msra.mxu3 %v646_v4  ;;  %703 = vmatpush.msra.mxu0 %v646_v4 }
  0x91   : > { %v393_v50 = vmul.f32 %v3283_v20, %v368_v46 }
  0x92   : > { %v3307_v40 = vsub.f32 %v333_v7, %v389_v37  ;;  %v3309_v41 = vsub.f32 %v335_v6, %v391_v36  ;;  %2933 = vmatpush.msra.mxu3 %v645_v5  ;;  %704 = vmatpush.msra.mxu0 %v645_v5 }
  0x93   : > { %v3329_v55 = vsub.f32 %v337_v8, %v393_v50 }
  0x94   : > { %v413_v44 = vmul.f32 %v3307_v40, %v3307_v40  ;;  %v415_v49 = vmul.f32 %v3309_v41, %v3309_v41 }
  0x95   : > { %v417_v58 = vmul.f32 %v3329_v55, %v3329_v55 }
  0x96   : > { %v433_v45 = vsel %vm341_vm0, %v413_v44, 0.0  ;;  %v439_v54 = vsel %vm341_vm0, %v415_v49, 0.0 }
  0x97   : > { %443 = vadd.xlane.f32.xlu1 %v442_v42  ;;  %v371_v47 = vpop.xlane.xlu1 %370  ;;  %373 = vadd.xlane.f32.xlu0 %v372_v43  ;;  %v445_v63 = vsel %vm341_vm0, %v417_v58, 0.0 }
  0x98   : > { %v394_v48 = vmul.f32 %v3283_v20, %v371_v47  ;;  %434 = vadd.xlane.f32.xlu2 %v433_v45 }
  0x9a   : > { %v3321_v51 = vsub.f32 %v338_v12, %v394_v48  ;;  %v3397_v48 = vld [vmem:[%s4923_s2] ss:$0 sm:$0xff] }
  0x9c   : > { %v418_v53 = vmul.f32 %v3321_v51, %v3321_v51 }
  0x9e   : > { %v448_v57 = vsel %vm341_vm0, %v418_v53, 0.0 }
  0x9f   : > { %449 = vadd.xlane.f32.xlu1 %v448_v57  ;;  %440 = vadd.xlane.f32.xlu0 %v439_v54 }
  0xa0   : > { %376 = vadd.xlane.f32.xlu2 %v375_v56 }
  0xa7   : > { %349 = vadd.xlane.f32.xlu1 %v348_v61  ;;  %343 = vadd.xlane.f32.xlu0 %v342_v62 }
  0xa8   : > { %446 = vadd.xlane.f32.xlu2 %v445_v63 }
  0xb0   : > { %346 = vadd.xlane.f32.xlu2 %v345_v1 }
 0x102   : > { %v438_v6 = vpop.xlane.xlu1 %437  ;;  %v432_v7 = vpop.xlane.xlu0 %431 }
 0x103   : > { %v462_v8 = vmul.f32 %v438_v6, %v3283_v20  ;;  %v460_v9 = vmul.f32 %v432_v7, %v3283_v20 }
 0x105   : > { %v3366_v10 = vadd.f32 1e-05, %v462_v8  ;;  %v472_v11 = vadd.f32 1e-05, %v460_v9 }
 0x107   : > { %2976 = vrsqrt.f32 %v3366_v10  ;;  %vm517_vm3 = vweird.f32 %v472_v11  ;;  %vm537_vm5 = vweird.f32 %v3366_v10 }
 0x108   : > { %2978 = vrsqrt.f32 %v472_v11 }
 0x10a   : > { %v444_v12 = vpop.xlane.xlu1 %443  ;;  %v374_v13 = vpop.xlane.xlu0 %373 }
 0x10b   : > { %v435_v14 = vpop.xlane.xlu2 %434  ;;  %v395_v15 = vmul.f32 %v3283_v20, %v374_v13  ;;  %v464_v24 = vmul.f32 %v444_v12, %v3283_v20 }
 0x10c   : > { %v461_v16 = vmul.f32 %v435_v14, %v3283_v20 }
 0x10d   : > { %v3371_v17 = vpop.eup %2976  ;;  %v3374_v18 = vsub.f32 %v3305_v39, %v395_v15  ;;  %v3383_v35 = vadd.f32 1e-05, %v464_v24 }
 0x10e   : > { %v2979_v19 = vpop.eup %2978  ;;  %v532_v21 = vmul.f32 %v3371_v17, %v3366_v10  ;;  %v473_v22 = vadd.f32 1e-05, %v461_v16  ;;  %vm538_vm6 = vweird.f32 %v3371_v17 }
 0x10f   : > { %v512_v23 = vmul.f32 %v2979_v19, %v472_v11  ;;  %v419_v25 = vmul.f32 %v3374_v18, %v3374_v18  ;;  %vm518_vm2 = vweird.f32 %v2979_v19  ;;  %vm3428_vm9 = vmor %vm537_vm5, %vm538_vm6  ;;  %vm557_vm14 = vweird.f32 %v3383_v35 }
 0x110   : > { %2980 = vrsqrt.f32 %v473_v22  ;;  %v533_v30 = vmul.f32 %v3371_v17, %v532_v21  ;;  %vm519_vm4 = vmor %vm517_vm3, %vm518_vm2  ;;  %vm527_vm8 = vweird.f32 %v473_v22 }
 0x111   : > { %v513_v26 = vmul.f32 %v2979_v19, %v512_v23  ;;  %v451_v33 = vsel %vm341_vm0, %v419_v25, 0.0  ;;  %2982 = vrsqrt.f32 %v3383_v35 }
 0x112   : > { %v450_v31 = vpop.xlane.xlu1 %449  ;;  %v441_v32 = vpop.xlane.xlu0 %440  ;;  %452 = vadd.xlane.f32.xlu0 %v451_v33  ;;  %v534_v44 = vmul.f32 0.5, %v533_v30 }
 0x113   : > { %v514_v34 = vmul.f32 0.5, %v513_v26  ;;  %v377_v36 = vpop.xlane.xlu2 %376  ;;  %v463_v37 = vmul.f32 %v441_v32, %v3283_v20  ;;  %v466_v9 = vmul.f32 %v450_v31, %v3283_v20 }
 0x114   : > { %v396_v38 = vmul.f32 %v3283_v20, %v377_v36 }
 0x115   : > { %v515_v39 = vsub.f32 1.5, %v514_v34  ;;  %v3387_v42 = vadd.f32 1e-05, %v463_v37 }
 0x116   : > { %v2981_v43 = vpop.eup %2980  ;;  %v3390_v45 = vsub.f32 %v3324_v52, %v396_v38  ;;  %v535_v52 = vsub.f32 1.5, %v534_v44 }
 0x117   : > { %v516_v46 = vmul.f32 %v2979_v19, %v515_v39  ;;  %v522_v47 = vmul.f32 %v2981_v43, %v473_v22  ;;  %2984 = vrsqrt.f32 %v3387_v42  ;;  %v3414_v4 = vpop.eup %2982  ;;  %vm528_vm7 = vweird.f32 %v2981_v43 }
 0x118   : > { %v420_v53 = vmul.f32 %v3390_v45, %v3390_v45  ;;  %v536_v12 = vmul.f32 %v3371_v17, %v535_v52  ;;  %v552_v15 = vmul.f32 %v3414_v4, %v3383_v35  ;;  %vm529_vm10 = vmor %vm527_vm8, %vm528_vm7  ;;  %v478_v22 = vadd.f32 1e-05, %v466_v9 }
 0x119   : > { %v520_v49 = vsel %vm519_vm4, %v2979_v19, %v516_v46  ;;  %v523_v50 = vmul.f32 %v2981_v43, %v522_v47  ;;  %vm547_vm11 = vweird.f32 %v3387_v42  ;;  %vm558_vm15 = vweird.f32 %v3414_v4 }
 0x11a   : > { %v350_v54 = vpop.xlane.xlu1 %349  ;;  %v344_v56 = vpop.xlane.xlu0 %343  ;;  %v604_v57 = vmul.f32 %v520_v49, %v3290_v28  ;;  %v454_v63 = vsel %vm341_vm0, %v420_v53, 0.0  ;;  %v540_v24 = vsel %vm3428_vm9, %v3371_v17, %v536_v12  ;;  %v553_v32 = vmul.f32 %v3414_v4, %v552_v15  ;;  %vm559_vm1 = vmor %vm557_vm14, %vm558_vm15 }
 0x11b   : > { %v524_v58 = vmul.f32 0.5, %v523_v50  ;;  %v447_v61 = vpop.xlane.xlu2 %446  ;;  %v387_v62 = vmul.f32 %v3283_v20, %v350_v54  ;;  %v385_v1 = vmul.f32 %v3283_v20, %v344_v56  ;;  %455 = vadd.xlane.f32.xlu2 %v454_v63  ;;  %v606_v38 = vmul.f32 %v540_v24, %v3288_v27 }
 0x11c   : > { %v465_v3 = vmul.f32 %v447_v61, %v3283_v20  ;;  %v620_v28 = vmul.f32 %v3397_v48, %v604_v57  ;;  %v554_v39 = vmul.f32 0.5, %v553_v32  ;;  %vm577_vm5 = vweird.f32 %v478_v22 }
 0x11d   : > { %v525_v5 = vsub.f32 1.5, %v524_v58  ;;  %v3417_v6 = vsub.f32 %v3337_v59, %v387_v62  ;;  %v3420_v7 = vsub.f32 %v3340_v60, %v385_v1  ;;  %v2985_v8 = vpop.eup %2984 }
 0x11e   : > { %v3423_v11 = vadd.f32 1e-05, %v465_v3  ;;  %v542_v59 = vmul.f32 %v2985_v8, %v3387_v42  ;;  %v636_v60 = vadd.f32 %v3408_v2, %v620_v28  ;;  %vm548_vm12 = vweird.f32 %v2985_v8 }
 0x11f   : > { %v526_v14 = vmul.f32 %v2981_v43, %v525_v5  ;;  %v411_v10 = vmul.f32 %v3417_v6, %v3417_v6  ;;  %v409_v21 = vmul.f32 %v3420_v7, %v3420_v7  ;;  %vm549_vm13 = vmor %vm547_vm11, %vm548_vm12  ;;  %v555_v47 = vsub.f32 1.5, %v554_v39 }
 0x120   : > { %2986 = vrsqrt.f32 %v3423_v11  ;;  %v543_v19 = vmul.f32 %v2985_v8, %v542_v59  ;;  %2560 = vmatmul.msk.f32.vlgmr.msra.gmra.mxu3 %vm341_vm0, %v636_v60  ;;  %vm567_vm2 = vweird.f32 %v3423_v11 }
 0x121   : > { %v530_v16 = vsel %vm529_vm10, %v2981_v43, %v526_v14  ;;  %v427_v26 = vsel %vm341_vm0, %v411_v10, 0.0  ;;  %v421_v31 = vsel %vm341_vm0, %v409_v21, 0.0  ;;  %2988 = vrsqrt.f32 %v478_v22 }
 0x122   : > { %v605_v23 = vmul.f32 %v530_v16, %v3307_v40  ;;  %v544_v25 = vmul.f32 0.5, %v543_v19  ;;  %422 = vadd.xlane.f32.xlu0 %v421_v31  ;;  %v556_v54 = vmul.f32 %v3414_v4, %v555_v47 }
 0x123   : > { %v347_v30 = vpop.xlane.xlu2 %346  ;;  %428 = vadd.xlane.f32.xlu2 %v427_v26 }
 0x124   : > { %v386_v33 = vmul.f32 %v3283_v20, %v347_v30  ;;  %v621_v34 = vmul.f32 %v3397_v48, %v605_v23  ;;  %v545_v36 = vsub.f32 1.5, %v544_v25  ;;  %v560_v61 = vsel %vm559_vm1, %v3414_v4, %v556_v54 }
 0x126   : > { %v2987_v40 = vpop.eup %2986  ;;  %v3453_v17 = vsub.f32 %v3348_v0, %v386_v33  ;;  %v637_v37 = vadd.f32 %v3408_v2, %v621_v34  ;;  %v546_v43 = vmul.f32 %v2985_v8, %v545_v36  ;;  %v622_v0 = vmul.f32 %v3397_v48, %v606_v38 }
 0x127   : > { %v562_v44 = vmul.f32 %v2987_v40, %v3423_v11  ;;  %v2989_v53 = vpop.eup %2988  ;;  %vm568_vm3 = vweird.f32 %v2987_v40 }
 0x128   : > { %v410_v46 = vmul.f32 %v3453_v17, %v3453_v17  ;;  %2561 = vmatmul.msk.f32.gmra.mxu3 %vm341_vm0, %v637_v37  ;;  %v550_v49 = vsel %vm549_vm13, %v2985_v8, %v546_v43  ;;  %v638_v27 = vadd.f32 %v3408_v2, %v622_v0  ;;  %v572_v56 = vmul.f32 %v2989_v53, %v478_v22  ;;  %vm569_vm4 = vmor %vm567_vm2, %vm568_vm3 }
 0x129   : > { %v563_v50 = vmul.f32 %v2987_v40, %v562_v44  ;;  %v607_v52 = vmul.f32 %v550_v49, %v3309_v41  ;;  %v608_v41 = vmul.f32 %v560_v61, %v3292_v29  ;;  %vm578_vm6 = vweird.f32 %v2989_v53 }
 0x12a   : > { %v424_v42 = vsel %vm341_vm0, %v410_v46, 0.0  ;;  %v573_v62 = vmul.f32 %v2989_v53, %v572_v56  ;;  %vm579_vm7 = vmor %vm577_vm5, %vm578_vm6 }
 0x12b   : > { %425 = vadd.xlane.f32.xlu1 %v424_v42  ;;  %v564_v57 = vmul.f32 0.5, %v563_v50  ;;  %v623_v58 = vmul.f32 %v3397_v48, %v607_v52  ;;  %v624_v28 = vmul.f32 %v3397_v48, %v608_v41 }
 0x12c   : > { %v574_v1 = vmul.f32 0.5, %v573_v62 }
 0x12d   : > { %v565_v63 = vsub.f32 1.5, %v564_v57  ;;  %v639_v35 = vadd.f32 %v3408_v2, %v623_v58  ;;  %v640_v4 = vadd.f32 %v3408_v2, %v624_v28 }
 0x12e   : > { %v575_v5 = vsub.f32 1.5, %v574_v1 }
 0x12f   : > { %v566_v3 = vmul.f32 %v2987_v40, %v565_v63 }
 0x130   : > { %2562 = vmatmul.msk.f32.gmra.mxu3 %vm341_vm0, %v638_v27  ;;  %v576_v11 = vmul.f32 %v2989_v53, %v575_v5 }
 0x131   : > { %v570_v8 = vsel %vm569_vm4, %v2987_v40, %v566_v3 }
 0x132   : > { %v609_v9 = vmul.f32 %v570_v8, %v3329_v55  ;;  %v580_v12 = vsel %vm579_vm7, %v2989_v53, %v576_v11 }
 0x133   : > { %v610_v14 = vmul.f32 %v580_v12, %v3321_v51 }
 0x134   : > { %v625_v29 = vmul.f32 %v3397_v48, %v609_v9 }
 0x135   : > { %v626_v59 = vmul.f32 %v3397_v48, %v610_v14 }
 0x136   : > { %v641_v13 = vadd.f32 %v3408_v2, %v625_v29 }
 0x137   : > { %v642_v60 = vadd.f32 %v3408_v2, %v626_v59 }
 0x138   : > { %2563 = vmatmul.msk.f32.gmra.mxu3 %vm341_vm0, %v639_v35 }
 0x140   : > { %2564 = vmatmul.msk.f32.gmra.mxu3 %vm341_vm0, %v640_v4 }
 0x148   : > { %2565 = vmatmul.msk.f32.gmra.mxu3 %vm341_vm0, %v641_v13 }
 0x150   : > { %2566 = vmatmul.msk.f32.gmra.mxu3 %vm341_vm0, %v642_v60 }
 0x185   : > { %v453_v55 = vpop.xlane.xlu0 %452 }
 0x186   : > { %v467_v15 = vmul.f32 %v453_v55, %v3283_v20 }
 0x188   : > { %v479_v16 = vadd.f32 1e-05, %v467_v15 }
 0x18a   : > { %2990 = vrsqrt.f32 %v479_v16  ;;  %vm587_vm9 = vweird.f32 %v479_v16 }
 0x18e   : > { %v456_v19 = vpop.xlane.xlu2 %455 }
 0x18f   : > { %v468_v10 = vmul.f32 %v456_v19, %v3283_v20 }
 0x190   : > { %v2991_v21 = vpop.eup %2990 }
 0x191   : > { %v582_v22 = vmul.f32 %v2991_v21, %v479_v16  ;;  %v480_v23 = vadd.f32 1e-05, %v468_v10  ;;  %vm588_vm8 = vweird.f32 %v2991_v21 }
 0x192   : > { %vm589_vm10 = vmor %vm587_vm9, %vm588_vm8 }
 0x193   : > { %v583_v51 = vmul.f32 %v2991_v21, %v582_v22  ;;  %2992 = vrsqrt.f32 %v480_v23  ;;  %vm597_vm12 = vweird.f32 %v480_v23 }
 0x195   : > { %v584_v24 = vmul.f32 0.5, %v583_v51  ;;  %v423_v26 = vpop.xlane.xlu0 %422 }
 0x196   : > { %v429_v25 = vpop.xlane.xlu2 %428  ;;  %v457_v32 = vmul.f32 %v423_v26, %v3283_v20 }
 0x197   : > { %v585_v30 = vsub.f32 1.5, %v584_v24  ;;  %v459_v31 = vmul.f32 %v429_v25, %v3283_v20 }
 0x198   : > { %v469_v40 = vadd.f32 1e-05, %v457_v32 }
 0x199   : > { %v2993_v33 = vpop.eup %2992  ;;  %v586_v34 = vmul.f32 %v2991_v21, %v585_v30  ;;  %v471_v36 = vadd.f32 1e-05, %v459_v31 }
 0x19a   : > { %v592_v37 = vmul.f32 %v2993_v33, %v480_v23  ;;  %vm598_vm11 = vweird.f32 %v2993_v33  ;;  %vm487_vm14 = vweird.f32 %v469_v40 }
 0x19b   : > { %v590_v38 = vsel %vm589_vm10, %v2991_v21, %v586_v34  ;;  %2994 = vrsqrt.f32 %v471_v36  ;;  %vm599_vm13 = vmor %vm597_vm12, %vm598_vm11  ;;  %vm507_vm5 = vweird.f32 %v471_v36 }
 0x19c   : > { %v593_v39 = vmul.f32 %v2993_v33, %v592_v37  ;;  %2996 = vrsqrt.f32 %v469_v40  ;;  %v611_v43 = vmul.f32 %v590_v38, %v3374_v18 }
 0x19e   : > { %v426_v44 = vpop.xlane.xlu1 %425  ;;  %v594_v46 = vmul.f32 0.5, %v593_v39  ;;  %v627_v0 = vmul.f32 %v3397_v48, %v611_v43 }
 0x19f   : > { %v458_v42 = vmul.f32 %v426_v44, %v3283_v20 }
 0x1a0   : > { %v595_v47 = vsub.f32 1.5, %v594_v46  ;;  %v643_v50 = vadd.f32 %v3408_v2, %v627_v0 }
 0x1a1   : > { %v470_v49 = vadd.f32 1e-05, %v458_v42  ;;  %v2995_v53 = vpop.eup %2994 }
 0x1a2   : > { %v2997_v27 = vpop.eup %2996  ;;  %v596_v52 = vmul.f32 %v2993_v33, %v595_v47  ;;  %2567 = vmatmul.msk.f32.gmra.mxu3 %vm341_vm0, %v643_v50  ;;  %v502_v18 = vmul.f32 %v2995_v53, %v471_v36  ;;  %vm508_vm6 = vweird.f32 %v2995_v53 }
 0x1a3   : > { %2998 = vrsqrt.f32 %v470_v49  ;;  %v482_v54 = vmul.f32 %v2997_v27, %v469_v40  ;;  %v3495_v56 = vpop.f32.mrf.mxu3  ;;  %vm488_vm15 = vweird.f32 %v2997_v27  ;;  %vm497_vm2 = vweird.f32 %v470_v49  ;;  %vm509_vm7 = vmor %vm507_vm5, %vm508_vm6 }
 0x1a4   : > { %v600_v20 = vsel %vm599_vm13, %v2993_v33, %v596_v52  ;;  %v503_v61 = vmul.f32 %v2995_v53, %v502_v18  ;;  %vm489_vm1 = vmor %vm487_vm14, %vm488_vm15 }
 0x1a5   : > { %v483_v57 = vmul.f32 %v2997_v27, %v482_v54  ;;  %v612_v58 = vmul.f32 %v600_v20, %v3390_v45 }
 0x1a6   : > { %v504_v28 = vmul.f32 0.5, %v503_v61 }
 0x1a7   : > { %v484_v62 = vmul.f32 0.5, %v483_v57  ;;  %v628_v63 = vmul.f32 %v3397_v48, %v612_v58 }
 0x1a8   : > { %v505_v29 = vsub.f32 1.5, %v504_v28 }
 0x1a9   : > { %v2999_v35 = vpop.eup %2998  ;;  %v485_v41 = vsub.f32 1.5, %v484_v62  ;;  %v644_v3 = vadd.f32 %v3408_v2, %v628_v63 }
 0x1aa   : > { %v492_v1 = vmul.f32 %v2999_v35, %v470_v49  ;;  %vm498_vm3 = vweird.f32 %v2999_v35  ;;  %v506_v60 = vmul.f32 %v2995_v53, %v505_v29 }
 0x1ab   : > { %v486_v5 = vmul.f32 %v2997_v27, %v485_v41  ;;  %v718_v4 = vpop.f32.mrf.mxu3  ;;  %2568 = vmatmul.msk.f32.gmra.mxu3 %vm341_vm0, %v644_v3  ;;  %vm499_vm4 = vmor %vm497_vm2, %vm498_vm3  ;;  %vm1016_vm3 = vcmask 785408  }
 0x1ac   : > { %v493_v8 = vmul.f32 %v2999_v35, %v492_v1  ;;  %v510_v19 = vsel %vm509_vm7, %v2995_v53, %v506_v60 }
 0x1ad   : > { %v490_v9 = vsel %vm489_vm1, %v2997_v27, %v486_v5  ;;  %v603_v21 = vmul.f32 %v510_v19, %v3417_v6 }
 0x1ae   : > { %v494_v45 = vmul.f32 0.5, %v493_v8  ;;  %v601_v11 = vmul.f32 %v490_v9, %v3420_v7 }
 0x1af   : > { %v619_v23 = vmul.f32 %v3397_v48, %v603_v21 }
 0x1b0   : > { %v495_v12 = vsub.f32 1.5, %v494_v45  ;;  %v617_v13 = vmul.f32 %v3397_v48, %v601_v11 }
 0x1b1   : > { %v635_v51 = vadd.f32 %v3408_v2, %v619_v23 }
 0x1b2   : > { %v496_v14 = vmul.f32 %v2999_v35, %v495_v12  ;;  %v633_v59 = vadd.f32 %v3408_v2, %v617_v13 }
 0x1b3   : > { %v721_v15 = vpop.f32.mrf.mxu3 }
 0x1b4   : > { %v500_v55 = vsel %vm499_vm4, %v2999_v35, %v496_v14  ;;  %2557 = vmatmul.msk.f32.vlgmr.msra.gmra.mxu0 %vm341_vm0, %v633_v59 }
 0x1b5   : > { %v602_v16 = vmul.f32 %v500_v55, %v3453_v17  ;;  %v2972_v17 = vld [vmem:[%s4926_s5] ss:$0 sm:$0xff] }
 0x1b6   : > { %v3554_v44 = vadd.f32 %v2972_v17, %v3495_v56  ;;  %v3573_v53 = vadd.f32 %v2972_v17, %v721_v15 }
 0x1b7   : > { %v618_v7 = vmul.f32 %v3397_v48, %v602_v16  ;;  %v3524_v48 = vadd.f32 %v2972_v17, %v718_v4 }
 0x1b9   : > { %v634_v10 = vadd.f32 %v3408_v2, %v618_v7  ;;  %v754_v2 = vlaneseq }
 0x1bb   : > { %v724_v22 = vpop.f32.mrf.mxu3  ;;  %v3532_v33 = vand.u32 127, %v754_v2 }
 0x1bc   : > { %2558 = vmatmul.msk.f32.gmra.mxu0 %vm341_vm0, %v634_v10  ;;  %v3536_v34 = vadd.f32 %v2972_v17, %v724_v22 }
 0x1bd   : > { %vm1624_vm8 = vcmp.ge.s32.totalorder %v3532_v33, 16  ;;  %vm1625_vm9 = vcmp.lt.s32.totalorder %v3532_v33, 24  ;;  %vm1250_vm11 = vcmp.ge.s32.totalorder %v3532_v33, 8  ;;  %vm1251_vm12 = vcmp.lt.s32.totalorder %v3532_v33, 16 }
 0x1be   : > { %vm3540_vm10 = vmand %vm1624_vm8, %vm1625_vm9  ;;  %vm757_vm13 = vcmp.lt.s32.totalorder %v3532_v33, 8  ;;  %vm1998_vm15 = vcmp.ge.s32.totalorder %v3532_v33, 24  ;;  %vm1999_vm1 = vcmp.lt.s32.totalorder %v3532_v33, 32  ;;  %v3954_v33 = vmul.f32 0.35355338, %v3554_v44 }
 0x1bf   : > { %vm3614_vm14 = vmand %vm1250_vm11, %vm1251_vm12 }
 0x1c0   : > { %vm3779_vm2 = vmand %vm1998_vm15, %vm1999_vm1 }
 0x1c3   : > { %v727_v24 = vpop.f32.mrf.mxu3 }
 0x1c4   : > { %2559 = vmatmul.msk.f32.gmra.mxu0 %vm341_vm0, %v635_v51  ;;  %v3520_v6 = vadd.f32 %v2972_v17, %v727_v24 }
 0x1cb   : > { %v730_v25 = vpop.f32.mrf.mxu3 }
 0x1cc   : > { %v3556_v46 = vadd.f32 %v2972_v17, %v730_v25 }
 0x1d3   : > { %v733_v26 = vpop.f32.mrf.mxu3 }
 0x1d4   : > { %v3516_v30 = vadd.f32 %v2972_v17, %v733_v26 }
 0x1d6   : > { %789 = vrot.lane.b32.xlu2 %v3516_v30, %s3201_s26 }
 0x1de   : > { %785 = vrot.lane.b32.xlu2 %v3520_v6, %s3201_s26 }
 0x1e6   : > { %779 = vrot.lane.b32.xlu2 %v3524_v48, %s3201_s26 }
 0x225   : > { %v736_v31 = vpop.f32.mrf.mxu3 }
 0x226   : > { %v3528_v32 = vadd.f32 %v2972_v17, %v736_v31 }
 0x228   : > { %791 = vrot.lane.b32.xlu1 %v3528_v32, %s3201_s26  ;;  %v4133_v37 = vmul.f32 0.35355338, %v3528_v32 }
 0x22a   : > { %4942 = vst [vmem:[#allocation3_spill] sm:$0xff] %v4133_v37 }
 0x22e   : > { %v739_v36 = vpop.f32.mrf.mxu3 }
 0x22f   : > { %v3538_v40 = vadd.f32 %v2972_v17, %v739_v36 }
 0x230   : > { %v3544_v38 = vpop.permute.xlu2 %789  ;;  %783 = vrot.lane.b32.xlu1 %v3536_v34, %s3201_s26 }
 0x231   : > { %v706_v39 = vpop.f32.mrf.mxu0  ;;  %793 = vrot.lane.b32.xlu0 %v3538_v40, %s3201_s26  ;;  %v1636_v43 = vsel %vm3540_vm10, %v3544_v38, 0.0  ;;  %v816_v9 = vsel %vm757_vm13, %v3544_v38, 0.0  ;;  %v1262_v45 = vsel %vm3614_vm14, %v3544_v38, 0.0 }
 0x232   : > { %v3571_v50 = vadd.f32 %v2972_v17, %v706_v39 }
 0x238   : > { %v3558_v42 = vpop.permute.xlu2 %785  ;;  %777 = vrot.lane.b32.xlu1 %v3554_v44, %s3201_s26 }
 0x239   : > { %v709_v0 = vpop.f32.mrf.mxu0  ;;  %787 = vrot.lane.b32.xlu0 %v3556_v46, %s3201_s26  ;;  %v1634_v47 = vsel %vm3540_vm10, %v3558_v42, 0.0  ;;  %v814_v60 = vsel %vm757_vm13, %v3558_v42, 0.0  ;;  %v1260_v55 = vsel %vm3614_vm14, %v3558_v42, 0.0 }
 0x23a   : > { %v3567_v49 = vadd.f32 %v2972_v17, %v709_v0 }
 0x23c   : > { %773 = vrot.lane.b32.xlu2 %v3567_v49, %s3201_s26 }
 0x240   : > { %771 = vrot.lane.b32.xlu1 %v3571_v50, %s3201_s26  ;;  %v3595_v18 = vpop.permute.xlu2 %779 }
 0x241   : > { %781 = vrot.lane.b32.xlu0 %v3573_v53, %s3201_s26  ;;  %v712_v27 = vpop.f32.mrf.mxu0  ;;  %v811_v24 = vsel %vm757_vm13, %v3595_v18, 0.0  ;;  %v1257_v25 = vsel %vm3614_vm14, %v3595_v18, 0.0 }
 0x242   : > { %v3580_v52 = vadd.f32 %v2972_v17, %v712_v27 }
 0x244   : > { %839 = vrot.lane.b32.xlu2 %v3528_v32, %s3202_s9 }
 0x248   : > { %837 = vrot.lane.b32.xlu1 %v3516_v30, %s3202_s9 }
 0x249   : > { %775 = vrot.lane.b32.xlu0 %v3580_v52, %s3201_s26 }
 0x24c   : > { %833 = vrot.lane.b32.xlu2 %v3520_v6, %s3202_s9 }
 0x250   : > { %831 = vrot.lane.b32.xlu1 %v3536_v34, %s3202_s9 }
 0x251   : > { %835 = vrot.lane.b32.xlu0 %v3556_v46, %s3202_s9 }
 0x254   : > { %829 = vrot.lane.b32.xlu2 %v3573_v53, %s3202_s9 }
 0x258   : > { %827 = vrot.lane.b32.xlu1 %v3524_v48, %s3202_s9 }
 0x259   : > { %841 = vrot.lane.b32.xlu0 %v3538_v40, %s3202_s9 }
 0x25c   : > { %825 = vrot.lane.b32.xlu2 %v3554_v44, %s3202_s9  ;;  %v2005_v44 = vsel %vm3779_vm2, %v3595_v18, 0.0 }
 0x260   : > { %823 = vrot.lane.b32.xlu1 %v3580_v52, %s3202_s9 }
 0x268   : > { %821 = vrot.lane.b32.xlu1 %v3567_v49, %s3202_s9 }
 0x270   : > { %819 = vrot.lane.b32.xlu1 %v3571_v50, %s3202_s9 }
 0x296   : > { %v3597_v54 = vpop.permute.xlu2 %773 }
 0x297   : > { %v1628_v56 = vsel %vm3540_vm10, %v3597_v54, 0.0 }
 0x29a   : > { %v3602_v20 = vpop.permute.xlu1 %791 }
 0x29b   : > { %v1637_v57 = vsel %vm3540_vm10, %v3602_v20, 0.0  ;;  %v817_v3 = vsel %vm757_vm13, %v3602_v20, 0.0  ;;  %v1263_v28 = vsel %vm3614_vm14, %v3602_v20, 0.0 }
 0x29e   : > { %v3707_v51 = vpop.permute.xlu2 %839 }
 0x2a2   : > { %v3609_v58 = vpop.permute.xlu1 %783 }
 0x2a3   : > { %v3611_v61 = vpop.permute.xlu0 %793  ;;  %v1633_v63 = vsel %vm3540_vm10, %v3609_v58, 0.0  ;;  %v813_v16 = vsel %vm757_vm13, %v3609_v58, 0.0  ;;  %v1259_v7 = vsel %vm3614_vm14, %v3609_v58, 0.0 }
 0x2a4   : > { %v818_v35 = vsel %vm757_vm13, %v3611_v61, 0.0  ;;  %v1264_v41 = vsel %vm3614_vm14, %v3611_v61, 0.0  ;;  %v1638_v1 = vsel %vm3540_vm10, %v3611_v61, 0.0 }
 0x2a5   : > { %2569 = vmatpush.xpose.msk.msra.mxu1 %vm341_vm0, %v818_v35  ;;  %2629 = vmatpush.xpose.msk.msrb.mxu3 %vm341_vm0, %v1264_v41  ;;  %v808_v41 = vsel %vm757_vm13, %v3597_v54, 0.0 }
 0x2a6   : > { %v3729_v36 = vpop.permute.xlu2 %833 }
 0x2a9   : > { %2570 = vmatpush.xpose.msk.msra.mxu1 %vm341_vm0, %v817_v3  ;;  %2630 = vmatpush.xpose.msk.msrb.mxu3 %vm341_vm0, %v1263_v28  ;;  %v1254_v3 = vsel %vm3614_vm14, %v3597_v54, 0.0 }
 0x2aa   : > { %v3640_v5 = vpop.permute.xlu1 %777 }
 0x2ab   : > { %v3642_v8 = vpop.permute.xlu0 %787  ;;  %v1630_v4 = vsel %vm3540_vm10, %v3640_v5, 0.0  ;;  %v810_v2 = vsel %vm757_vm13, %v3640_v5, 0.0  ;;  %v1256_v31 = vsel %vm3614_vm14, %v3640_v5, 0.0 }
 0x2ac   : > { %v1635_v11 = vsel %vm3540_vm10, %v3642_v8, 0.0  ;;  %v815_v29 = vsel %vm757_vm13, %v3642_v8, 0.0  ;;  %v1261_v12 = vsel %vm3614_vm14, %v3642_v8, 0.0 }
 0x2ad   : > { %2571 = vmatpush.xpose.msk.msra.mxu1 %vm341_vm0, %v816_v9  ;;  %2631 = vmatpush.xpose.msk.msrb.mxu3 %vm341_vm0, %v1262_v45 }
 0x2b1   : > { %2572 = vmatpush.xpose.msk.msra.mxu1 %vm341_vm0, %v815_v29  ;;  %2632 = vmatpush.xpose.msk.msrb.mxu3 %vm341_vm0, %v1261_v12  ;;  %v3784_v29 = vmul.f32 0.35355338, %v3571_v50  ;;  %v3786_v12 = vpop.permute.xlu2 %829  ;;  %v2011_v50 = vsel %vm3779_vm2, %v3602_v20, 0.0  ;;  %v1631_v20 = vsel %vm3540_vm10, %v3595_v18, 0.0 }
 0x2b2   : > { %v3666_v13 = vpop.permute.xlu1 %771 }
 0x2b3   : > { %v3668_v14 = vpop.permute.xlu0 %781  ;;  %v1627_v59 = vsel %vm3540_vm10, %v3666_v13, 0.0  ;;  %v807_v28 = vsel %vm757_vm13, %v3666_v13, 0.0  ;;  %v1253_v9 = vsel %vm3614_vm14, %v3666_v13, 0.0 }
 0x2b4   : > { %v1632_v15 = vsel %vm3540_vm10, %v3668_v14, 0.0  ;;  %v812_v21 = vsel %vm757_vm13, %v3668_v14, 0.0  ;;  %v1258_v22 = vsel %vm3614_vm14, %v3668_v14, 0.0 }
 0x2b5   : > { %2573 = vmatpush.xpose.msk.msra.mxu1 %vm341_vm0, %v814_v60  ;;  %2633 = vmatpush.xpose.msk.msrb.mxu3 %vm341_vm0, %v1260_v55  ;;  %v2012_v60 = vsel %vm3779_vm2, %v3611_v61, 0.0  ;;  %v2006_v61 = vsel %vm3779_vm2, %v3668_v14, 0.0 }
 0x2b9   : > { %2574 = vmatpush.xpose.msk.msra.mxu1 %vm341_vm0, %v813_v16  ;;  %2634 = vmatpush.xpose.msk.msrb.mxu3 %vm341_vm0, %v1259_v7  ;;  %v3839_v16 = vmul.f32 0.35355338, %v3567_v49  ;;  %v3855_v49 = vpop.permute.xlu2 %825 }
 0x2ba   : > { %v3692_v19 = vpop.permute.xlu1 %837 }
 0x2bb   : > { %v3694_v10 = vpop.permute.xlu0 %775 }
 0x2bc   : > { %v1629_v23 = vsel %vm3540_vm10, %v3694_v10, 0.0  ;;  %v809_v39 = vsel %vm757_vm13, %v3694_v10, 0.0  ;;  %v1255_v0 = vsel %vm3614_vm14, %v3694_v10, 0.0 }
 0x2bd   : > { %2575 = vmatpush.xpose.msk.msra.mxu1 %vm341_vm0, %v812_v21  ;;  %2635 = vmatpush.xpose.msk.msrb.mxu3 %vm341_vm0, %v1258_v22  ;;  %v2010_v21 = vsel %vm3779_vm2, %v3544_v38, 0.0  ;;  %v2009_v22 = vsel %vm3779_vm2, %v3642_v8, 0.0  ;;  %v2004_v38 = vsel %vm3779_vm2, %v3640_v5, 0.0 }
 0x2c1   : > { %2576 = vmatpush.xpose.msk.msra.mxu1 %vm341_vm0, %v811_v24  ;;  %2636 = vmatpush.xpose.msk.msrb.mxu3 %vm341_vm0, %v1257_v25  ;;  %v3891_v24 = vmul.f32 0.35355338, %v3580_v52  ;;  %v2007_v52 = vsel %vm3779_vm2, %v3609_v58, 0.0  ;;  %v4097_v58 = vmul.f32 0.35355338, %v3520_v6 }
 0x2c2   : > { %v3717_v17 = vpop.permute.xlu1 %831  ;;  %v4114_v6 = vmul.f32 0.35355338, %v3556_v46  ;;  %v4140_v46 = vmul.f32 0.35355338, %v3538_v40 }
 0x2c3   : > { %v3719_v26 = vpop.permute.xlu0 %835 }
 0x2c4   : > { %4943 = vst [vmem:[#allocation4_spill] sm:$0xff] %v4140_v46 }
 0x2c5   : > { %2577 = vmatpush.xpose.msk.msra.mxu1 %vm341_vm0, %v810_v2  ;;  %2637 = vmatpush.xpose.msk.msrb.mxu3 %vm341_vm0, %v1256_v31  ;;  %v2008_v2 = vsel %vm3779_vm2, %v3558_v42, 0.0  ;;  %v4041_v42 = vmul.f32 0.35355338, %v3573_v53  ;;  %v2001_v53 = vsel %vm3779_vm2, %v3666_v13, 0.0  ;;  %v4195_v31 = vld [vmem:[%s4181_s13] sm:$0xff]  }
 0x2c9   : > { %2578 = vmatpush.xpose.msk.msra.mxu1 %vm341_vm0, %v809_v39  ;;  %2638 = vmatpush.xpose.msk.msrb.mxu3 %vm341_vm0, %v1255_v0 }
 0x2ca   : > { %v3739_v27 = vpop.permute.xlu1 %827 }
 0x2cb   : > { %v3741_v35 = vpop.permute.xlu0 %841 }
 0x2cc   : > { %2593 = vmatpush.msk.msrb.mxu0 %vm757_vm13, %v3741_v35  ;;  %2935 = vmatpush.msk.msra.mxu2 %vm757_vm13, %v3741_v35 }
 0x2cd   : > { %2579 = vmatpush.xpose.msk.msra.mxu1 %vm341_vm0, %v808_v41  ;;  %2639 = vmatpush.xpose.msk.msrb.mxu3 %vm341_vm0, %v1254_v3  ;;  %v2910_v41 = vld [vmem:[%s4181_s13 + $0x20] sm:$0xff]   ;;  %v2813_v3 = vunpack.c.l.bf16 %v4195_v31 }
 0x2ce   : > { %2594 = vmatpush.msk.msrb.mxu0 %vm757_vm13, %v3707_v51  ;;  %2937 = vmatpush.msk.msra.mxu2 %vm757_vm13, %v3707_v51 }
 0x2d0   : > { %2595 = vmatpush.msk.msrb.mxu0 %vm757_vm13, %v3692_v19  ;;  %2939 = vmatpush.msk.msra.mxu2 %vm757_vm13, %v3692_v19 }
 0x2d1   : > { %2580 = vmatpush.xpose.msk.msra.mxu1 %vm341_vm0, %v807_v28  ;;  %2640 = vmatpush.xpose.msk.msrb.mxu3 %vm341_vm0, %v1253_v9 }
 0x2d2   : > { %2596 = vmatpush.msk.msrb.mxu0 %vm757_vm13, %v3719_v26  ;;  %v3797_v55 = vpop.permute.xlu1 %823  ;;  %2941 = vmatpush.msk.msra.mxu2 %vm757_vm13, %v3719_v26 }
 0x2d4   : > { %2581 = vmatmul.msk.f32.vlgmr.msra.gmra.mxu1 %vm341_vm0, %v3784_v29  ;;  %2597 = vmatpush.msk.msrb.mxu0 %vm757_vm13, %v3729_v36 }
 0x2d5   : > { %2934 = vmatpush.msk.msrb.mxu1 %vm757_vm13, %v3741_v35  ;;  %2749 = vmatpush.xpose.msk.msra.mxu3 %vm341_vm0, %v2012_v60  ;;  %v2829_v60 = vunpack.c.l.bf16 %v2910_v41 }
 0x2d6   : > { %2943 = vmatpush.msk.msra.mxu2 %vm757_vm13, %v3729_v36  ;;  %2641 = vmatmul.msk.f32.vlgmr.msrb.gmra.mxu3 %vm341_vm0, %v3784_v29 }
 0x2d7   : > { %2936 = vmatpush.msk.msrb.mxu1 %vm757_vm13, %v3707_v51  ;;  %2598 = vmatpush.msk.msrb.mxu0 %vm757_vm13, %v3717_v17 }
 0x2d8   : > { %2945 = vmatpush.msk.msra.mxu2 %vm757_vm13, %v3717_v17 }
 0x2d9   : > { %2938 = vmatpush.msk.msrb.mxu1 %vm757_vm13, %v3692_v19  ;;  %2750 = vmatpush.xpose.msk.msra.mxu3 %vm341_vm0, %v2011_v50 }
 0x2da   : > { %2599 = vmatpush.msk.msrb.mxu0 %vm757_vm13, %v3786_v12  ;;  %2947 = vmatpush.msk.msra.mxu2 %vm757_vm13, %v3786_v12  ;;  %v3844_v7 = vpop.permute.xlu1 %821 }
 0x2db   : > { %2940 = vmatpush.msk.msrb.mxu1 %vm757_vm13, %v3719_v26 }
 0x2dc   : > { %2600 = vmatpush.msk.msrb.mxu0 %vm757_vm13, %v3739_v27  ;;  %2949 = vmatpush.msk.msra.mxu2 %vm757_vm13, %v3739_v27 }
 0x2dd   : > { %2942 = vmatpush.msk.msrb.mxu1 %vm757_vm13, %v3729_v36  ;;  %2751 = vmatpush.xpose.msk.msra.mxu3 %vm341_vm0, %v2010_v21  ;;  %v4210_v21 = vld [vmem:[%s4181_s13 + $0x30] sm:$0xff]  }
 0x2de   : > { %2582 = vmatmul.msk.f32.gmra.mxu1 %vm341_vm0, %v3839_v16  ;;  %2601 = vmatpush.msk.msrb.mxu0 %vm757_vm13, %v3855_v49 }
 0x2df   : > { %2944 = vmatpush.msk.msrb.mxu1 %vm757_vm13, %v3717_v17  ;;  %2951 = vmatpush.msk.msra.mxu2 %vm757_vm13, %v3855_v49 }
 0x2e0   : > { %2642 = vmatmul.msk.f32.gmra.mxu3 %vm341_vm0, %v3839_v16  ;;  %2602 = vmatpush.msk.msrb.mxu0 %vm757_vm13, %v3797_v55 }
 0x2e1   : > { %2946 = vmatpush.msk.msrb.mxu1 %vm757_vm13, %v3786_v12  ;;  %2953 = vmatpush.msk.msra.mxu2 %vm757_vm13, %v3797_v55 }
 0x2e2   : > { %2752 = vmatpush.xpose.msk.msra.mxu3 %vm341_vm0, %v2009_v22  ;;  %2603 = vmatpush.msk.msrb.mxu0 %vm757_vm13, %v3844_v7  ;;  %v3896_v25 = vpop.permute.xlu1 %819 }
 0x2e3   : > { %2948 = vmatpush.msk.msrb.mxu1 %vm757_vm13, %v3739_v27  ;;  %2955 = vmatpush.msk.msra.mxu2 %vm757_vm13, %v3844_v7 }
 0x2e4   : > { %2604 = vmatpush.msk.msrb.mxu0 %vm757_vm13, %v3896_v25 }
 0x2e5   : > { %2950 = vmatpush.msk.msrb.mxu1 %vm757_vm13, %v3855_v49  ;;  %2957 = vmatpush.msk.msra.mxu2 %vm757_vm13, %v3896_v25 }
 0x2e6   : > { %2753 = vmatpush.xpose.msk.msra.mxu3 %vm341_vm0, %v2008_v2  ;;  %2583 = vmatmul.msk.f32.gmra.mxu1 %vm341_vm0, %v3891_v24  ;;  %v4213_v2 = vld [vmem:[%s4181_s13 + $0x8] sm:$0xff]  }
 0x2e7   : > { %2952 = vmatpush.msk.msrb.mxu1 %vm757_vm13, %v3797_v55  ;;  %2653 = vmatpush.msk.msra.mxu0 %vm3614_vm14, %v3741_v35 }
 0x2e8   : > { %2643 = vmatmul.msk.f32.gmra.mxu3 %vm341_vm0, %v3891_v24  ;;  %2689 = vmatpush.xpose.msk.msrb.mxu2 %vm341_vm0, %v1638_v1 }
 0x2e9   : > { %2954 = vmatpush.msk.msrb.mxu1 %vm757_vm13, %v3844_v7  ;;  %2654 = vmatpush.msk.msra.mxu0 %vm3614_vm14, %v3707_v51 }
 0x2ea   : > { %2754 = vmatpush.xpose.msk.msra.mxu3 %vm341_vm0, %v2007_v52 }
 0x2eb   : > { %2956 = vmatpush.msk.msrb.mxu1 %vm757_vm13, %v3896_v25  ;;  %2655 = vmatpush.msk.msra.mxu0 %vm3614_vm14, %v3692_v19 }
 0x2ec   : > { %2690 = vmatpush.xpose.msk.msrb.mxu2 %vm341_vm0, %v1637_v57  ;;  %v4084_v57 = vmul.f32 0.35355338, %v3536_v34  ;;  %v4126_v34 = vmul.f32 0.35355338, %v3516_v30 }
 0x2ed   : > { %2713 = vmatpush.msk.msra.mxu1 %vm3540_vm10, %v3741_v35  ;;  %2656 = vmatpush.msk.msra.mxu0 %vm3614_vm14, %v3719_v26 }
 0x2ee   : > { %2755 = vmatpush.xpose.msk.msra.mxu3 %vm341_vm0, %v2006_v61  ;;  %2584 = vmatmul.msk.f32.gmra.mxu1 %vm341_vm0, %v3954_v33  ;;  %4941 = vst [vmem:[#allocation2_spill] sm:$0xff] %v4126_v34  ;;  %v2837_v61 = vunpack.c.l.bf16 %v4210_v21 }
 0x2ef   : > { %2714 = vmatpush.msk.msra.mxu1 %vm3540_vm10, %v3707_v51  ;;  %2657 = vmatpush.msk.msra.mxu0 %vm3614_vm14, %v3729_v36 }
 0x2f0   : > { %2644 = vmatmul.msk.f32.gmra.mxu3 %vm341_vm0, %v3954_v33  ;;  %2691 = vmatpush.xpose.msk.msrb.mxu2 %vm341_vm0, %v1636_v43  ;;  %v4000_v43 = vmul.f32 0.35355338, %v3524_v48  ;;  %v2003_v48 = vsel %vm3779_vm2, %v3694_v10, 0.0 }
 0x2f1   : > { %2715 = vmatpush.msk.msra.mxu1 %vm3540_vm10, %v3692_v19  ;;  %2658 = vmatpush.msk.msra.mxu0 %vm3614_vm14, %v3717_v17 }
 0x2f2   : > { %2756 = vmatpush.xpose.msk.msra.mxu3 %vm341_vm0, %v2005_v44 }
 0x2f3   : > { %2716 = vmatpush.msk.msra.mxu1 %vm3540_vm10, %v3719_v26  ;;  %2659 = vmatpush.msk.msra.mxu0 %vm3614_vm14, %v3786_v12 }
 0x2f4   : > { %2692 = vmatpush.xpose.msk.msrb.mxu2 %vm341_vm0, %v1635_v11 }
 0x2f5   : > { %2717 = vmatpush.msk.msra.mxu1 %vm3540_vm10, %v3729_v36  ;;  %2660 = vmatpush.msk.msra.mxu0 %vm3614_vm14, %v3739_v27 }
 0x2f6   : > { %2757 = vmatpush.xpose.msk.msra.mxu3 %vm341_vm0, %v2004_v38  ;;  %2585 = vmatmul.msk.f32.gmra.mxu1 %vm341_vm0, %v4000_v43 }
 0x2f7   : > { %2718 = vmatpush.msk.msra.mxu1 %vm3540_vm10, %v3717_v17  ;;  %2661 = vmatpush.msk.msra.mxu0 %vm3614_vm14, %v3855_v49 }
 0x2f8   : > { %2645 = vmatmul.msk.f32.gmra.mxu3 %vm341_vm0, %v4000_v43  ;;  %2693 = vmatpush.xpose.msk.msrb.mxu2 %vm341_vm0, %v1634_v47  ;;  %v2002_v47 = vsel %vm3779_vm2, %v3597_v54, 0.0 }
 0x2f9   : > { %2719 = vmatpush.msk.msra.mxu1 %vm3540_vm10, %v3786_v12  ;;  %2662 = vmatpush.msk.msra.mxu0 %vm3614_vm14, %v3797_v55 }
 0x2fa   : > { %2758 = vmatpush.xpose.msk.msra.mxu3 %vm341_vm0, %v2003_v48  ;;  %v2817_v48 = vunpack.c.l.bf16 %v4213_v2 }
 0x2fb   : > { %2720 = vmatpush.msk.msra.mxu1 %vm3540_vm10, %v3739_v27  ;;  %2663 = vmatpush.msk.msra.mxu0 %vm3614_vm14, %v3844_v7 }
 0x2fc   : > { %2694 = vmatpush.xpose.msk.msrb.mxu2 %vm341_vm0, %v1633_v63 }
 0x2fd   : > { %2721 = vmatpush.msk.msra.mxu1 %vm3540_vm10, %v3855_v49  ;;  %2664 = vmatpush.msk.msra.mxu0 %vm3614_vm14, %v3896_v25 }
 0x2fe   : > { %2759 = vmatpush.xpose.msk.msra.mxu3 %vm341_vm0, %v2002_v47  ;;  %2586 = vmatmul.msk.f32.gmra.mxu1 %vm341_vm0, %v4041_v42  ;;  %v2830_v47 = vunpack.c.h.bf16 %v2910_v41 }
 0x2ff   : > { %2722 = vmatpush.msk.msra.mxu1 %vm3540_vm10, %v3797_v55 }
 0x300   : > { %2646 = vmatmul.msk.f32.gmra.mxu3 %vm341_vm0, %v4041_v42  ;;  %2695 = vmatpush.xpose.msk.msrb.mxu2 %vm341_vm0, %v1632_v15 }
 0x301   : > { %2723 = vmatpush.msk.msra.mxu1 %vm3540_vm10, %v3844_v7 }
 0x302   : > { %2760 = vmatpush.xpose.msk.msra.mxu3 %vm341_vm0, %v2001_v53 }
 0x303   : > { %2724 = vmatpush.msk.msra.mxu1 %vm3540_vm10, %v3896_v25 }
 0x304   : > { %2696 = vmatpush.xpose.msk.msrb.mxu2 %vm341_vm0, %v1631_v20 }
 0x306   : > { %2587 = vmatmul.msk.f32.gmra.mxu1 %vm341_vm0, %v4084_v57 }
 0x308   : > { %2647 = vmatmul.msk.f32.gmra.mxu3 %vm341_vm0, %v4084_v57  ;;  %2697 = vmatpush.xpose.msk.msrb.mxu2 %vm341_vm0, %v1630_v4  ;;  %v2909_v4 = vld [vmem:[%s4181_s13 + $0x18] sm:$0xff]  }
 0x309   : > { %v2825_v13 = vunpack.c.l.bf16 %v2909_v4 }
 0x30c   : > { %2698 = vmatpush.xpose.msk.msrb.mxu2 %vm341_vm0, %v1629_v23  ;;  %v2826_v23 = vunpack.c.h.bf16 %v2909_v4 }
 0x30e   : > { %2588 = vmatmul.msk.f32.gmra.mxu1 %vm341_vm0, %v4097_v58 }
 0x310   : > { %2648 = vmatmul.msk.f32.gmra.mxu3 %vm341_vm0, %v4097_v58  ;;  %2699 = vmatpush.xpose.msk.msrb.mxu2 %vm341_vm0, %v1628_v56 }
 0x314   : > { %2700 = vmatpush.xpose.msk.msrb.mxu2 %vm341_vm0, %v1627_v59 }
 0x316   : > { %2589 = vmatmul.msk.f32.gmra.mxu1 %vm341_vm0, %v4114_v6 }
 0x318   : > { %2649 = vmatmul.msk.f32.gmra.mxu3 %vm341_vm0, %v4114_v6 }
 0x31e   : > { %2590 = vmatmul.msk.f32.gmra.mxu1 %vm341_vm0, %v4126_v34 }
 0x320   : > { %2650 = vmatmul.msk.f32.gmra.mxu3 %vm341_vm0, %v4126_v34 }
 0x326   : > { %2591 = vmatmul.msk.f32.gmra.mxu1 %vm341_vm0, %v4133_v37 }
 0x328   : > { %2651 = vmatmul.msk.f32.gmra.mxu3 %vm341_vm0, %v4133_v37 }
 0x32e   : > { %2592 = vmatmul.msk.f32.gmra.mxu1 %vm341_vm0, %v4140_v46 }
 0x330   : > { %2652 = vmatmul.msk.f32.gmra.mxu3 %vm341_vm0, %v4140_v46 }
 0x338   : > { %2761 = vmatmul.msk.f32.vlgmr.msra.gmra.mxu3 %vm341_vm0, %v3784_v29 }
 0x340   : > { %2762 = vmatmul.msk.f32.gmra.mxu3 %vm341_vm0, %v3839_v16 }
 0x348   : > { %2763 = vmatmul.msk.f32.gmra.mxu3 %vm341_vm0, %v3891_v24 }
 0x350   : > { %2764 = vmatmul.msk.f32.gmra.mxu3 %vm341_vm0, %v3954_v33 }
 0x351   : > { %v980_v30 = vpop.f32.mrf.mxu1 }
 0x352   : > { %v4207_v50 = vadd.f32 %v2813_v3, %v980_v30 }
 0x354   : > { %v1017_v38 = vsel %vm1016_vm3, %v4207_v50, -inf }
 0x358   : > { %2765 = vmatmul.msk.f32.gmra.mxu3 %vm341_vm0, %v4000_v43 }
 0x359   : > { %v1355_v32 = vpop.f32.mrf.mxu3 }
 0x35a   : > { %v4225_v20 = vadd.f32 %v2837_v61, %v1355_v32  ;;  %v4248_v61 = vld [vmem:[%s4181_s13 + $0x48] sm:$0xff]  }
 0x35b   : > { %v4156_v40 = vpop.f32.mrf.mxu1 }
 0x35c   : > { %v1391_v3 = vsel %vm1016_vm3, %v4225_v20, -inf }
 0x360   : > { %2766 = vmatmul.msk.f32.gmra.mxu3 %vm341_vm0, %v4041_v42 }
 0x363   : > { %v4160_v18 = vpop.f32.mrf.mxu3  ;;  %v986_v54 = vpop.f32.mrf.mxu1 }
 0x364   : > { %v4227_v30 = vadd.f32 %v2817_v48, %v986_v54 }
 0x366   : > { %v1023_v54 = vsel %vm1016_vm3, %v4227_v30, -inf }
 0x368   : > { %2767 = vmatmul.msk.f32.gmra.mxu3 %vm341_vm0, %v4084_v57 }
 0x36b   : > { %v4164_v56 = vpop.f32.mrf.mxu3  ;;  %v4166_v62 = vpop.f32.mrf.mxu1 }
 0x370   : > { %2768 = vmatmul.msk.f32.gmra.mxu3 %vm341_vm0, %v4097_v58 }
 0x373   : > { %v1364_v63 = vpop.f32.mrf.mxu3  ;;  %v992_v1 = vpop.f32.mrf.mxu1 }
 0x378   : > { %2769 = vmatmul.msk.f32.gmra.mxu3 %vm341_vm0, %v4114_v6 }
 0x37b   : > { %v4174_v5 = vpop.f32.mrf.mxu3  ;;  %v4176_v8 = vpop.f32.mrf.mxu1 }
 0x380   : > { %2770 = vmatmul.msk.f32.gmra.mxu3 %vm341_vm0, %v4126_v34 }
 0x383   : > { %v4186_v11 = vpop.f32.mrf.mxu3  ;;  %v998_v14 = vpop.f32.mrf.mxu1 }
 0x384   : > { %v4188_v59 = vadd.f32 %v2825_v13, %v998_v14  ;;  %v4230_v13 = vld [vmem:[%s4181_s13 + $0x10] sm:$0xff]  }
 0x385   : > { %v2821_v32 = vunpack.c.l.bf16 %v4230_v13 }
 0x386   : > { %v1035_v15 = vsel %vm1016_vm3, %v4188_v59, -inf }
 0x387   : > { %1036 = vmax.xlane.f32.xlu0 %v1035_v15  ;;  %v2913_v15 = vld [vmem:[%s4181_s13 + $0x38] sm:$0xff]  }
 0x388   : > { %2771 = vmatmul.msk.f32.gmra.mxu3 %vm341_vm0, %v4133_v37 }
 0x38b   : > { %v1373_v10 = vpop.f32.mrf.mxu3  ;;  %v1001_v39 = vpop.f32.mrf.mxu1 }
 0x38c   : > { %v4197_v0 = vadd.f32 %v2826_v23, %v1001_v39  ;;  %v2911_v23 = vld [vmem:[%s4181_s13 + $0x28] sm:$0xff]   ;;  %v2842_v39 = vunpack.c.h.bf16 %v2913_v15 }
 0x38e   : > { %v1038_v28 = vsel %vm1016_vm3, %v4197_v0, -inf }
 0x38f   : > { %1039 = vmax.xlane.f32.xlu2 %v1038_v28  ;;  %v2833_v28 = vunpack.c.l.bf16 %v2911_v23 }
 0x390   : > { %2772 = vmatmul.msk.f32.gmra.mxu3 %vm341_vm0, %v4140_v46 }
 0x393   : > { %v4205_v9 = vpop.f32.mrf.mxu3  ;;  %v1004_v22 = vpop.f32.mrf.mxu1 }
 0x394   : > { %v4215_v52 = vadd.f32 %v2829_v60, %v1004_v22  ;;  %v4243_v60 = vadd.f32 %v2842_v39, %v1364_v63  ;;  %v4245_v22 = vadd.f32 %v2821_v32, %v992_v1  ;;  %v2841_v63 = vunpack.c.l.bf16 %v2913_v15 }
 0x395   : > { %v2834_v39 = vunpack.c.h.bf16 %v2911_v23  ;;  %v2814_v15 = vunpack.c.h.bf16 %v4195_v31 }
 0x396   : > { %v1041_v44 = vsel %vm1016_vm3, %v4215_v52, -inf  ;;  %v1029_v1 = vsel %vm1016_vm3, %v4245_v22, -inf  ;;  %v4262_v32 = vadd.f32 %v2841_v63, %v4164_v56 }
 0x397   : > { %1042 = vmax.xlane.f32.xlu1 %v1041_v44  ;;  %1018 = vmax.xlane.f32.xlu2 %v1017_v38 }
 0x398   : > { %v1397_v56 = vsel %vm1016_vm3, %v4262_v32, -inf }
 0x39b   : > { %v4223_v53 = vpop.f32.mrf.mxu3  ;;  %v1007_v4 = vpop.f32.mrf.mxu1 }
 0x39c   : > { %v4232_v14 = vadd.f32 %v2830_v47, %v1007_v4  ;;  %v2849_v47 = vunpack.c.l.bf16 %v4248_v61  ;;  %v1400_v4 = vsel %vm1016_vm3, %v4243_v60, -inf }
 0x39e   : > { %v1044_v41 = vsel %vm1016_vm3, %v4232_v14, -inf }
 0x39f   : > { %1392 = vmax.xlane.f32.xlu1 %v1391_v3  ;;  %1045 = vmax.xlane.f32.xlu0 %v1044_v41  ;;  %v4259_v41 = vadd.f32 %v2849_v47, %v1373_v10  ;;  %v4276_v47 = vadd.f32 %v2814_v15, %v4156_v40  ;;  %v2838_v15 = vunpack.c.h.bf16 %v4210_v21  ;;  %v4314_v21 = vld [vmem:[%s4181_s13 + $0x90] sm:$0xff]  }
 0x3a0   : > { %1024 = vmax.xlane.f32.xlu2 %v1023_v54 }
 0x3a1   : > { %v1409_v37 = vsel %vm1016_vm3, %v4259_v41, -inf }
 0x3a3   : > { %v1382_v44 = vpop.f32.mrf.mxu3  ;;  %v1010_v38 = vpop.f32.mrf.mxu1 }
 0x3a4   : > { %v4250_v48 = vadd.f32 %v2833_v28, %v1010_v38  ;;  %v2916_v38 = vld [vmem:[%s4181_s13 + $0x50] sm:$0xff]  }
 0x3a5   : > { %v2853_v34 = vunpack.c.l.bf16 %v2916_v38 }
 0x3a6   : > { %v1047_v3 = vsel %vm1016_vm3, %v4250_v48, -inf }
 0x3a7   : > { %1401 = vmax.xlane.f32.xlu1 %v1400_v4  ;;  %1048 = vmax.xlane.f32.xlu0 %v1047_v3  ;;  %v2914_v4 = vld [vmem:[%s4181_s13 + $0x40] sm:$0xff]   ;;  %v2854_v3 = vunpack.c.h.bf16 %v2916_v38 }
 0x3a8   : > { %1030 = vmax.xlane.f32.xlu2 %v1029_v1  ;;  %v2846_v23 = vunpack.c.h.bf16 %v2914_v4  ;;  %v2917_v1 = vld [vmem:[%s4181_s13 + $0x58] sm:$0xff]  }
 0x3a9   : > { %v4278_v63 = vadd.f32 %v2854_v3, %v1382_v44  ;;  %v4297_v44 = vadd.f32 %v2853_v34, %v4223_v53  ;;  %v2845_v53 = vunpack.c.l.bf16 %v2914_v4 }
 0x3aa   : > { %v4281_v31 = vadd.f32 %v2846_v23, %v4186_v11  ;;  %v2822_v23 = vunpack.c.h.bf16 %v4230_v13  ;;  %v2885_v13 = vunpack.c.l.bf16 %v4314_v21 }
 0x3ab   : > { %v1013_v54 = vpop.f32.mrf.mxu1  ;;  %v1385_v46 = vpop.f32.mrf.mxu3 }
 0x3ac   : > { %v4264_v28 = vadd.f32 %v2834_v39, %v1013_v54  ;;  %v2818_v39 = vunpack.c.h.bf16 %v4213_v2  ;;  %v2858_v54 = vunpack.c.h.bf16 %v2917_v1  ;;  %v1406_v40 = vsel %vm1016_vm3, %v4281_v31, -inf }
 0x3ad   : > { %v4311_v34 = vadd.f32 %v2822_v23, %v4176_v8  ;;  %v2850_v8 = vunpack.c.h.bf16 %v4248_v61 }
 0x3ae   : > { %v1050_v10 = vsel %vm1016_vm3, %v4264_v28, -inf  ;;  %v4292_v11 = vadd.f32 %v2818_v39, %v4166_v62  ;;  %v1415_v62 = vsel %vm1016_vm3, %v4297_v44, -inf  ;;  %v4308_v39 = vadd.f32 %v2838_v15, %v4160_v18 }
 0x3af   : > { %1410 = vmax.xlane.f32.xlu1 %v1409_v37  ;;  %1051 = vmax.xlane.f32.xlu0 %v1050_v10  ;;  %v1418_v37 = vsel %vm1016_vm3, %v4278_v63, -inf  ;;  %v1020_v10 = vsel %vm1016_vm3, %v4276_v47, -inf  ;;  %v4322_v18 = vadd.f32 %v2845_v53, %v4174_v5  ;;  %v4332_v15 = vadd.f32 %v2850_v8, %v4205_v9 }
 0x3b0   : > { %1398 = vmax.xlane.f32.xlu2 %v1397_v56  ;;  %v1026_v3 = vsel %vm1016_vm3, %v4292_v11, -inf }
 0x3b1   : > { %v1403_v4 = vsel %vm1016_vm3, %v4322_v18, -inf  ;;  %v1412_v5 = vsel %vm1016_vm3, %v4332_v15, -inf }
 0x3b3   : > { %v1388_v56 = vpop.f32.mrf.mxu3 }
 0x3b4   : > { %v4294_v2 = vadd.f32 %v2858_v54, %v1388_v56  ;;  %v1394_v54 = vsel %vm1016_vm3, %v4308_v39, -inf }
 0x3b6   : > { %v1424_v38 = vsel %vm1016_vm3, %v4294_v2, -inf }
 0x3b7   : > { %1419 = vmax.xlane.f32.xlu1 %v1418_v37  ;;  %1021 = vmax.xlane.f32.xlu0 %v1020_v10  ;;  %v1032_v37 = vsel %vm1016_vm3, %v4311_v34, -inf }
 0x3b8   : > { %1407 = vmax.xlane.f32.xlu2 %v1406_v40 }
 0x3bb   : > { %v2103_v10 = vpop.f32.mrf.mxu3 }
 0x3bc   : > { %v4324_v56 = vadd.f32 %v2885_v13, %v2103_v10 }
 0x3be   : > { %v2139_v40 = vsel %vm1016_vm3, %v4324_v56, -inf }
 0x3bf   : > { %1425 = vmax.xlane.f32.xlu1 %v1424_v38  ;;  %1027 = vmax.xlane.f32.xlu0 %v1026_v3  ;;  %v2857_v38 = vunpack.c.l.bf16 %v2917_v1 }
 0x3c0   : > { %1416 = vmax.xlane.f32.xlu2 %v1415_v62 }
 0x3c1   : > { %v4336_v3 = vadd.f32 %v2857_v38, %v1385_v46 }
 0x3c3   : > { %v1421_v61 = vsel %vm1016_vm3, %v4336_v3, -inf }
 0x3c7   : > { %1395 = vmax.xlane.f32.xlu0 %v1394_v54 }
 0x3c8   : > { %1033 = vmax.xlane.f32.xlu2 %v1032_v37 }
 0x3cf   : > { %1404 = vmax.xlane.f32.xlu0 %v1403_v4 }
 0x3d0   : > { %2140 = vmax.xlane.f32.xlu2 %v2139_v40 }
 0x3d7   : > { %1413 = vmax.xlane.f32.xlu0 %v1412_v5 }
 0x3df   : > { %1422 = vmax.xlane.f32.xlu0 %v1421_v61 }
 0x3fa   : > { %v1037_v23 = vpop.xlane.xlu0 %1036 }
 0x3fb   : > { %v1059_v62 = vsub.f32 %v4188_v59, %v1037_v23 }
 0x3fd   : > { %v1077_v53 = vmul.f32 1.442695, %v1059_v62 }
 0x3ff   : > { %3000 = vpow2.f32 %v1077_v53 }
 0x402   : > { %v1040_v54 = vpop.xlane.xlu2 %1039 }
 0x403   : > { %v1060_v9 = vsub.f32 %v4197_v0, %v1040_v54 }
 0x405   : > { %v4342_v13 = vpop.eup %3000  ;;  %v1079_v1 = vmul.f32 1.442695, %v1060_v9 }
 0x406   : > { %2611 = vmatmul.msk.f32.vlgmr.msra.gmra.mxu2 %vm1016_vm3, %v4342_v13 }
 0x407   : > { %3002 = vpow2.f32 %v1079_v1 }
 0x40a   : > { %v1043_v46 = vpop.xlane.xlu1 %1042  ;;  %v1019_v37 = vpop.xlane.xlu2 %1018 }
 0x40b   : > { %v1061_v10 = vsub.f32 %v4215_v52, %v1043_v46  ;;  %v1053_v8 = vsub.f32 %v4207_v50, %v1019_v37 }
 0x40d   : > { %v4348_v4 = vpop.eup %3002  ;;  %v1081_v59 = vmul.f32 1.442695, %v1061_v10  ;;  %v1065_v40 = vmul.f32 1.442695, %v1053_v8 }
 0x40e   : > { %2612 = vmatmul.msk.f32.gmra.mxu2 %vm1016_vm3, %v4348_v4 }
 0x40f   : > { %3004 = vpow2.f32 %v1081_v59 }
 0x410   : > { %3006 = vpow2.f32 %v1065_v40 }
 0x412   : > { %v1046_v0 = vpop.xlane.xlu0 %1045 }
 0x413   : > { %v1025_v38 = vpop.xlane.xlu2 %1024  ;;  %v1062_v5 = vsub.f32 %v4232_v14, %v1046_v0 }
 0x415   : > { %v4353_v61 = vpop.eup %3004  ;;  %v1083_v23 = vmul.f32 1.442695, %v1062_v5 }
 0x416   : > { %v4355_v62 = vpop.eup %3006  ;;  %2613 = vmatmul.msk.f32.gmra.mxu2 %vm1016_vm3, %v4353_v61 }
 0x417   : > { %2605 = vmatmul.msk.f32.vlgmr.msrb.gmra.mxu0 %vm1016_vm3, %v4355_v62  ;;  %3008 = vpow2.f32 %v1083_v23 }
 0x418   : > { %2773 = vmatpush.msk.msrb.mxu0 %vm3779_vm2, %v3741_v35 }
 0x41a   : > { %2774 = vmatpush.msk.msrb.mxu0 %vm3779_vm2, %v3707_v51  ;;  %v1049_v50 = vpop.xlane.xlu0 %1048 }
 0x41b   : > { %v1031_v52 = vpop.xlane.xlu2 %1030  ;;  %v1063_v14 = vsub.f32 %v4250_v48, %v1049_v50 }
 0x41c   : > { %2775 = vmatpush.msk.msrb.mxu0 %vm3779_vm2, %v3692_v19  ;;  %v1057_v10 = vsub.f32 %v4245_v22, %v1031_v52 }
 0x41d   : > { %v1085_v53 = vmul.f32 1.442695, %v1063_v14  ;;  %v4374_v54 = vpop.eup %3008 }
 0x41e   : > { %2776 = vmatpush.msk.msrb.mxu0 %vm3779_vm2, %v3719_v26  ;;  %2614 = vmatmul.msk.f32.gmra.mxu2 %vm1016_vm3, %v4374_v54 }
 0x41f   : > { %3010 = vpow2.f32 %v1085_v53 }
 0x420   : > { %2777 = vmatpush.msk.msrb.mxu0 %vm3779_vm2, %v3729_v36 }
 0x422   : > { %2778 = vmatpush.msk.msrb.mxu0 %vm3779_vm2, %v3717_v17  ;;  %v1052_v19 = vpop.xlane.xlu0 %1051 }
 0x423   : > { %v1399_v51 = vpop.xlane.xlu2 %1398  ;;  %v1064_v35 = vsub.f32 %v4264_v28, %v1052_v19 }
 0x424   : > { %2779 = vmatpush.msk.msrb.mxu0 %vm3779_vm2, %v3786_v12 }
 0x425   : > { %v1087_v26 = vmul.f32 1.442695, %v1064_v35  ;;  %v4391_v48 = vpop.eup %3010 }
 0x426   : > { %2780 = vmatpush.msk.msrb.mxu0 %vm3779_vm2, %v3739_v27  ;;  %2615 = vmatmul.msk.f32.gmra.mxu2 %vm1016_vm3, %v4391_v48 }
 0x427   : > { %3012 = vpow2.f32 %v1087_v26 }
 0x428   : > { %2781 = vmatpush.msk.msrb.mxu0 %vm3779_vm2, %v3855_v49 }
 0x42a   : > { %2782 = vmatpush.msk.msrb.mxu0 %vm3779_vm2, %v3797_v55  ;;  %v1022_v17 = vpop.xlane.xlu0 %1021  ;;  %v1055_v55 = vsub.f32 %v4227_v30, %v1025_v38 }
 0x42b   : > { %v4401_v36 = vpop.xlane.xlu2 %1407  ;;  %v1054_v12 = vsub.f32 %v4276_v47, %v1022_v17 }
 0x42c   : > { %2783 = vmatpush.msk.msrb.mxu0 %vm3779_vm2, %v3844_v7  ;;  %v1069_v47 = vmul.f32 1.442695, %v1055_v55 }
 0x42d   : > { %v1067_v27 = vmul.f32 1.442695, %v1054_v12  ;;  %v4410_v49 = vpop.eup %3012 }
 0x42e   : > { %2784 = vmatpush.msk.msrb.mxu0 %vm3779_vm2, %v3896_v25  ;;  %2616 = vmatmul.msk.f32.gmra.mxu2 %vm1016_vm3, %v4410_v49 }
 0x42f   : > { %3014 = vpow2.f32 %v1067_v27 }
 0x430   : > { %3016 = vpow2.f32 %v1069_v47 }
 0x432   : > { %v1028_v9 = vpop.xlane.xlu0 %1027 }
 0x433   : > { %v4415_v28 = vpop.xlane.xlu2 %1416  ;;  %v1056_v45 = vsub.f32 %v4292_v11, %v1028_v9  ;;  %v1393_v11 = vpop.xlane.xlu1 %1392 }
 0x435   : > { %v4417_v1 = vpop.eup %3014  ;;  %v1071_v30 = vmul.f32 1.442695, %v1056_v45 }
 0x436   : > { %2606 = vmatmul.msk.f32.gmra.mxu0 %vm1016_vm3, %v4417_v1  ;;  %2701 = vmatmul.msk.f32.vlgmr.msrb.gmra.mxu2 %vm341_vm0, %v3784_v29  ;;  %v4425_v37 = vpop.eup %3016  ;;  %v1073_v29 = vmul.f32 1.442695, %v1057_v10 }
 0x43b   : > { %v1034_v7 = vpop.xlane.xlu2 %1033  ;;  %v1402_v23 = vpop.xlane.xlu1 %1401 }
 0x43c   : > { %v1058_v25 = vsub.f32 %v4311_v34, %v1034_v7  ;;  %v1396_v34 = vpop.xlane.xlu0 %1395 }
 0x43d   : > { %v1428_v0 = vsub.f32 %v4308_v39, %v1396_v34 }
 0x43e   : > { %v1075_v46 = vmul.f32 1.442695, %v1058_v25  ;;  %2607 = vmatmul.msk.f32.gmra.mxu0 %vm1016_vm3, %v4425_v37  ;;  %2702 = vmatmul.msk.f32.gmra.mxu2 %vm341_vm0, %v3839_v16  ;;  %v1427_v16 = vsub.f32 %v4225_v20, %v1393_v11 }
 0x43f   : > { %v1441_v38 = vmul.f32 1.442695, %v1428_v0  ;;  %v2106_v0 = vpop.f32.mrf.mxu3 }
 0x440   : > { %3018 = vpow2.f32 %v1075_v46  ;;  %v1439_v22 = vmul.f32 1.442695, %v1427_v16 }
 0x441   : > { %3020 = vpow2.f32 %v1071_v30 }
 0x442   : > { %3022 = vpow2.f32 %v1073_v29 }
 0x443   : > { %3024 = vpow2.f32 %v1439_v22  ;;  %v1411_v19 = vpop.xlane.xlu1 %1410  ;;  %v2141_v22 = vpop.xlane.xlu2 %2140 }
 0x444   : > { %3026 = vpow2.f32 %v1441_v38  ;;  %v1405_v52 = vpop.xlane.xlu0 %1404 }
 0x446   : > { %v4432_v8 = vpop.eup %3018  ;;  %2703 = vmatmul.msk.f32.gmra.mxu2 %vm341_vm0, %v3891_v24  ;;  %v1429_v24 = vsub.f32 %v4262_v32, %v1399_v51 }
 0x447   : > { %v4434_v59 = vpop.eup %3020  ;;  %2610 = vmatmul.msk.f32.vlgmr.msrb.gmra.mxu1 %vm1016_vm3, %v4432_v8 }
 0x448   : > { %2608 = vmatmul.msk.f32.gmra.mxu0 %vm1016_vm3, %v4434_v59  ;;  %v4443_v40 = vpop.eup %3022  ;;  %v1443_v20 = vmul.f32 1.442695, %v1429_v24 }
 0x449   : > { %v4450_v5 = vpop.eup %3024 }
 0x44a   : > { %v4457_v50 = vpop.eup %3026  ;;  %3028 = vpow2.f32 %v1443_v20 }
 0x44b   : > { %v1420_v55 = vpop.xlane.xlu1 %1419 }
 0x44c   : > { %v1414_v35 = vpop.xlane.xlu0 %1413  ;;  %v1436_v9 = vsub.f32 %v4278_v63, %v1420_v55 }
 0x44d   : > { %v1434_v26 = vsub.f32 %v4332_v15, %v1414_v35  ;;  %v4946_v15 = vld [vmem:[#allocation4_spill] sm:$0xff] }
 0x44e   : > { %2704 = vmatmul.msk.f32.gmra.mxu2 %vm341_vm0, %v3954_v33  ;;  %v1430_v33 = vsub.f32 %v4243_v60, %v1402_v23  ;;  %v1457_v7 = vmul.f32 1.442695, %v1436_v9  ;;  %v2109_v23 = vpop.f32.mrf.mxu3 }
 0x44f   : > { %v1453_v17 = vmul.f32 1.442695, %v1434_v26  ;;  %v2919_v26 = vld [vmem:[%s4181_s13 + $0x68] sm:$0xff]  }
 0x450   : > { %2609 = vmatmul.msk.f32.gmra.mxu0 %vm1016_vm3, %v4443_v40  ;;  %v1445_v39 = vmul.f32 1.442695, %v1430_v33  ;;  %v4464_v14 = vpop.eup %3028  ;;  %v2918_v33 = vld [vmem:[%s4181_s13 + $0x60] sm:$0xff]  }
 0x452   : > { %3030 = vpow2.f32 %v1445_v39 }
 0x453   : > { %v1426_v10 = vpop.xlane.xlu1 %1425 }
 0x454   : > { %v1438_v63 = vsub.f32 %v4294_v2, %v1426_v10 }
 0x456   : > { %2705 = vmatmul.msk.f32.gmra.mxu2 %vm341_vm0, %v4000_v43  ;;  %v1431_v43 = vsub.f32 %v4322_v18, %v1405_v52  ;;  %v1461_v16 = vmul.f32 1.442695, %v1438_v63  ;;  %v2926_v63 = vld [vmem:[%s4181_s13 + $0xa0] sm:$0xff]  }
 0x458   : > { %2665 = vmatmul.msk.f32.vlgmr.msra.gmra.mxu0 %vm1016_vm3, %v4450_v5  ;;  %v1447_v32 = vmul.f32 1.442695, %v1431_v43  ;;  %v4471_v53 = vpop.eup %3030 }
 0x45a   : > { %3032 = vpow2.f32 %v1447_v32  ;;  %v2886_v32 = vunpack.c.h.bf16 %v4314_v21 }
 0x45e   : > { %2706 = vmatmul.msk.f32.gmra.mxu2 %vm341_vm0, %v4041_v42  ;;  %v1432_v42 = vsub.f32 %v4281_v31, %v4401_v36  ;;  %v4944_v31 = vld [vmem:[#allocation2_spill] sm:$0xff] }
 0x460   : > { %2666 = vmatmul.msk.f32.gmra.mxu0 %vm1016_vm3, %v4457_v50  ;;  %v1449_v60 = vmul.f32 1.442695, %v1432_v42  ;;  %v4479_v51 = vpop.eup %3032 }
 0x462   : > { %3034 = vpow2.f32 %v1449_v60  ;;  %v2112_v60 = vpop.f32.mrf.mxu3 }
 0x466   : > { %2707 = vmatmul.msk.f32.gmra.mxu2 %vm341_vm0, %v4084_v57  ;;  %v1433_v57 = vsub.f32 %v4259_v41, %v1411_v19  ;;  %v1435_v41 = vsub.f32 %v4297_v44, %v4415_v28  ;;  %v1423_v44 = vpop.xlane.xlu0 %1422  ;;  %v2862_v19 = vunpack.c.h.bf16 %v2918_v33 }
 0x467   : > { %v1437_v25 = vsub.f32 %v4336_v3, %v1423_v44  ;;  %v2175_v3 = vsub.f32 %v4324_v56, %v2141_v22  ;;  %v2861_v56 = vunpack.c.l.bf16 %v2918_v33 }
 0x468   : > { %2667 = vmatmul.msk.f32.gmra.mxu0 %vm1016_vm3, %v4464_v14  ;;  %v1451_v18 = vmul.f32 1.442695, %v1433_v57  ;;  %v1455_v27 = vmul.f32 1.442695, %v1435_v41  ;;  %v4549_v57 = vadd.f32 %v2886_v32, %v2106_v0  ;;  %v2865_v41 = vunpack.c.l.bf16 %v2919_v26  ;;  %v2920_v0 = vld [vmem:[%s4181_s13 + $0x70] sm:$0xff]  }
 0x469   : > { %v1459_v46 = vmul.f32 1.442695, %v1437_v25  ;;  %v2187_v24 = vmul.f32 1.442695, %v2175_v3 }
 0x46a   : > { %3036 = vpow2.f32 %v1451_v18  ;;  %v2925_v18 = vld [vmem:[%s4181_s13 + $0x98] sm:$0xff]   ;;  %v2142_v21 = vsel %vm1016_vm3, %v4549_v57, -inf }
 0x46b   : > { %3038 = vpow2.f32 %v1453_v17  ;;  %v2889_v17 = vunpack.c.l.bf16 %v2925_v18 }
 0x46c   : > { %3040 = vpow2.f32 %v1455_v27  ;;  %v2115_v27 = vpop.f32.mrf.mxu3 }
 0x46d   : > { %3042 = vpow2.f32 %v1457_v7  ;;  %v4559_v55 = vadd.f32 %v2889_v17, %v2109_v23  ;;  %v2890_v7 = vunpack.c.h.bf16 %v2925_v18 }
 0x46e   : > { %2708 = vmatmul.msk.f32.gmra.mxu2 %vm341_vm0, %v4097_v58  ;;  %v4486_v58 = vpop.eup %3034  ;;  %3044 = vpow2.f32 %v1459_v46  ;;  %v2866_v46 = vunpack.c.h.bf16 %v2919_v26  ;;  %v2870_v26 = vunpack.c.h.bf16 %v2920_v0 }
 0x46f   : > { %3046 = vpow2.f32 %v1461_v16  ;;  %v2145_v25 = vsel %vm1016_vm3, %v4559_v55, -inf  ;;  %v4567_v10 = vadd.f32 %v2890_v7, %v2112_v60 }
 0x470   : > { %2668 = vmatmul.msk.f32.gmra.mxu0 %vm1016_vm3, %v4471_v53  ;;  %v4493_v36 = vpop.eup %3036  ;;  %3048 = vpow2.f32 %v2187_v24  ;;  %v2893_v24 = vunpack.c.l.bf16 %v2926_v63 }
 0x471   : > { %v4503_v47 = vpop.eup %3038  ;;  %v2148_v23 = vsel %vm1016_vm3, %v4567_v10, -inf }
 0x472   : > { %v4512_v28 = vpop.eup %3040 }
 0x473   : > { %v4519_v29 = vpop.eup %3042 }
 0x474   : > { %v4526_v34 = vpop.eup %3044  ;;  %v2118_v16 = vpop.f32.mrf.mxu3 }
 0x475   : > { %v4533_v20 = vpop.eup %3046 }
 0x476   : > { %2709 = vmatmul.msk.f32.gmra.mxu2 %vm341_vm0, %v4114_v6  ;;  %v4945_v6 = vld [vmem:[#allocation3_spill] sm:$0xff]  ;;  %v4540_v39 = vpop.eup %3048 }
 0x478   : > { %2669 = vmatmul.msk.f32.gmra.mxu0 %vm1016_vm3, %v4479_v51 }
 0x47c   : > { %v2121_v60 = vpop.f32.mrf.mxu3 }
 0x47e   : > { %2710 = vmatmul.msk.f32.gmra.mxu2 %vm341_vm0, %v4944_v31 }
 0x480   : > { %2670 = vmatmul.msk.f32.gmra.mxu0 %vm1016_vm3, %v4486_v58 }
 0x486   : > { %2711 = vmatmul.msk.f32.gmra.mxu2 %vm341_vm0, %v4945_v6 }
 0x488   : > { %2671 = vmatmul.msk.f32.gmra.mxu0 %vm1016_vm3, %v4493_v36 }
 0x489   : > { %v4501_v12 = vpop.f32.mrf.mxu2 }
 0x48e   : > { %2712 = vmatmul.msk.f32.gmra.mxu2 %vm341_vm0, %v4946_v15 }
 0x490   : > { %2672 = vmatmul.msk.f32.gmra.mxu0 %vm1016_vm3, %v4503_v47 }
 0x491   : > { %v4510_v45 = vpop.f32.mrf.mxu2 }
 0x498   : > { %2673 = vmatmul.msk.f32.gmra.mxu0 %vm1016_vm3, %v4512_v28 }
 0x499   : > { %v4517_v30 = vpop.f32.mrf.mxu2 }
 0x4a0   : > { %2674 = vmatmul.msk.f32.gmra.mxu0 %vm1016_vm3, %v4519_v29 }
 0x4a1   : > { %v4524_v11 = vpop.f32.mrf.mxu2 }
 0x4a8   : > { %2675 = vmatmul.msk.f32.gmra.mxu0 %vm1016_vm3, %v4526_v34 }
 0x4a9   : > { %v4531_v38 = vpop.f32.mrf.mxu2 }
 0x4aa   : > { %4947 = vst [vmem:[#allocation2_spill] sm:$0xff] %v4531_v38 }
 0x4b0   : > { %2676 = vmatmul.msk.f32.gmra.mxu0 %vm1016_vm3, %v4533_v20 }
 0x4b1   : > { %v4537_v2 = vpop.f32.mrf.mxu2 }
 0x4b2   : > { %4948 = vst [vmem:[#allocation3_spill] sm:$0xff] %v4537_v2 }
 0x4b8   : > { %2785 = vmatmul.msk.f32.vlgmr.msrb.gmra.mxu0 %vm1016_vm3, %v4540_v39 }
 0x4b9   : > { %v1729_v52 = vpop.f32.mrf.mxu2 }
 0x4ba   : > { %v4544_v43 = vadd.f32 %v2861_v56, %v1729_v52  ;;  %v2869_v56 = vunpack.c.l.bf16 %v2920_v0  ;;  %v4577_v52 = vadd.f32 %v2893_v24, %v2115_v27  ;;  %v2921_v27 = vld [vmem:[%s4181_s13 + $0x78] sm:$0xff]  }
 0x4bc   : > { %v1765_v42 = vsel %vm1016_vm3, %v4544_v43, -inf }
 0x4bd   : > { %1766 = vmax.xlane.f32.xlu0 %v1765_v42 }
 0x4c1   : > { %v1732_v35 = vpop.f32.mrf.mxu2 }
 0x4c2   : > { %v4552_v31 = vadd.f32 %v2862_v19, %v1732_v35  ;;  %v2894_v19 = vunpack.c.h.bf16 %v2926_v63  ;;  %v2151_v35 = vsel %vm1016_vm3, %v4577_v52, -inf }
 0x4c4   : > { %v1768_v6 = vsel %vm1016_vm3, %v4552_v31, -inf  ;;  %v4585_v17 = vadd.f32 %v2894_v19, %v2118_v16  ;;  %v2928_v19 = vld [vmem:[%s4181_s13 + $0xb0] sm:$0xff]  }
 0x4c5   : > { %1769 = vmax.xlane.f32.xlu1 %v1768_v6  ;;  %2143 = vmax.xlane.f32.xlu0 %v2142_v21  ;;  %v2927_v6 = vld [vmem:[%s4181_s13 + $0xa8] sm:$0xff]  }
 0x4c6   : > { %v2898_v0 = vunpack.c.h.bf16 %v2927_v6 }
 0x4c9   : > { %v1735_v15 = vpop.f32.mrf.mxu2 }
 0x4ca   : > { %v4561_v9 = vadd.f32 %v2865_v41, %v1735_v15  ;;  %v2897_v15 = vunpack.c.l.bf16 %v2927_v6 }
 0x4cc   : > { %v1771_v44 = vsel %vm1016_vm3, %v4561_v9, -inf  ;;  %v4595_v63 = vadd.f32 %v2897_v15, %v2121_v60 }
 0x4cd   : > { %1772 = vmax.xlane.f32.xlu2 %v1771_v44  ;;  %2146 = vmax.xlane.f32.xlu1 %v2145_v25  ;;  %v2154_v44 = vsel %vm1016_vm3, %v4585_v17, -inf  ;;  %v2124_v25 = vpop.f32.mrf.mxu3 }
 0x4ce   : > { %v2157_v24 = vsel %vm1016_vm3, %v4595_v63, -inf }
 0x4d1   : > { %v1738_v22 = vpop.f32.mrf.mxu2 }
 0x4d2   : > { %v4570_v3 = vadd.f32 %v2866_v46, %v1738_v22  ;;  %v2873_v46 = vunpack.c.l.bf16 %v2921_v27 }
 0x4d4   : > { %v1774_v33 = vsel %vm1016_vm3, %v4570_v3, -inf }
 0x4d5   : > { %2149 = vmax.xlane.f32.xlu2 %v2148_v23  ;;  %1775 = vmax.xlane.f32.xlu0 %v1774_v33  ;;  %v2874_v33 = vunpack.c.h.bf16 %v2921_v27 }
 0x4d9   : > { %v1741_v32 = vpop.f32.mrf.mxu2 }
 0x4da   : > { %v4579_v42 = vadd.f32 %v2869_v56, %v1741_v32  ;;  %v2127_v56 = vpop.f32.mrf.mxu3  ;;  %v4603_v32 = vadd.f32 %v2898_v0, %v2124_v25 }
 0x4dc   : > { %v1777_v18 = vsel %vm1016_vm3, %v4579_v42, -inf }
 0x4dd   : > { %1778 = vmax.xlane.f32.xlu1 %v1777_v18  ;;  %2152 = vmax.xlane.f32.xlu0 %v2151_v35  ;;  %v2922_v35 = vld [vmem:[%s4181_s13 + $0x80] sm:$0xff]  }
 0x4de   : > { %v2877_v15 = vunpack.c.l.bf16 %v2922_v35 }
 0x4e1   : > { %v1744_v21 = vpop.f32.mrf.mxu2 }
 0x4e2   : > { %v4588_v41 = vadd.f32 %v2870_v26, %v1744_v21  ;;  %v2901_v26 = vunpack.c.l.bf16 %v2928_v19  ;;  %v2160_v21 = vsel %vm1016_vm3, %v4603_v32, -inf }
 0x4e4   : > { %v1780_v7 = vsel %vm1016_vm3, %v4588_v41, -inf  ;;  %v4613_v27 = vadd.f32 %v2901_v26, %v2127_v56 }
 0x4e5   : > { %1781 = vmax.xlane.f32.xlu2 %v1780_v7  ;;  %2155 = vmax.xlane.f32.xlu1 %v2154_v44  ;;  %v2130_v7 = vpop.f32.mrf.mxu3 }
 0x4e6   : > { %v2163_v0 = vsel %vm1016_vm3, %v4613_v27, -inf }
 0x4e9   : > { %v1747_v16 = vpop.f32.mrf.mxu2 }
 0x4ea   : > { %v4597_v22 = vadd.f32 %v2873_v46, %v1747_v16  ;;  %v2902_v46 = vunpack.c.h.bf16 %v2928_v19 }
 0x4ec   : > { %v1783_v23 = vsel %vm1016_vm3, %v4597_v22, -inf }
 0x4ed   : > { %2158 = vmax.xlane.f32.xlu2 %v2157_v24  ;;  %1784 = vmax.xlane.f32.xlu0 %v1783_v23  ;;  %v2878_v24 = vunpack.c.h.bf16 %v2922_v35  ;;  %v4621_v23 = vadd.f32 %v2902_v46, %v2130_v7  ;;  %v2133_v26 = vpop.f32.mrf.mxu3 }
 0x4ef   : > { %v2166_v19 = vsel %vm1016_vm3, %v4621_v23, -inf }
 0x4f1   : > { %v1750_v18 = vpop.f32.mrf.mxu2 }
 0x4f2   : > { %v4606_v60 = vadd.f32 %v2874_v33, %v1750_v18  ;;  %v2929_v33 = vld [vmem:[%s4181_s13 + $0xb8] sm:$0xff]  }
 0x4f3   : > { %v2906_v46 = vunpack.c.h.bf16 %v2929_v33 }
 0x4f4   : > { %v1786_v6 = vsel %vm1016_vm3, %v4606_v60, -inf }
 0x4f5   : > { %1787 = vmax.xlane.f32.xlu1 %v1786_v6  ;;  %2161 = vmax.xlane.f32.xlu0 %v2160_v21  ;;  %v2923_v6 = vld [vmem:[%s4181_s13 + $0x88] sm:$0xff]   ;;  %v2905_v21 = vunpack.c.l.bf16 %v2929_v33 }
 0x4f6   : > { %v2882_v2 = vunpack.c.h.bf16 %v2923_v6 }
 0x4f9   : > { %v1753_v44 = vpop.f32.mrf.mxu2 }
 0x4fa   : > { %v4615_v25 = vadd.f32 %v2877_v15, %v1753_v44  ;;  %v2881_v44 = vunpack.c.l.bf16 %v2923_v6  ;;  %v1463_v6 = vsel %vm1016_vm3, %v4450_v5, 0.0  ;;  %v1469_v5 = vsel %vm1016_vm3, %v4464_v14, 0.0 }
 0x4fc   : > { %v1789_v16 = vsel %vm1016_vm3, %v4615_v25, -inf }
 0x4fd   : > { %1790 = vmax.xlane.f32.xlu2 %v1789_v16  ;;  %2164 = vmax.xlane.f32.xlu1 %v2163_v0  ;;  %v4631_v16 = vadd.f32 %v2905_v21, %v2133_v26  ;;  %v1089_v21 = vsel %vm1016_vm3, %v4355_v62, 0.0  ;;  %v1092_v62 = vsel %vm1016_vm3, %v4417_v1, 0.0 }
 0x501   : > { %v1756_v18 = vpop.f32.mrf.mxu2 }
 0x502   : > { %v4624_v56 = vadd.f32 %v2878_v24, %v1756_v18  ;;  %v2169_v24 = vsel %vm1016_vm3, %v4631_v16, -inf  ;;  %v2136_v18 = vpop.f32.mrf.mxu3 }
 0x503   : > { %v4639_v38 = vadd.f32 %v2906_v46, %v2136_v18 }
 0x504   : > { %v1792_v15 = vsel %vm1016_vm3, %v4624_v56, -inf }
 0x505   : > { %2167 = vmax.xlane.f32.xlu2 %v2166_v19  ;;  %1793 = vmax.xlane.f32.xlu0 %v1792_v15  ;;  %v2172_v33 = vsel %vm1016_vm3, %v4639_v38, -inf }
 0x509   : > { %v1759_v35 = vpop.f32.mrf.mxu2 }
 0x50a   : > { %v4633_v7 = vadd.f32 %v2881_v44, %v1759_v35  ;;  %v4649_v44 = vpop.f32.mrf.mxu0  ;;  %v2211_v35 = vsel %vm1016_vm3, %v4540_v39, 0.0  ;;  %v1098_v39 = vsel %vm1016_vm3, %v4434_v59, 0.0 }
 0x50c   : > { %v1795_v0 = vsel %vm1016_vm3, %v4633_v7, -inf }
 0x50d   : > { %1796 = vmax.xlane.f32.xlu1 %v1795_v0  ;;  %2170 = vmax.xlane.f32.xlu0 %v2169_v24  ;;  %v1095_v0 = vsel %vm1016_vm3, %v4425_v37, 0.0 }
 0x511   : > { %v1762_v19 = vpop.f32.mrf.mxu2 }
 0x512   : > { %v4641_v15 = vadd.f32 %v2882_v2, %v1762_v19  ;;  %v1466_v2 = vsel %vm1016_vm3, %v4457_v50, 0.0  ;;  %v4657_v46 = vpop.f32.mrf.mxu0 }
 0x514   : > { %v1798_v26 = vsel %vm1016_vm3, %v4641_v15, -inf }
 0x515   : > { %1799 = vmax.xlane.f32.xlu2 %v1798_v26  ;;  %2173 = vmax.xlane.f32.xlu1 %v2172_v33 }
 0x516   : > { %1090 = vadd.xlane.f32.xlu0 %v1089_v21 }
 0x51a   : > { %v4665_v50 = vpop.f32.mrf.mxu0 }
 0x51d   : > { %1464 = vadd.xlane.f32.xlu2 %v1463_v6  ;;  %1467 = vadd.xlane.f32.xlu1 %v1466_v2 }
 0x51e   : > { %2212 = vadd.xlane.f32.xlu0 %v2211_v35 }
 0x522   : > { %v4670_v1 = vpop.f32.mrf.mxu0 }
 0x525   : > { %1093 = vadd.xlane.f32.xlu2 %v1092_v62  ;;  %1096 = vadd.xlane.f32.xlu1 %v1095_v0 }
 0x526   : > { %1470 = vadd.xlane.f32.xlu0 %v1469_v5 }
 0x52a   : > { %v4675_v59 = vpop.f32.mrf.mxu0 }
 0x52e   : > { %1099 = vadd.xlane.f32.xlu0 %v1098_v39 }
 0x530   : > { %v1767_v24 = vpop.xlane.xlu0 %1766 }
 0x531   : > { %v1801_v18 = vsub.f32 %v4544_v43, %v1767_v24 }
 0x533   : > { %v1813_v19 = vmul.f32 1.442695, %v1801_v18 }
 0x535   : > { %3050 = vpow2.f32 %v1813_v19 }
 0x538   : > { %v1770_v37 = vpop.xlane.xlu1 %1769  ;;  %v2144_v26 = vpop.xlane.xlu0 %2143 }
 0x539   : > { %v1802_v14 = vsub.f32 %v4552_v31, %v1770_v37  ;;  %v2176_v33 = vsub.f32 %v4549_v57, %v2144_v26  ;;  %v4682_v37 = vpop.f32.mrf.mxu0 }
 0x53b   : > { %v3051_v21 = vpop.eup %3050  ;;  %v1815_v6 = vmul.f32 1.442695, %v1802_v14  ;;  %v2189_v2 = vmul.f32 1.442695, %v2176_v33 }
 0x53c   : > { %2725 = vmatmul.msk.f32.vlgmr.msra.gmra.mxu1 %vm1016_vm3, %v3051_v21 }
 0x53d   : > { %3052 = vpow2.f32 %v1815_v6 }
 0x53e   : > { %3054 = vpow2.f32 %v2189_v2 }
 0x540   : > { %v1773_v43 = vpop.xlane.xlu2 %1772  ;;  %v2147_v35 = vpop.xlane.xlu1 %2146 }
 0x541   : > { %v1803_v62 = vsub.f32 %v4561_v9, %v1773_v43  ;;  %v2177_v0 = vsub.f32 %v4559_v55, %v2147_v35  ;;  %v1472_v43 = vsel %vm1016_vm3, %v4471_v53, 0.0  ;;  %v1837_v53 = vsel %vm1016_vm3, %v3051_v21, 0.0  ;;  %v2375_v21 = vld [vmem:[%s4927_s6 + $0x18] sm:$0xff] }
 0x542   : > { %2428 = vmatpush.msra.mxu2 %v2375_v21 }
 0x543   : > { %v3053_v5 = vpop.eup %3052  ;;  %v1817_v39 = vmul.f32 1.442695, %v1803_v62  ;;  %v2191_v31 = vmul.f32 1.442695, %v2177_v0 }
 0x544   : > { %v3055_v24 = vpop.eup %3054  ;;  %2726 = vmatmul.msk.f32.gmra.mxu1 %vm1016_vm3, %v3053_v5 }
 0x545   : > { %3056 = vpow2.f32 %v1817_v39  ;;  %2786 = vmatmul.msk.f32.gmra.mxu0 %vm1016_vm3, %v3055_v24  ;;  %v2214_v57 = vsel %vm1016_vm3, %v3055_v24, 0.0  ;;  %v4696_v39 = vpop.f32.mrf.mxu0 }
 0x546   : > { %3058 = vpow2.f32 %v2191_v31  ;;  %2215 = vadd.xlane.f32.xlu2 %v2214_v57 }
 0x548   : > { %v2150_v18 = vpop.xlane.xlu2 %2149  ;;  %v1776_v19 = vpop.xlane.xlu0 %1775 }
 0x549   : > { %v2178_v9 = vsub.f32 %v4567_v10, %v2150_v18  ;;  %v1804_v55 = vsub.f32 %v4570_v3, %v1776_v19 }
 0x54b   : > { %v4686_v26 = vpop.eup %3056  ;;  %v2193_v14 = vmul.f32 1.442695, %v2178_v9  ;;  %v1819_v33 = vmul.f32 1.442695, %v1804_v55 }
 0x54c   : > { %v3059_v6 = vpop.eup %3058  ;;  %2727 = vmatmul.msk.f32.gmra.mxu1 %vm1016_vm3, %v4686_v26 }
 0x54d   : > { %3060 = vpow2.f32 %v2193_v14  ;;  %2787 = vmatmul.msk.f32.gmra.mxu0 %vm1016_vm3, %v3059_v6  ;;  %v2217_v2 = vsel %vm1016_vm3, %v3059_v6, 0.0 }
 0x54e   : > { %3062 = vpow2.f32 %v1819_v33  ;;  %2218 = vadd.xlane.f32.xlu1 %v2217_v2  ;;  %1473 = vadd.xlane.f32.xlu2 %v1472_v43  ;;  %v4711_v43 = vpop.f32.mrf.mxu0 }
 0x550   : > { %v1779_v10 = vpop.xlane.xlu1 %1778  ;;  %v2153_v3 = vpop.xlane.xlu0 %2152 }
 0x551   : > { %v1805_v35 = vsub.f32 %v4579_v42, %v1779_v10  ;;  %v2179_v62 = vsub.f32 %v4577_v52, %v2153_v3  ;;  %v1101_v52 = vsel %vm1016_vm3, %v4443_v40, 0.0  ;;  %v1840_v40 = vsel %vm1016_vm3, %v3053_v5, 0.0 }
 0x553   : > { %v3061_v0 = vpop.eup %3060  ;;  %v1821_v31 = vmul.f32 1.442695, %v1805_v35  ;;  %v2195_v24 = vmul.f32 1.442695, %v2179_v62 }
 0x554   : > { %v4698_v57 = vpop.eup %3062  ;;  %v2220_v18 = vsel %vm1016_vm3, %v3061_v0, 0.0 }
 0x555   : > { %3064 = vpow2.f32 %v1821_v31  ;;  %2728 = vmatmul.msk.f32.gmra.mxu1 %vm1016_vm3, %v4698_v57  ;;  %2788 = vmatmul.msk.f32.gmra.mxu0 %vm1016_vm3, %v3061_v0 }
 0x556   : > { %3066 = vpow2.f32 %v2195_v24  ;;  %2221 = vadd.xlane.f32.xlu0 %v2220_v18  ;;  %1838 = vadd.xlane.f32.xlu1 %v1837_v53  ;;  %v1478_v24 = vsel %vm1016_vm3, %v4486_v58, 0.0  ;;  %v1104_v18 = vsel %vm1016_vm3, %v4432_v8, 0.0  ;;  %v1107_v8 = vsel %vm1016_vm3, %v4342_v13, 0.0 }
 0x557   : > { %1102 = vadd.xlane.f32.xlu2 %v1101_v52 }
 0x558   : > { %v1782_v42 = vpop.xlane.xlu2 %1781  ;;  %v2156_v19 = vpop.xlane.xlu1 %2155 }
 0x559   : > { %v1806_v9 = vsub.f32 %v4588_v41, %v1782_v42  ;;  %v2180_v55 = vsub.f32 %v4585_v17, %v2156_v19  ;;  %v1475_v41 = vsel %vm1016_vm3, %v4479_v51, 0.0 }
 0x55b   : > { %v4709_v14 = vpop.eup %3064  ;;  %v1823_v33 = vmul.f32 1.442695, %v1806_v9  ;;  %v2197_v6 = vmul.f32 1.442695, %v2180_v55 }
 0x55c   : > { %v3067_v2 = vpop.eup %3066 }
 0x55d   : > { %3068 = vpow2.f32 %v1823_v33  ;;  %2729 = vmatmul.msk.f32.gmra.mxu1 %vm1016_vm3, %v4709_v14  ;;  %2789 = vmatmul.msk.f32.gmra.mxu0 %vm1016_vm3, %v3067_v2  ;;  %v2223_v17 = vsel %vm1016_vm3, %v3067_v2, 0.0 }
 0x55e   : > { %3070 = vpow2.f32 %v2197_v6  ;;  %1841 = vadd.xlane.f32.xlu0 %v1840_v40  ;;  %1476 = vadd.xlane.f32.xlu1 %v1475_v41 }
 0x55f   : > { %2224 = vadd.xlane.f32.xlu2 %v2223_v17 }
 0x560   : > { %v2159_v10 = vpop.xlane.xlu2 %2158  ;;  %v1785_v3 = vpop.xlane.xlu0 %1784 }
 0x561   : > { %v2181_v35 = vsub.f32 %v4595_v63, %v2159_v10  ;;  %v1807_v5 = vsub.f32 %v4597_v22, %v1785_v3  ;;  %v1843_v63 = vsel %vm1016_vm3, %v4686_v26, 0.0  ;;  %v4736_v22 = vpop.f32.mrf.mxu0  ;;  %v1846_v26 = vsel %vm1016_vm3, %v4698_v57, 0.0 }
 0x563   : > { %v4725_v62 = vpop.eup %3068  ;;  %v2199_v51 = vmul.f32 1.442695, %v2181_v35  ;;  %v1825_v0 = vmul.f32 1.442695, %v1807_v5 }
 0x564   : > { %v3071_v31 = vpop.eup %3070 }
 0x565   : > { %3072 = vpow2.f32 %v2199_v51  ;;  %2730 = vmatmul.msk.f32.gmra.mxu1 %vm1016_vm3, %v4725_v62  ;;  %2790 = vmatmul.msk.f32.gmra.mxu0 %vm1016_vm3, %v3071_v31  ;;  %v2374_v51 = vld [vmem:[%s4927_s6 + $0x10] sm:$0xff] }
 0x566   : > { %3074 = vpow2.f32 %v1825_v0  ;;  %1479 = vadd.xlane.f32.xlu0 %v1478_v24  ;;  %1105 = vadd.xlane.f32.xlu1 %v1104_v18 }
 0x567   : > { %1844 = vadd.xlane.f32.xlu2 %v1843_v63  ;;  %2429 = vmatpush.msra.mxu2 %v2374_v51  ;;  %v1493_v51 = vsel %vm1016_vm3, %v4526_v34, 0.0 }
 0x568   : > { %v1788_v53 = vpop.xlane.xlu1 %1787  ;;  %v2162_v52 = vpop.xlane.xlu0 %2161 }
 0x569   : > { %v1808_v42 = vsub.f32 %v4606_v60, %v1788_v53  ;;  %v2182_v19 = vsub.f32 %v4603_v32, %v2162_v52  ;;  %v1481_v32 = vsel %vm1016_vm3, %v4493_v36, 0.0  ;;  %v4753_v41 = vpop.f32.mrf.mxu0  ;;  %v1849_v36 = vsel %vm1016_vm3, %v4709_v14, 0.0 }
 0x56b   : > { %v3073_v9 = vpop.eup %3072  ;;  %v1827_v58 = vmul.f32 1.442695, %v1808_v42  ;;  %v2201_v55 = vmul.f32 1.442695, %v2182_v19 }
 0x56c   : > { %v4740_v33 = vpop.eup %3074 }
 0x56d   : > { %3076 = vpow2.f32 %v1827_v58  ;;  %2731 = vmatmul.msk.f32.gmra.mxu1 %vm1016_vm3, %v4740_v33  ;;  %2791 = vmatmul.msk.f32.gmra.mxu0 %vm1016_vm3, %v3073_v9 }
 0x56e   : > { %3078 = vpow2.f32 %v2201_v55  ;;  %1108 = vadd.xlane.f32.xlu0 %v1107_v8  ;;  %1847 = vadd.xlane.f32.xlu1 %v1846_v26 }
 0x56f   : > { %1482 = vadd.xlane.f32.xlu2 %v1481_v32 }
 0x570   : > { %v1791_v60 = vpop.xlane.xlu2 %1790  ;;  %v2165_v6 = vpop.xlane.xlu1 %2164 }
 0x571   : > { %v1809_v2 = vsub.f32 %v4615_v25, %v1791_v60  ;;  %v2183_v40 = vsub.f32 %v4613_v27, %v2165_v6  ;;  %v2226_v25 = vsel %vm1016_vm3, %v3071_v31, 0.0  ;;  %v1110_v27 = vsel %vm1016_vm3, %v4348_v4, 0.0  ;;  %v4772_v18 = vpop.f32.mrf.mxu0 }
 0x572   : > { %v2229_v4 = vsel %vm1016_vm3, %v3073_v9, 0.0 }
 0x573   : > { %v4755_v17 = vpop.eup %3076  ;;  %v1829_v13 = vmul.f32 1.442695, %v1809_v2  ;;  %v2203_v21 = vmul.f32 1.442695, %v2183_v40 }
 0x574   : > { %v3079_v57 = vpop.eup %3078 }
 0x575   : > { %3080 = vpow2.f32 %v1829_v13  ;;  %2732 = vmatmul.msk.f32.gmra.mxu1 %vm1016_vm3, %v4755_v17  ;;  %2792 = vmatmul.msk.f32.gmra.mxu0 %vm1016_vm3, %v3079_v57  ;;  %v1858_v13 = vsel %vm1016_vm3, %v4755_v17, 0.0  ;;  %v1116_v17 = vsel %vm1016_vm3, %v4374_v54, 0.0 }
 0x576   : > { %3082 = vpow2.f32 %v2203_v21  ;;  %1850 = vadd.xlane.f32.xlu0 %v1849_v36  ;;  %2227 = vadd.xlane.f32.xlu1 %v2226_v25 }
 0x577   : > { %1111 = vadd.xlane.f32.xlu2 %v1110_v27 }
 0x578   : > { %v2168_v10 = vpop.xlane.xlu2 %2167  ;;  %v1794_v3 = vpop.xlane.xlu0 %1793 }
 0x579   : > { %v2184_v35 = vsub.f32 %v4621_v23, %v2168_v10  ;;  %v1810_v5 = vsub.f32 %v4624_v56, %v1794_v3  ;;  %v1484_v23 = vsel %vm1016_vm3, %v4503_v47, 0.0  ;;  %v1852_v56 = vsel %vm1016_vm3, %v4725_v62, 0.0  ;;  %v4790_v8 = vpop.f32.mrf.mxu0 }
 0x57a   : > { %v1487_v47 = vsel %vm1016_vm3, %v4512_v28, 0.0  ;;  %v1855_v62 = vsel %vm1016_vm3, %v4740_v33, 0.0  ;;  %v2373_v28 = vld [vmem:[%s4927_s6 + $0x8] sm:$0xff]  ;;  %v1119_v3 = vsel %vm1016_vm3, %v4391_v48, 0.0  ;;  %v2372_v48 = vld [vmem:[%s4927_s6] sm:$0xff] }
 0x57b   : > { %v4770_v14 = vpop.eup %3080  ;;  %v2205_v0 = vmul.f32 1.442695, %v2184_v35  ;;  %v1831_v31 = vmul.f32 1.442695, %v1810_v5  ;;  %2430 = vmatpush.msra.mxu2 %v2373_v28 }
 0x57c   : > { %v3083_v24 = vpop.eup %3082  ;;  %v1861_v25 = vsel %vm1016_vm3, %v4770_v14, 0.0 }
 0x57d   : > { %3084 = vpow2.f32 %v2205_v0  ;;  %2733 = vmatmul.msk.f32.gmra.mxu1 %vm1016_vm3, %v4770_v14  ;;  %2793 = vmatmul.msk.f32.gmra.mxu0 %vm1016_vm3, %v3083_v24 }
 0x57e   : > { %3086 = vpow2.f32 %v1831_v31  ;;  %2230 = vadd.xlane.f32.xlu0 %v2229_v4  ;;  %1485 = vadd.xlane.f32.xlu1 %v1484_v23  ;;  %v1122_v4 = vsel %vm1016_vm3, %v4410_v49, 0.0 }
 0x57f   : > { %1853 = vadd.xlane.f32.xlu2 %v1852_v56  ;;  %2431 = vmatpush.msra.mxu2 %v2372_v48 }
 0x580   : > { %v1797_v63 = vpop.xlane.xlu1 %1796  ;;  %v2171_v53 = vpop.xlane.xlu0 %2170 }
 0x581   : > { %v1811_v52 = vsub.f32 %v4633_v7, %v1797_v63  ;;  %v2185_v42 = vsub.f32 %v4631_v16, %v2171_v53  ;;  %v2232_v16 = vsel %vm1016_vm3, %v3079_v57, 0.0  ;;  %v4806_v21 = vpop.f32.mrf.mxu0 }
 0x583   : > { %v3085_v19 = vpop.eup %3084  ;;  %v1833_v58 = vmul.f32 1.442695, %v1811_v52  ;;  %v2207_v55 = vmul.f32 1.442695, %v2185_v42  ;;  %v4838_v52 = vpop.f32.mrf.mxu1 }
 0x584   : > { %v3087_v9 = vpop.eup %3086  ;;  %v2238_v27 = vsel %vm1016_vm3, %v3085_v19, 0.0 }
 0x585   : > { %3088 = vpow2.f32 %v1833_v58  ;;  %2734 = vmatmul.msk.f32.gmra.mxu1 %vm1016_vm3, %v3087_v9  ;;  %2794 = vmatmul.msk.f32.gmra.mxu0 %vm1016_vm3, %v3085_v19  ;;  %v1864_v10 = vsel %vm1016_vm3, %v3087_v9, 0.0 }
 0x586   : > { %3090 = vpow2.f32 %v2207_v55  ;;  %1488 = vadd.xlane.f32.xlu0 %v1487_v47  ;;  %1856 = vadd.xlane.f32.xlu1 %v1855_v62 }
 0x587   : > { %2233 = vadd.xlane.f32.xlu2 %v2232_v16 }
 0x588   : > { %v1800_v7 = vpop.xlane.xlu2 %1799  ;;  %v2174_v26 = vpop.xlane.xlu1 %2173 }
 0x589   : > { %v1812_v32 = vsub.f32 %v4641_v15, %v1800_v7  ;;  %v2186_v60 = vsub.f32 %v4639_v38, %v2174_v26  ;;  %v1113_v38 = vsel %vm1016_vm3, %v4353_v61, 0.0  ;;  %v1490_v15 = vsel %vm1016_vm3, %v4519_v29, 0.0  ;;  %v4815_v29 = vpop.f32.mrf.mxu0  ;;  %v1091_v54 = vpop.xlane.xlu0 %1090 }
 0x58a   : > { %v2235_v61 = vsel %vm1016_vm3, %v3083_v24, 0.0  ;;  %v1496_v24 = vsel %vm1016_vm3, %v4533_v20, 0.0 }
 0x58b   : > { %v3089_v33 = vpop.eup %3088  ;;  %v1835_v6 = vmul.f32 1.442695, %v1812_v32  ;;  %v2209_v2 = vmul.f32 1.442695, %v2186_v60 }
 0x58c   : > { %v3091_v40 = vpop.eup %3090  ;;  %v1867_v5 = vsel %vm1016_vm3, %v3089_v33, 0.0 }
 0x58d   : > { %3092 = vpow2.f32 %v1835_v6  ;;  %2735 = vmatmul.msk.f32.gmra.mxu1 %vm1016_vm3, %v3089_v33  ;;  %2795 = vmatmul.msk.f32.gmra.mxu0 %vm1016_vm3, %v3091_v40  ;;  %v2241_v14 = vsel %vm1016_vm3, %v3091_v40, 0.0 }
 0x58e   : > { %3094 = vpow2.f32 %v2209_v2  ;;  %1859 = vadd.xlane.f32.xlu0 %v1858_v13  ;;  %1114 = vadd.xlane.f32.xlu1 %v1113_v38 }
 0x58f   : > { %1491 = vadd.xlane.f32.xlu2 %v1490_v15 }
 0x590   : > { %v1465_v0 = vpop.xlane.xlu2 %1464  ;;  %v1468_v56 = vpop.xlane.xlu1 %1467 }
 0x591   : > { %v4821_v35 = vpop.f32.mrf.mxu0  ;;  %v2213_v31 = vpop.xlane.xlu0 %2212  ;;  %3096 = vrcp.f32 %v1465_v0 }
 0x592   : > { %3098 = vrcp.f32 %v1091_v54 }
 0x593   : > { %v3093_v57 = vpop.eup %3092  ;;  %3100 = vrcp.f32 %v2213_v31 }
 0x594   : > { %v3095_v36 = vpop.eup %3094  ;;  %v1870_v34 = vsel %vm1016_vm3, %v3093_v57, 0.0 }
 0x595   : > { %2736 = vmatmul.msk.f32.gmra.mxu1 %vm1016_vm3, %v3093_v57  ;;  %2796 = vmatmul.msk.f32.gmra.mxu0 %vm1016_vm3, %v3095_v36  ;;  %v2244_v53 = vsel %vm1016_vm3, %v3095_v36, 0.0 }
 0x596   : > { %1117 = vadd.xlane.f32.xlu0 %v1116_v17  ;;  %2236 = vadd.xlane.f32.xlu1 %v2235_v61 }
 0x597   : > { %1862 = vadd.xlane.f32.xlu2 %v1861_v25  ;;  %v3097_v32 = vpop.eup %3096 }
 0x598   : > { %v1094_v63 = vpop.xlane.xlu2 %1093  ;;  %v1097_v20 = vpop.xlane.xlu1 %1096  ;;  %v1600_v6 = vmul.f32 %v3097_v32, %v4682_v37 }
 0x599   : > { %v4834_v23 = vpop.f32.mrf.mxu0  ;;  %v1471_v42 = vpop.xlane.xlu0 %1470 }
 0x59a   : > { %v3099_v33 = vpop.eup %3098 }
 0x59b   : > { %v3101_v2 = vpop.eup %3100  ;;  %v1226_v40 = vmul.f32 %v3099_v33, %v4649_v44 }
 0x59d   : > { %v1612_v38 = vadd.f32 %v1600_v6, %v1226_v40 }
 0x59e   : > { %2239 = vadd.xlane.f32.xlu0 %v2238_v27  ;;  %1865 = vadd.xlane.f32.xlu1 %v1864_v10 }
 0x59f   : > { %1120 = vadd.xlane.f32.xlu2 %v1119_v3 }
 0x5a1   : > { %v4840_v19 = vpop.f32.mrf.mxu0  ;;  %v1100_v55 = vpop.xlane.xlu0 %1099 }
 0x5a6   : > { %1868 = vadd.xlane.f32.xlu0 %v1867_v5  ;;  %1494 = vadd.xlane.f32.xlu1 %v1493_v51 }
 0x5a7   : > { %2242 = vadd.xlane.f32.xlu2 %v2241_v14 }
 0x5a9   : > { %v2312_v62 = vpop.f32.mrf.mxu0 }
 0x5aa   : > { %v2348_v25 = vmul.f32 %v3101_v2, %v2312_v62 }
 0x5ae   : > { %1497 = vadd.xlane.f32.xlu0 %v1496_v24  ;;  %1123 = vadd.xlane.f32.xlu1 %v1122_v4 }
 0x5af   : > { %1871 = vadd.xlane.f32.xlu2 %v1870_v34 }
 0x5b6   : > { %2245 = vadd.xlane.f32.xlu1 %v2244_v53 }
 0x5b9   : > { %v2216_v58 = vpop.xlane.xlu2 %2215  ;;  %v1938_v49 = vpop.f32.mrf.mxu1 }
 0x5c1   : > { %v2219_v9 = vpop.xlane.xlu1 %2218  ;;  %v1474_v47 = vpop.xlane.xlu2 %1473 }
 0x5c2   : > { %v1941_v16 = vpop.f32.mrf.mxu1  ;;  %v2315_v60 = vpop.f32.mrf.mxu0 }
 0x5c9   : > { %v1839_v7 = vpop.xlane.xlu1 %1838  ;;  %v2222_v26 = vpop.xlane.xlu0 %2221 }
 0x5ca   : > { %3102 = vrcp.f32 %v1839_v7  ;;  %v4842_v28 = vpop.xlane.xlu2 %1102  ;;  %v1944_v17 = vpop.f32.mrf.mxu1 }
 0x5cb   : > { %3104 = vrcp.f32 %v1094_v63  ;;  %v2318_v3 = vpop.f32.mrf.mxu0 }
 0x5cc   : > { %3106 = vrcp.f32 %v1468_v56 }
 0x5cd   : > { %3108 = vrcp.f32 %v1097_v20 }
 0x5d0   : > { %v3103_v13 = vpop.eup %3102 }
 0x5d1   : > { %v1974_v15 = vmul.f32 %v3103_v13, %v1938_v49  ;;  %v1477_v57 = vpop.xlane.xlu1 %1476  ;;  %v1842_v36 = vpop.xlane.xlu0 %1841 }
 0x5d2   : > { %v4846_v61 = vpop.xlane.xlu2 %2224  ;;  %v3105_v10 = vpop.eup %3104  ;;  %3110 = vrcp.f32 %v1842_v36 }
 0x5d3   : > { %v1986_v27 = vadd.f32 %v1974_v15, %v1612_v38  ;;  %3112 = vrcp.f32 %v1471_v42  ;;  %v3107_v54 = vpop.eup %3106  ;;  %v1227_v44 = vmul.f32 %v3105_v10, %v4657_v46  ;;  %v1947_v63 = vpop.f32.mrf.mxu1 }
 0x5d4   : > { %3114 = vrcp.f32 %v2216_v58  ;;  %v3109_v5 = vpop.eup %3108  ;;  %v1601_v51 = vmul.f32 %v3107_v54, %v4696_v39  ;;  %v2321_v39 = vpop.f32.mrf.mxu0 }
 0x5d5   : > { %v2360_v37 = vadd.f32 %v2348_v25, %v1986_v27  ;;  %v1228_v46 = vmul.f32 %v3109_v5, %v4665_v50 }
 0x5d6   : > { %v1613_v34 = vadd.f32 %v1601_v51, %v1227_v44 }
 0x5d7   : > { %2797 = vmatmul.msk.f32.vlgmr.msra.gmra.mxu2 %vm341_vm0, %v2360_v37 }
 0x5d8   : > { %v3111_v48 = vpop.eup %3110 }
 0x5d9   : > { %v1106_v14 = vpop.xlane.xlu1 %1105  ;;  %v1480_v0 = vpop.xlane.xlu0 %1479  ;;  %v1975_v4 = vmul.f32 %v3111_v48, %v1941_v16 }
 0x5da   : > { %v1845_v31 = vpop.xlane.xlu2 %1844  ;;  %v3113_v24 = vpop.eup %3112 }
 0x5db   : > { %3116 = vrcp.f32 %v1845_v31  ;;  %v3115_v56 = vpop.eup %3114  ;;  %v1987_v42 = vadd.f32 %v1975_v4, %v1613_v34  ;;  %v1602_v20 = vmul.f32 %v3113_v24, %v4711_v43 }
 0x5dc   : > { %3118 = vrcp.f32 %v1474_v47  ;;  %v2349_v53 = vmul.f32 %v3115_v56, %v2315_v60  ;;  %v2324_v38 = vpop.f32.mrf.mxu0 }
 0x5dd   : > { %3120 = vrcp.f32 %v2219_v9  ;;  %v1614_v33 = vadd.f32 %v1602_v20, %v1228_v46 }
 0x5de   : > { %3122 = vrcp.f32 %v1100_v55  ;;  %v2361_v58 = vadd.f32 %v2349_v53, %v1987_v42  ;;  %v1950_v55 = vpop.f32.mrf.mxu1 }
 0x5e0   : > { %2798 = vmatmul.msk.f32.gmra.mxu2 %vm341_vm0, %v2361_v58 }
 0x5e1   : > { %v3117_v49 = vpop.eup %3116  ;;  %v1848_v62 = vpop.xlane.xlu1 %1847 }
 0x5e2   : > { %v1109_v16 = vpop.xlane.xlu0 %1108  ;;  %v3119_v7 = vpop.eup %3118  ;;  %v1976_v32 = vmul.f32 %v3117_v49, %v1944_v17  ;;  %3124 = vrcp.f32 %v1848_v62 }
 0x5e3   : > { %v1483_v47 = vpop.xlane.xlu2 %1482  ;;  %v3121_v9 = vpop.eup %3120  ;;  %3126 = vrcp.f32 %v2222_v26  ;;  %v1603_v43 = vmul.f32 %v3119_v7, %v4736_v22 }
 0x5e4   : > { %v3123_v60 = vpop.eup %3122  ;;  %v2350_v6 = vmul.f32 %v3121_v9, %v2318_v3  ;;  %v1988_v50 = vadd.f32 %v1976_v32, %v1614_v33  ;;  %3128 = vrcp.f32 %v1477_v57  ;;  %v2327_v48 = vpop.f32.mrf.mxu0 }
 0x5e5   : > { %v1229_v40 = vmul.f32 %v3123_v60, %v4670_v1  ;;  %3130 = vrcp.f32 %v4842_v28 }
 0x5e6   : > { %v2362_v2 = vadd.f32 %v2350_v6, %v1988_v50  ;;  %3132 = vrcp.f32 %v1106_v14  ;;  %v1953_v37 = vpop.f32.mrf.mxu1 }
 0x5e7   : > { %v1615_v25 = vadd.f32 %v1603_v43, %v1229_v40 }
 0x5e8   : > { %v3125_v13 = vpop.eup %3124  ;;  %2799 = vmatmul.msk.f32.gmra.mxu2 %vm341_vm0, %v2362_v2 }
 0x5e9   : > { %v1977_v15 = vmul.f32 %v3125_v13, %v1947_v63  ;;  %v2228_v36 = vpop.xlane.xlu1 %2227  ;;  %v3127_v26 = vpop.eup %3126 }
 0x5ea   : > { %v1851_v17 = vpop.xlane.xlu0 %1850  ;;  %v2351_v10 = vmul.f32 %v3127_v26, %v2321_v39  ;;  %v3129_v57 = vpop.eup %3128 }
 0x5eb   : > { %v1112_v27 = vpop.xlane.xlu2 %1111  ;;  %v1989_v22 = vadd.f32 %v1977_v15, %v1615_v25  ;;  %3134 = vrcp.f32 %v1851_v17  ;;  %v3131_v1 = vpop.eup %3130  ;;  %v1604_v28 = vmul.f32 %v3129_v57, %v4753_v41 }
 0x5ec   : > { %3136 = vrcp.f32 %v1480_v0  ;;  %v3133_v54 = vpop.eup %3132  ;;  %v1230_v44 = vmul.f32 %v3131_v1, %v4675_v59  ;;  %v2330_v32 = vpop.f32.mrf.mxu0 }
 0x5ed   : > { %v2363_v3 = vadd.f32 %v2351_v10, %v1989_v22  ;;  %3138 = vrcp.f32 %v4846_v61  ;;  %v1231_v56 = vmul.f32 %v3133_v54, %v4838_v52 }
 0x5ee   : > { %3140 = vrcp.f32 %v1483_v47  ;;  %v1616_v4 = vadd.f32 %v1604_v28, %v1230_v44  ;;  %v1956_v49 = vpop.f32.mrf.mxu1 }
 0x5ef   : > { %3142 = vrcp.f32 %v2228_v36 }
 0x5f0   : > { %2800 = vmatmul.msk.f32.gmra.mxu2 %vm341_vm0, %v2363_v3 }
 0x5f1   : > { %v1486_v5 = vpop.xlane.xlu1 %1485  ;;  %v3135_v14 = vpop.eup %3134 }
 0x5f2   : > { %v2231_v51 = vpop.xlane.xlu0 %2230  ;;  %v3137_v0 = vpop.eup %3136  ;;  %v1978_v24 = vmul.f32 %v3135_v14, %v1950_v55 }
 0x5f3   : > { %v1854_v31 = vpop.xlane.xlu2 %1853  ;;  %v3139_v61 = vpop.eup %3138  ;;  %v1605_v59 = vmul.f32 %v3137_v0, %v4772_v18 }
 0x5f4   : > { %3144 = vrcp.f32 %v1854_v31  ;;  %v2352_v41 = vmul.f32 %v3139_v61, %v2324_v38  ;;  %v1990_v34 = vadd.f32 %v1978_v24, %v1616_v4  ;;  %v3141_v63 = vpop.eup %3140  ;;  %v2333_v17 = vpop.f32.mrf.mxu0 }
 0x5f5   : > { %3146 = vrcp.f32 %v1109_v16  ;;  %v3143_v42 = vpop.eup %3142  ;;  %v1617_v7 = vadd.f32 %v1605_v59, %v1231_v56  ;;  %v1606_v18 = vmul.f32 %v3141_v63, %v4790_v8 }
 0x5f6   : > { %v2364_v53 = vadd.f32 %v2352_v41, %v1990_v34  ;;  %3148 = vrcp.f32 %v2231_v51  ;;  %v2353_v52 = vmul.f32 %v3143_v42, %v2327_v48  ;;  %v1959_v36 = vpop.f32.mrf.mxu1 }
 0x5f8   : > { %2801 = vmatmul.msk.f32.gmra.mxu2 %vm341_vm0, %v2364_v53 }
 0x5f9   : > { %v1857_v20 = vpop.xlane.xlu1 %1856 }
 0x5fa   : > { %v3145_v46 = vpop.eup %3144  ;;  %v1489_v39 = vpop.xlane.xlu0 %1488  ;;  %3150 = vrcp.f32 %v1857_v20 }
 0x5fb   : > { %v3147_v58 = vpop.eup %3146  ;;  %v1979_v62 = vmul.f32 %v3145_v46, %v1953_v37  ;;  %v2234_v16 = vpop.xlane.xlu2 %2233  ;;  %3152 = vrcp.f32 %v1486_v5 }
 0x5fc   : > { %v1232_v33 = vmul.f32 %v3147_v58, %v4501_v12  ;;  %v3149_v60 = vpop.eup %3148  ;;  %3154 = vrcp.f32 %v1112_v27  ;;  %v2336_v31 = vpop.f32.mrf.mxu0 }
 0x5fd   : > { %v1991_v47 = vadd.f32 %v1979_v62, %v1617_v7  ;;  %v2354_v13 = vmul.f32 %v3149_v60, %v2330_v32  ;;  %3156 = vrcp.f32 %v2234_v16 }
 0x5fe   : > { %v1618_v50 = vadd.f32 %v1606_v18, %v1232_v33 }
 0x5ff   : > { %v2365_v9 = vadd.f32 %v2353_v52, %v1991_v47 }
 0x600   : > { %v3151_v6 = vpop.eup %3150 }
 0x601   : > { %v1980_v43 = vmul.f32 %v3151_v6, %v1956_v49  ;;  %2802 = vmatmul.msk.f32.gmra.mxu2 %vm341_vm0, %v2365_v9  ;;  %v1115_v55 = vpop.xlane.xlu1 %1114  ;;  %v3153_v15 = vpop.eup %3152  ;;  %v4949_v9 = vld [vmem:[#allocation2_spill] sm:$0xff] }
 0x602   : > { %v1860_v2 = vpop.xlane.xlu0 %1859  ;;  %v3155_v8 = vpop.eup %3154  ;;  %v1607_v25 = vmul.f32 %v3153_v15, %v4806_v21 }
 0x603   : > { %v1492_v40 = vpop.xlane.xlu2 %1491  ;;  %v1992_v38 = vadd.f32 %v1980_v43, %v1618_v50  ;;  %3158 = vrcp.f32 %v1860_v2  ;;  %v3157_v26 = vpop.eup %3156  ;;  %v1233_v27 = vmul.f32 %v3155_v8, %v4510_v45 }
 0x604   : > { %3160 = vrcp.f32 %v1115_v55  ;;  %v2355_v44 = vmul.f32 %v3157_v26, %v2333_v17  ;;  %v1962_v21 = vpop.f32.mrf.mxu1  ;;  %v2339_v7 = vpop.f32.mrf.mxu0 }
 0x605   : > { %v2366_v12 = vadd.f32 %v2354_v13, %v1992_v38  ;;  %3162 = vrcp.f32 %v1489_v39  ;;  %v1619_v28 = vadd.f32 %v1607_v25, %v1233_v27  ;;  %v4950_v25 = vld [vmem:[#allocation3_spill] sm:$0xff] }
 0x609   : > { %2803 = vmatmul.msk.f32.gmra.mxu2 %vm341_vm0, %v2366_v12  ;;  %v2237_v10 = vpop.xlane.xlu1 %2236  ;;  %v3159_v57 = vpop.eup %3158 }
 0x60a   : > { %v1118_v22 = vpop.xlane.xlu0 %1117  ;;  %3164 = vrcp.f32 %v2237_v10  ;;  %v3161_v1 = vpop.eup %3160  ;;  %v1981_v37 = vmul.f32 %v3159_v57, %v1959_v36 }
 0x60b   : > { %v1863_v3 = vpop.xlane.xlu2 %1862  ;;  %v3163_v54 = vpop.eup %3162  ;;  %v1234_v51 = vmul.f32 %v3161_v1, %v4517_v30 }
 0x60c   : > { %3166 = vrcp.f32 %v1863_v3  ;;  %v1993_v5 = vadd.f32 %v1981_v37, %v1619_v28  ;;  %v1608_v48 = vmul.f32 %v3163_v54, %v4815_v29  ;;  %v1965_v20 = vpop.f32.mrf.mxu1  ;;  %v2342_v15 = vpop.f32.mrf.mxu0 }
 0x60d   : > { %3168 = vrcp.f32 %v1118_v22 }
 0x60e   : > { %3170 = vrcp.f32 %v1492_v40  ;;  %v2367_v45 = vadd.f32 %v2355_v44, %v1993_v5  ;;  %v1620_v41 = vadd.f32 %v1608_v48, %v1234_v51 }
 0x610   : > { %v3165_v14 = vpop.eup %3164 }
 0x611   : > { %2804 = vmatmul.msk.f32.gmra.mxu2 %vm341_vm0, %v2367_v45  ;;  %v1866_v24 = vpop.xlane.xlu1 %1865  ;;  %v2356_v63 = vmul.f32 %v3165_v14, %v2336_v31 }
 0x612   : > { %v3167_v0 = vpop.eup %3166  ;;  %v2240_v4 = vpop.xlane.xlu0 %2239  ;;  %3172 = vrcp.f32 %v1866_v24 }
 0x613   : > { %v3169_v61 = vpop.eup %3168  ;;  %v1982_v34 = vmul.f32 %v3167_v0, %v1962_v21  ;;  %v1121_v56 = vpop.xlane.xlu2 %1120  ;;  %3174 = vrcp.f32 %v2240_v4  ;;  %v2973_v21 = vld [vmem:[%s4928_s7] ss:$0 sm:$0xff] }
 0x614   : > { %v3171_v59 = vpop.eup %3170  ;;  %v1235_v53 = vmul.f32 %v3169_v61, %v4524_v11  ;;  %3176 = vrcp.f32 %v1121_v56  ;;  %v1968_v2 = vpop.f32.mrf.mxu1 }
 0x615   : > { %v1994_v30 = vadd.f32 %v1982_v34, %v1620_v41  ;;  %v1609_v29 = vmul.f32 %v3171_v59, %v4821_v35  ;;  %v2345_v37 = vpop.f32.mrf.mxu0 }
 0x617   : > { %v2368_v42 = vadd.f32 %v2356_v63, %v1994_v30  ;;  %v1621_v39 = vadd.f32 %v1609_v29, %v1235_v53 }
 0x618   : > { %v3173_v46 = vpop.eup %3172 }
 0x619   : > { %v1983_v58 = vmul.f32 %v3173_v46, %v1965_v20  ;;  %2805 = vmatmul.msk.f32.gmra.mxu2 %vm341_vm0, %v2368_v42  ;;  %v1495_v49 = vpop.xlane.xlu1 %1494  ;;  %v3175_v16 = vpop.eup %3174 }
 0x61a   : > { %v1869_v62 = vpop.xlane.xlu0 %1868  ;;  %3178 = vrcp.f32 %v1495_v49  ;;  %v2357_v47 = vmul.f32 %v3175_v16, %v2339_v7  ;;  %v3177_v18 = vpop.eup %3176 }
 0x61b   : > { %v2243_v32 = vpop.xlane.xlu2 %2242  ;;  %v1995_v52 = vadd.f32 %v1983_v58, %v1621_v39  ;;  %v1236_v60 = vmul.f32 %v3177_v18, %v4949_v9 }
 0x61c   : > { %3180 = vrcp.f32 %v2243_v32  ;;  %v1971_v3 = vpop.f32.mrf.mxu1 }
 0x61d   : > { %3182 = vrcp.f32 %v1869_v62  ;;  %v2369_v11 = vadd.f32 %v2357_v47, %v1995_v52 }
 0x620   : > { %v3179_v35 = vpop.eup %3178 }
 0x621   : > { %v1610_v6 = vmul.f32 %v3179_v35, %v4834_v23  ;;  %2806 = vmatmul.msk.f32.gmra.mxu2 %vm341_vm0, %v2369_v11  ;;  %v1124_v50 = vpop.xlane.xlu1 %1123 }
 0x622   : > { %v3181_v33 = vpop.eup %3180  ;;  %v1498_v43 = vpop.xlane.xlu0 %1497  ;;  %3184 = vrcp.f32 %v1124_v50 }
 0x623   : > { %v3183_v55 = vpop.eup %3182  ;;  %v1622_v40 = vadd.f32 %v1610_v6, %v1236_v60  ;;  %v1872_v38 = vpop.xlane.xlu2 %1871  ;;  %3186 = vrcp.f32 %v1498_v43  ;;  %v2358_v36 = vmul.f32 %v3181_v33, %v2342_v15 }
 0x624   : > { %v1984_v13 = vmul.f32 %v3183_v55, %v1968_v2  ;;  %3188 = vrcp.f32 %v1872_v38 }
 0x626   : > { %v1996_v12 = vadd.f32 %v1984_v13, %v1622_v40 }
 0x628   : > { %v2370_v8 = vadd.f32 %v2358_v36, %v1996_v12  ;;  %v3185_v17 = vpop.eup %3184 }
 0x629   : > { %v1237_v26 = vmul.f32 %v3185_v17, %v4950_v25  ;;  %v2246_v23 = vpop.xlane.xlu1 %2245  ;;  %v3187_v27 = vpop.eup %3186 }
 0x62a   : > { %2807 = vmatmul.msk.f32.gmra.mxu2 %vm341_vm0, %v2370_v8  ;;  %3190 = vrcp.f32 %v2246_v23  ;;  %v1611_v10 = vmul.f32 %v3187_v27, %v4840_v19  ;;  %v3189_v22 = vpop.eup %3188 }
 0x62b   : > { %v1985_v1 = vmul.f32 %v3189_v22, %v1971_v3 }
 0x62c   : > { %v1623_v57 = vadd.f32 %v1611_v10, %v1237_v26 }
 0x62e   : > { %v1997_v44 = vadd.f32 %v1985_v1, %v1623_v57 }
 0x630   : > { %v3191_v28 = vpop.eup %3190 }
 0x631   : > { %v2359_v54 = vmul.f32 %v3191_v28, %v2345_v37 }
 0x633   : > { %v2371_v5 = vadd.f32 %v2359_v54, %v1997_v44 }
 0x635   : > { %2808 = vmatmul.msk.f32.gmra.mxu2 %vm341_vm0, %v2371_v5 }
 0x65a   : > { %v2433_v19 = vpop.f32.mrf.mxu2 }
 0x65b   : > { %v2434_v51 = vadd.f32 %v2973_v21, %v2433_v19 }
 0x65d   : > { %2469 = vst.msk [vmem:[%s4892_s25] sm:$0xff] %vm341_vm0, %v2434_v51 }
 0x663   : > { %v2436_v45 = vpop.f32.mrf.mxu2 }
 0x664   : > { %v2437_v14 = vadd.f32 %v2973_v21, %v2436_v45 }
 0x666   : > { %2470 = vst.msk [vmem:[%s4892_s25 + $0x8] sm:$0xff] %vm341_vm0, %v2437_v14 }
 0x66b   : > { %v2439_v48 = vpop.f32.mrf.mxu2 }
 0x66c   : > { %v2440_v31 = vadd.f32 %v2973_v21, %v2439_v48 }
 0x66e   : > { %2471 = vst.msk [vmem:[%s4892_s25 + $0x10] sm:$0xff] %vm341_vm0, %v2440_v31 }
 0x673   : > { %v2442_v0 = vpop.f32.mrf.mxu2 }
 0x674   : > { %v2443_v24 = vadd.f32 %v2973_v21, %v2442_v0 }
 0x676   : > { %2472 = vst.msk [vmem:[%s4892_s25 + $0x18] sm:$0xff] %vm341_vm0, %v2443_v24 }
 0x67b   : > { %v2445_v4 = vpop.f32.mrf.mxu2 }
 0x67c   : > { %v2446_v61 = vadd.f32 %v2973_v21, %v2445_v4 }
 0x67e   : > { %2473 = vst.msk [vmem:[%s4892_s25 + $0x20] sm:$0xff] %vm341_vm0, %v2446_v61 }
 0x684   : > { %v2448_v41 = vpop.f32.mrf.mxu2 }
 0x685   : > { %v2449_v34 = vadd.f32 %v2973_v21, %v2448_v41 }
 0x687   : > { %2474 = vst.msk [vmem:[%s4892_s25 + $0x28] sm:$0xff] %vm341_vm0, %v2449_v34 }
 0x68c   : > { %v2451_v56 = vpop.f32.mrf.mxu2 }
 0x68d   : > { %v2452_v59 = vadd.f32 %v2973_v21, %v2451_v56 }
 0x68f   : > { %2475 = vst.msk [vmem:[%s4892_s25 + $0x30] sm:$0xff] %vm341_vm0, %v2452_v59 }
 0x694   : > { %v2454_v63 = vpop.f32.mrf.mxu2 }
 0x695   : > { %v2455_v30 = vadd.f32 %v2973_v21, %v2454_v63 }
 0x697   : > { %2476 = vst.msk [vmem:[%s4892_s25 + $0x38] sm:$0xff] %vm341_vm0, %v2455_v30 }
 0x69c   : > { %v2457_v53 = vpop.f32.mrf.mxu2 }
 0x69d   : > { %v2458_v42 = vadd.f32 %v2973_v21, %v2457_v53 }
 0x69f   : > { %2477 = vst.msk [vmem:[%s4892_s25 + $0x40] sm:$0xff] %vm341_vm0, %v2458_v42 }
 0x6a4   : > { %v2460_v29 = vpop.f32.mrf.mxu2 }
 0x6a5   : > { %v2461_v46 = vadd.f32 %v2973_v21, %v2460_v29 }
 0x6a7   : > { %2478 = vst.msk [vmem:[%s4892_s25 + $0x48] sm:$0xff] %vm341_vm0, %v2461_v46 }
 0x6ad   : > { %v2463_v20 = vpop.f32.mrf.mxu2 }
 0x6ae   : > { %v2464_v39 = vadd.f32 %v2973_v21, %v2463_v20 }
 0x6b0   : > { %2479 = vst.msk [vmem:[%s4892_s25 + $0x50] sm:$0xff] %vm341_vm0, %v2464_v39 }
 0x6b8   : > { %v2466_v58 = vpop.f32.mrf.mxu2 }
 0x6b9   : > { %v2467_v49 = vadd.f32 %v2973_v21, %v2466_v58 }
 0x6bb   : > { %2480 = vst.msk [vmem:[%s4892_s25 + $0x58] sm:$0xff] %vm341_vm0, %v2467_v49 }
 0x6bc PF: > { %s18_s27 = sadd.s32 1, %s3198_s27  }
 0x6bd   : > { %p15_p5 = scmp.ge.s32.totalorder %s18_s27, 6  }
 0x6bf   :  { %17 = sbr.rel (!%p15_p5) target bundleno = 1 (0x1), region = 88 }

</bundles_post_ra>
